<compile_context>
chip_gen: v5e
topology: v5e:2x2
jax: 0.10.0
libtpu: 0.0.40
codegen_flags: <defaults>
</compile_context>

<pallas_src>
import math
import functools

import jax
import jax.numpy as jnp
from jax.experimental import pallas as pl
from jax.experimental.pallas import tpu as pltpu

EPS = 1e-5                       # layer_norm_eps (elementwise_affine=False everywhere)
MXU_DTYPE = jnp.bfloat16         # matmul-input / hand-off dtype (f32 accumulation)
GELU_C = math.sqrt(2.0 / math.pi)
NEG_INF = -1e30
VMEM_LIMIT = 64 * 1024 * 1024    # explicit scoped-VMEM limit (<= physical on all gens)


def pick_tile(n, pref=256):
    """Largest tile from {256,...,8} that divides `n` and does not exceed `pref`."""
    for t in (256, 128, 64, 32, 16, 8):
        if t <= pref and t <= n and n % t == 0:
            return t
    return n


def _cparams(*sems):
    return pltpu.CompilerParams(dimension_semantics=sems, vmem_limit_bytes=VMEM_LIMIT)


def _ln(x):
    mu = jnp.mean(x, axis=-1, keepdims=True)
    xc = x - mu
    var = jnp.mean(xc * xc, axis=-1, keepdims=True)
    return xc * jax.lax.rsqrt(var + EPS)


def _gelu_tanh(x):
    return 0.5 * x * (1.0 + jnp.tanh(GELU_C * (x + 0.044715 * x * x * x)))


# --------------------------- fused QKVG projection ----------------------------

def _qkvg_kernel(x_ref, w_ref, b_ref, q_ref, k_ref, v_ref, g_ref, *, num_heads, scale):
    H = x_ref.shape[-1]
    D = H // num_heads
    ln = _ln(x_ref[...]).astype(MXU_DTYPE)
    # single lane-dense (tm, 4H) MXU matmul, f32 accumulation
    h4 = jnp.dot(ln, w_ref[...], preferred_element_type=jnp.float32) + b_ref[...]
    g_ref[...] = h4[:, 3 * H:].astype(MXU_DTYPE)            # raw gate (GELU later)
    q = (h4[:, :H] * scale).astype(MXU_DTYPE)                # scale folded into q
    k = h4[:, H:2 * H].astype(MXU_DTYPE)
    v = h4[:, 2 * H:3 * H].astype(MXU_DTYPE)
    for h in range(num_heads):                               # head-major split in-kernel
        sl = slice(h * D, (h + 1) * D)
        q_ref[h] = q[:, sl]
        k_ref[h] = k[:, sl]
        v_ref[h] = v[:, sl]


def qkvg_project(x2d, p, tm, num_heads, scale):
    rows, H = x2d.shape
    D = H // num_heads
    row_spec = pl.BlockSpec((tm, H), lambda i: (i, 0))
    head_spec = pl.BlockSpec((num_heads, tm, D), lambda i: (0, i, 0))
    head_shape = jax.ShapeDtypeStruct((num_heads, rows, D), MXU_DTYPE)
    kernel = functools.partial(_qkvg_kernel, num_heads=num_heads, scale=scale)
    return pl.pallas_call(
        kernel,
        out_shape=(head_shape, head_shape, head_shape,
                   jax.ShapeDtypeStruct((rows, H), MXU_DTYPE)),
        grid=(rows // tm,),
        in_specs=[row_spec,
                  pl.BlockSpec((H, 4 * H), lambda i: (0, 0)),
                  pl.BlockSpec((1, 4 * H), lambda i: (0, 0))],
        out_specs=(head_spec, head_spec, head_spec, row_spec),
        compiler_params=_cparams("parallel"),
    )(x2d, p['w_qkvg'], p['b_qkvg'])


# --------------------------- attention core -----------------------------------

def _attn_core_kernel(q_ref, k_ref, v_ref, qpos_ref, kpos_ref, idx_ref, mask_ref, o_ref):
    R = qpos_ref.shape[1]
    tq = q_ref.shape[2]
    S = k_ref.shape[2]

    q = q_ref[0, 0]                                     # (tq, D) bf16, pre-scaled
    k = k_ref[0, 0]                                     # (S, D)  bf16
    v = v_ref[0, 0]                                     # (S, D)  bf16
    kpos = kpos_ref[0]                                  # (R, D)  bf16
    qpos = qpos_ref[0]                                  # (R, D)  bf16, pre-scaled
    bias = mask_ref[0]                                  # (1, S)  additive (0 / -1e30)
    idx = idx_ref[...]                                  # (tq, S) int32 bucket indices

    dn = (((1,), (1,)), ((), ()))                       # contract last dims (A @ B.T)
    s = jax.lax.dot_general(q, k, dn, preferred_element_type=jnp.float32)       # (tq,S)
    c2p = jax.lax.dot_general(q, kpos, dn, preferred_element_type=jnp.float32)  # (tq,R)
    p2c = jax.lax.dot_general(k, qpos, dn, preferred_element_type=jnp.float32)  # (S,R)

    # fused bucket gather: one (tq,S,R) multiply-reduce for both c2p and p2c
    iota_r = jax.lax.broadcasted_iota(jnp.int32, (tq, S, R), 2)
    onehot = (idx[:, :, None] == iota_r).astype(jnp.float32)
    s = s + jnp.sum((c2p[:, None, :] + p2c[None, :, :]) * onehot, axis=-1)
    s = s + bias

    m = jnp.max(s, axis=-1, keepdims=True)
    e = jnp.exp(s - m)
    p = e * pl.reciprocal(jnp.sum(e, axis=-1, keepdims=True), approx=True)
    # exact zeros on masked keys / fully-masked rows (matches MaskedSoftmax)
    p = p * (bias > -1.0).astype(jnp.float32)

    o_ref[0, 0] = jnp.dot(p.astype(MXU_DTYPE), v,
                          preferred_element_type=jnp.float32).astype(MXU_DTYPE)


def attention_core(q, k, v, qpos, kpos, pos_idx, mask_bias, tq):
    Hn, B, S, D = q.shape
    R = qpos.shape[1]
    q_spec = pl.BlockSpec((1, 1, tq, D), lambda b, h, i: (h, b, i, 0))
    kv_spec = pl.BlockSpec((1, 1, S, D), lambda b, h, i: (h, b, 0, 0))
    tab_spec = pl.BlockSpec((1, R, D), lambda b, h, i: (h, 0, 0))
    return pl.pallas_call(
        _attn_core_kernel,
        out_shape=jax.ShapeDtypeStruct((Hn, B, S, D), MXU_DTYPE),
        grid=(B, Hn, S // tq),
        in_specs=[q_spec, kv_spec, kv_spec, tab_spec, tab_spec,
                  pl.BlockSpec((tq, S), lambda b, h, i: (i, 0)),
                  pl.BlockSpec((1, 1, S), lambda b, h, i: (b, 0, 0))],
        out_specs=q_spec,
        compiler_params=_cparams("parallel", "parallel", "parallel"),
    )(q, k, v, qpos, kpos, pos_idx, mask_bias)


# --------------------------- fused epilogues ----------------------------------

def _attn_out_kernel(x_ref, ctx_ref, gate_ref, w_ref, b_ref, o_ref):
    num_heads = ctx_ref.shape[0]
    # TODO(synk): PyTorch uses exact (erf) GELU for the gate; Mosaic has no
    # guaranteed erf lowering so the tanh approximation is used in-kernel.
    gate = _gelu_tanh(gate_ref[...].astype(jnp.float32))
    ctx = jnp.concatenate(
        [ctx_ref[h].astype(jnp.float32) for h in range(num_heads)], axis=-1)
    y = _ln(ctx * gate).astype(MXU_DTYPE)
    o_ref[...] = (x_ref[...]
                  + jnp.dot(y, w_ref[...], preferred_element_type=jnp.float32)
                  + b_ref[...])


def attn_output(x2d, ctx, gate, wout, bout, tm):
    rows, H = x2d.shape
    Hn, _, D = ctx.shape
    row_spec = pl.BlockSpec((tm, H), lambda i: (i, 0))
    return pl.pallas_call(
        _attn_out_kernel,
        out_shape=jax.ShapeDtypeStruct((rows, H), jnp.float32),
        grid=(rows // tm,),
        in_specs=[row_spec,
                  pl.BlockSpec((Hn, tm, D), lambda i: (0, i, 0)),
                  row_spec,
                  pl.BlockSpec((H, H), lambda i: (0, 0)),
                  pl.BlockSpec((1, H), lambda i: (0, 0))],
        out_specs=row_spec,
        compiler_params=_cparams("parallel"),
    )(x2d, ctx, gate, wout, bout)


def _ffn_kernel(x_ref, w1_ref, w2_ref, o_ref):
    # LN -> Linear(H,2I no bias) -> GeGLU(tanh) -> LN(I) -> Linear(I,H no bias) -> +res
    inter = w2_ref.shape[0]
    x = x_ref[...]
    ln = _ln(x).astype(MXU_DTYPE)
    h1 = jnp.dot(ln, w1_ref[...], preferred_element_type=jnp.float32)   # (tm, 2I)
    y = _ln(h1[:, :inter] * _gelu_tanh(h1[:, inter:])).astype(MXU_DTYPE)
    o_ref[...] = x + jnp.dot(y, w2_ref[...], preferred_element_type=jnp.float32)


def ffn_apply(x2d, pf, tm):
    rows, H = x2d.shape
    I2 = pf['w1'].shape[1]
    I = pf['w2'].shape[0]
    row_spec = pl.BlockSpec((tm, H), lambda i: (i, 0))
    return pl.pallas_call(
        _ffn_kernel,
        out_shape=jax.ShapeDtypeStruct((rows, H), jnp.float32),
        grid=(rows // tm,),
        in_specs=[row_spec,
                  pl.BlockSpec((H, I2), lambda i: (0, 0)),
                  pl.BlockSpec((I, H), lambda i: (0, 0))],
        out_specs=row_spec,
        compiler_params=_cparams("parallel"),
    )(x2d, pf['w1'], pf['w2'])


# --------------------------- DWA combine (populated slices only) --------------

def _dwa_kernel(alpha_ref, *refs):
    ins, o_ref = refs[:-1], refs[-1]
    acc = ins[0][...] * alpha_ref[0]
    for j in range(1, len(ins)):
        acc = acc + ins[j][...] * alpha_ref[j]
    o_ref[...] = acc


def dwa_combine(alpha, tensors, tm):
    # tensors: the populated accumulator slices (kept f32: they ARE the residual stream)
    rows, H = tensors[0].shape
    row_spec = pl.BlockSpec((tm, H), lambda i, a: (i, 0))
    return pl.pallas_call(
        _dwa_kernel,
        out_shape=jax.ShapeDtypeStruct((rows, H), jnp.float32),
        grid_spec=pltpu.PrefetchScalarGridSpec(
            num_scalar_prefetch=1,
            grid=(rows // tm,),
            in_specs=[row_spec] * len(tensors),
            out_specs=pl.BlockSpec((tm, H), lambda i, a: (i, 0)),
        ),
        compiler_params=_cparams("parallel"),
    )(alpha, *tensors)


# --------------------------- glue (plain JAX, jitted) --------------------------

def make_log_bucket_position(relative_pos, bucket_size, max_position):
    sign = jnp.sign(relative_pos)
    mid = bucket_size // 2
    abs_pos = jnp.where(
        (relative_pos < mid) & (relative_pos > -mid),
        mid - 1,
        jnp.minimum(jnp.abs(relative_pos), max_position - 1),
    )
    log_pos = (
        jnp.ceil(
            jnp.log(abs_pos.astype(jnp.float32) / mid)
            / math.log((max_position - 1) / mid)
            * (mid - 1)
        ).astype(jnp.int32)
        + mid
    )
    return jnp.where(abs_pos <= mid, relative_pos, log_pos * sign).astype(jnp.int32)


@functools.partial(jax.jit, static_argnames=("num_heads",))
def encoder_forward(params, x, attention_mask, relative_embedding, pos_idx, *, num_heads):
    S, B, H = x.shape
    D = H // num_heads
    rows = B * S
    R = relative_embedding.shape[0]
    tm = pick_tile(rows)
    # cap the q tile so the (tq, S, R) bucket-gather intermediate stays ~<6 MB
    tq = pick_tile(S, pref=max(8, (6 * 1024 * 1024) // max(1, S * R * 4)))
    scale = 1.0 / math.sqrt(3 * D)

    # key-padding attention mask (bool, True == masked), broadcastable to (B,1,1,S);
    # shipped to the kernel as a tiny (B,1,S) additive key bias.
    maskk = jnp.broadcast_to(attention_mask, (B, 1, 1, S)).reshape(B, 1, S)
    mask_bias = jnp.where(maskk, NEG_INF, 0.0).astype(jnp.float32)

    # batch-major residual stream: one transpose at entry, one at exit.
    x2d = x.transpose(1, 0, 2).reshape(rows, H)

    outputs = [x2d]                       # DWA accumulator slices (f32)
    cur = x2d
    for i, (pa, pf) in enumerate(zip(params['attn'], params['ffn'])):
        # relative-position tables: tiny (R,H)x(H,2H) matmul -> plain XLA
        w_qk = pa['w_qkvg'][:, :2 * H].astype(jnp.float32)
        pos = jnp.dot(relative_embedding, w_qk) + pa['b_qkvg'][0, :2 * H]
        qpos = (pos[:, :H].reshape(R, num_heads, D).transpose(1, 0, 2)
                * scale).astype(MXU_DTYPE)                   # scaled: p2c = k @ (qpos*scale)
        kpos = pos[:, H:].reshape(R, num_heads, D).transpose(1, 0, 2).astype(MXU_DTYPE)

        q, k, v, gate = qkvg_project(cur, pa, tm, num_heads, scale)
        ctx = attention_core(q.reshape(num_heads, B, S, D),
                             k.reshape(num_heads, B, S, D),
                             v.reshape(num_heads, B, S, D),
                             qpos, kpos, pos_idx, mask_bias, tq)     # (Hn,B,S,D) bf16
        cur = attn_output(cur, ctx.reshape(num_heads, rows, D), gate,
                          pa['wout'], pa['bout'], tm)                # x + out_proj(...)
        outputs.append(cur)
        cur = dwa_combine(params['alphas'][2 * i], outputs, tm)

        cur = ffn_apply(cur, pf, tm)
        outputs.append(cur)
        cur = dwa_combine(params['alphas'][2 * i + 1], outputs, tm)

    return cur.reshape(B, S, H).transpose(1, 0, 2)


# --------------------------- parameter init -----------------------------------

def trunc_normal(key, shape, std):
    return jax.random.truncated_normal(key, -2.0, 2.0, shape, jnp.float32) * std


def init_params(key, hidden, inter, n_layers):
    std = math.sqrt(2.0 / (5.0 * hidden))
    params = {'attn': [], 'ffn': [], 'alphas': []}
    for i in range(n_layers):
        key, k0, k1, k2, k3, k4 = jax.random.split(key, 6)
        wqk = trunc_normal(k0, (2 * hidden, hidden), std)      # torch (out, in) layout
        wvg = trunc_normal(k1, (2 * hidden, hidden), std)
        wout = trunc_normal(k2, (hidden, hidden), std)
        # packed (in, out) = (H, 4H) weight, column order [q | k | v | gate]
        w_qkvg = jnp.concatenate([wqk[:hidden].T, wqk[hidden:].T,
                                  wvg[:hidden].T, wvg[hidden:].T], axis=1)
        params['attn'].append({
            'w_qkvg': w_qkvg.astype(MXU_DTYPE),
            'b_qkvg': jnp.zeros((1, 4 * hidden), jnp.float32),
            'wout': wout.T.astype(MXU_DTYPE),
            'bout': jnp.zeros((1, hidden), jnp.float32),
        })
        depth_scale = math.sqrt(1.0 / (2.0 * (1 + i)))
        w1 = trunc_normal(k3, (2 * inter, hidden), std) * depth_scale   # (2I, H)
        w2 = trunc_normal(k4, (hidden, inter), std) * depth_scale       # (H, I)
        params['ffn'].append({
            # packed (H, 2I): [value path | gate path]
            'w1': jnp.concatenate([w1[:inter].T, w1[inter:].T], axis=1).astype(MXU_DTYPE),
            'w2': w2.T.astype(MXU_DTYPE),                                # (I, H)
        })
    for j in range(2 * n_layers):
        params['alphas'].append(jnp.zeros((j + 2,), jnp.float32).at[-1].set(1.0))
    return params


# --------------------------- main ----------------------------------------------

if __name__ == "__main__":
    # small config consistent with the module
    SEQ, BATCH = 16, 2
    HIDDEN, HEADS = 64, 4
    INTER = 96
    LAYERS = 2
    BUCKET = 8            # position_bucket_size
    MAX_POS = 64          # max_position_embeddings

    key = jax.random.PRNGKey(0)
    key, kx, kr, kp = jax.random.split(key, 4)

    x = jax.random.normal(kx, (SEQ, BATCH, HIDDEN), jnp.float32)
    relative_embedding = jax.random.normal(kr, (2 * BUCKET - 1, HIDDEN), jnp.float32) * 0.02

    # padding-style attention mask (True == masked); batch 1 has 3 padded keys
    lengths = jnp.array([SEQ, SEQ - 3])
    pad = jnp.arange(SEQ)[None, :] >= lengths[:, None]        # (B, S)
    attention_mask = pad[:, None, None, :]                    # (B, 1, 1, S) bool

    # relative position bucket indices (buffer in the torch module)
    rel = (jnp.arange(MAX_POS, dtype=jnp.int32)[:, None]
           - jnp.arange(MAX_POS, dtype=jnp.int32)[None, :])
    position_indices = BUCKET - 1 + make_log_bucket_position(rel, BUCKET, MAX_POS)
    pos_idx = position_indices[:SEQ, :SEQ].astype(jnp.int32)

    params = init_params(kp, HIDDEN, INTER, LAYERS)

    out = encoder_forward(params, x, attention_mask, relative_embedding, pos_idx,
                          num_heads=HEADS)
    out = jax.block_until_ready(out)
    assert out.shape == (SEQ, BATCH, HIDDEN)
    assert bool(jnp.all(jnp.isfinite(out)))
    print("KERNEL_OK")
</pallas_src>

<mosaic_0001>
module attributes {stable_mosaic.version = 11 : i64} {
  func.func @_qkvg_kernel(%arg0: i32, %arg1: memref<32x64xf32, #tpu.memory_space<vmem>>, %arg2: memref<64x256xbf16, #tpu.memory_space<vmem>>, %arg3: memref<1x256xf32, #tpu.memory_space<vmem>>, %arg4: memref<4x32x16xbf16, #tpu.memory_space<vmem>>, %arg5: memref<4x32x16xbf16, #tpu.memory_space<vmem>>, %arg6: memref<4x32x16xbf16, #tpu.memory_space<vmem>>, %arg7: memref<32x64xbf16, #tpu.memory_space<vmem>>) attributes {dimension_semantics = [#tpu.dimension_semantics<parallel>], iteration_bounds = array<i64: 1>, scalar_prefetch = 0 : i64, scratch_operands = 0 : i64, tpu.core_type = #tpu.core_type<tc>, window_params = [{transform_indices = @transform_0, window_bounds = array<i64: 32, 64>}, {pipeline_mode = #tpu.pipeline_mode<synchronous>, transform_indices = @transform_1, window_bounds = array<i64: 64, 256>}, {pipeline_mode = #tpu.pipeline_mode<synchronous>, transform_indices = @transform_2, window_bounds = array<i64: 1, 256>}, {transform_indices = @transform_3, window_bounds = array<i64: 4, 32, 16>}, {transform_indices = @transform_4, window_bounds = array<i64: 4, 32, 16>}, {transform_indices = @transform_5, window_bounds = array<i64: 4, 32, 16>}, {transform_indices = @transform_6, window_bounds = array<i64: 32, 64>}]} {
    %c0 = arith.constant 0 : index
    %c0_0 = arith.constant 0 : index
    %0 = vector.load %arg1[%c0, %c0_0] : memref<32x64xf32, #tpu.memory_space<vmem>>, vector<32x64xf32>
    %cst = arith.constant dense<0.000000e+00> : vector<32xf32>
    %1 = vector.multi_reduction <add>, %0, %cst [1] : vector<32x64xf32> to vector<32xf32>
    %2 = vector.shape_cast %1 : vector<32xf32> to vector<32x1xf32>
    %cst_1 = arith.constant 6.400000e+01 : f32
    %3 = vector.broadcast %cst_1 : f32 to vector<32x1xf32>
    %4 = arith.divf %2, %3 : vector<32x1xf32>
    %5 = vector.broadcast %4 : vector<32x1xf32> to vector<32x64xf32>
    %6 = arith.subf %0, %5 : vector<32x64xf32>
    %7 = arith.mulf %6, %6 : vector<32x64xf32>
    %cst_2 = arith.constant dense<0.000000e+00> : vector<32xf32>
    %8 = vector.multi_reduction <add>, %7, %cst_2 [1] : vector<32x64xf32> to vector<32xf32>
    %9 = vector.shape_cast %8 : vector<32xf32> to vector<32x1xf32>
    %cst_3 = arith.constant 6.400000e+01 : f32
    %10 = vector.broadcast %cst_3 : f32 to vector<32x1xf32>
    %11 = arith.divf %9, %10 : vector<32x1xf32>
    %cst_4 = arith.constant 9.99999974E-6 : f32
    %12 = vector.broadcast %cst_4 : f32 to vector<32x1xf32>
    %13 = arith.addf %11, %12 : vector<32x1xf32>
    %14 = math.rsqrt %13 : vector<32x1xf32>
    %15 = vector.broadcast %14 : vector<32x1xf32> to vector<32x64xf32>
    %16 = arith.mulf %6, %15 : vector<32x64xf32>
    %17 = arith.truncf %16 : vector<32x64xf32> to vector<32x64xbf16>
    %c0_5 = arith.constant 0 : index
    %c0_6 = arith.constant 0 : index
    %18 = vector.load %arg2[%c0_5, %c0_6] : memref<64x256xbf16, #tpu.memory_space<vmem>>, vector<64x256xbf16>
    %cst_7 = arith.constant dense<0.000000e+00> : vector<32x256xf32>
    %19 = tpu.matmul %17, %18, %cst_7 {dimension_numbers = #tpu.dot_dimension_numbers<[1], [0], [0], [1], [0, 0, 1, 1], [], []>} : vector<32x64xbf16>, vector<64x256xbf16>, vector<32x256xf32> -> vector<32x256xf32>
    %c0_8 = arith.constant 0 : index
    %c0_9 = arith.constant 0 : index
    %20 = vector.load %arg3[%c0_8, %c0_9] : memref<1x256xf32, #tpu.memory_space<vmem>>, vector<1x256xf32>
    %21 = vector.broadcast %20 : vector<1x256xf32> to vector<32x256xf32>
    %22 = arith.addf %19, %21 : vector<32x256xf32>
    %23 = vector.extract_strided_slice %22 {offsets = [0, 192], sizes = [32, 64], strides = [1, 1]} : vector<32x256xf32> to vector<32x64xf32>
    %24 = arith.truncf %23 : vector<32x64xf32> to vector<32x64xbf16>
    %c0_10 = arith.constant 0 : index
    %c0_11 = arith.constant 0 : index
    %25 = vector.load %arg7[%c0_10, %c0_11] : memref<32x64xbf16, #tpu.memory_space<vmem>>, vector<32x64xbf16>
    tpu.vector_store %arg7[%c0_10, %c0_11], %24 {strides = array<i32>} : memref<32x64xbf16, #tpu.memory_space<vmem>>, vector<32x64xbf16>,
    %26 = vector.extract_strided_slice %22 {offsets = [0, 0], sizes = [32, 64], strides = [1, 1]} : vector<32x256xf32> to vector<32x64xf32>
    %cst_12 = arith.constant 0.144337565 : f32
    %27 = vector.broadcast %cst_12 : f32 to vector<32x64xf32>
    %28 = arith.mulf %26, %27 : vector<32x64xf32>
    %29 = arith.truncf %28 : vector<32x64xf32> to vector<32x64xbf16>
    %30 = vector.extract_strided_slice %22 {offsets = [0, 64], sizes = [32, 64], strides = [1, 1]} : vector<32x256xf32> to vector<32x64xf32>
    %31 = arith.truncf %30 : vector<32x64xf32> to vector<32x64xbf16>
    %32 = vector.extract_strided_slice %22 {offsets = [0, 128], sizes = [32, 64], strides = [1, 1]} : vector<32x256xf32> to vector<32x64xf32>
    %33 = arith.truncf %32 : vector<32x64xf32> to vector<32x64xbf16>
    %34 = vector.extract_strided_slice %29 {offsets = [0, 0], sizes = [32, 16], strides = [1, 1]} : vector<32x64xbf16> to vector<32x16xbf16>
    %c0_13 = arith.constant 0 : index
    %c0_14 = arith.constant 0 : index
    %c0_15 = arith.constant 0 : index
    %35 = vector.load %arg4[%c0_13, %c0_14, %c0_15] : memref<4x32x16xbf16, #tpu.memory_space<vmem>>, vector<1x32x16xbf16>
    %36 = vector.shape_cast %35 : vector<1x32x16xbf16> to vector<32x16xbf16>
    %37 = vector.shape_cast %34 : vector<32x16xbf16> to vector<1x32x16xbf16>
    tpu.vector_store %arg4[%c0_13, %c0_14, %c0_15], %37 {strides = array<i32>} : memref<4x32x16xbf16, #tpu.memory_space<vmem>>, vector<1x32x16xbf16>,
    %38 = vector.extract_strided_slice %31 {offsets = [0, 0], sizes = [32, 16], strides = [1, 1]} : vector<32x64xbf16> to vector<32x16xbf16>
    %c0_16 = arith.constant 0 : index
    %c0_17 = arith.constant 0 : index
    %c0_18 = arith.constant 0 : index
    %39 = vector.load %arg5[%c0_16, %c0_17, %c0_18] : memref<4x32x16xbf16, #tpu.memory_space<vmem>>, vector<1x32x16xbf16>
    %40 = vector.shape_cast %39 : vector<1x32x16xbf16> to vector<32x16xbf16>
    %41 = vector.shape_cast %38 : vector<32x16xbf16> to vector<1x32x16xbf16>
    tpu.vector_store %arg5[%c0_16, %c0_17, %c0_18], %41 {strides = array<i32>} : memref<4x32x16xbf16, #tpu.memory_space<vmem>>, vector<1x32x16xbf16>,
    %42 = vector.extract_strided_slice %33 {offsets = [0, 0], sizes = [32, 16], strides = [1, 1]} : vector<32x64xbf16> to vector<32x16xbf16>
    %c0_19 = arith.constant 0 : index
    %c0_20 = arith.constant 0 : index
    %c0_21 = arith.constant 0 : index
    %43 = vector.load %arg6[%c0_19, %c0_20, %c0_21] : memref<4x32x16xbf16, #tpu.memory_space<vmem>>, vector<1x32x16xbf16>
    %44 = vector.shape_cast %43 : vector<1x32x16xbf16> to vector<32x16xbf16>
    %45 = vector.shape_cast %42 : vector<32x16xbf16> to vector<1x32x16xbf16>
    tpu.vector_store %arg6[%c0_19, %c0_20, %c0_21], %45 {strides = array<i32>} : memref<4x32x16xbf16, #tpu.memory_space<vmem>>, vector<1x32x16xbf16>,
    %46 = vector.extract_strided_slice %29 {offsets = [0, 16], sizes = [32, 16], strides = [1, 1]} : vector<32x64xbf16> to vector<32x16xbf16>
    %c1 = arith.constant 1 : index
    %c0_22 = arith.constant 0 : index
    %c0_23 = arith.constant 0 : index
    %47 = vector.load %arg4[%c1, %c0_22, %c0_23] : memref<4x32x16xbf16, #tpu.memory_space<vmem>>, vector<1x32x16xbf16>
    %48 = vector.shape_cast %47 : vector<1x32x16xbf16> to vector<32x16xbf16>
    %49 = vector.shape_cast %46 : vector<32x16xbf16> to vector<1x32x16xbf16>
    tpu.vector_store %arg4[%c1, %c0_22, %c0_23], %49 {strides = array<i32>} : memref<4x32x16xbf16, #tpu.memory_space<vmem>>, vector<1x32x16xbf16>,
    %50 = vector.extract_strided_slice %31 {offsets = [0, 16], sizes = [32, 16], strides = [1, 1]} : vector<32x64xbf16> to vector<32x16xbf16>
    %c1_24 = arith.constant 1 : index
    %c0_25 = arith.constant 0 : index
    %c0_26 = arith.constant 0 : index
    %51 = vector.load %arg5[%c1_24, %c0_25, %c0_26] : memref<4x32x16xbf16, #tpu.memory_space<vmem>>, vector<1x32x16xbf16>
    %52 = vector.shape_cast %51 : vector<1x32x16xbf16> to vector<32x16xbf16>
    %53 = vector.shape_cast %50 : vector<32x16xbf16> to vector<1x32x16xbf16>
    tpu.vector_store %arg5[%c1_24, %c0_25, %c0_26], %53 {strides = array<i32>} : memref<4x32x16xbf16, #tpu.memory_space<vmem>>, vector<1x32x16xbf16>,
    %54 = vector.extract_strided_slice %33 {offsets = [0, 16], sizes = [32, 16], strides = [1, 1]} : vector<32x64xbf16> to vector<32x16xbf16>
    %c1_27 = arith.constant 1 : index
    %c0_28 = arith.constant 0 : index
    %c0_29 = arith.constant 0 : index
    %55 = vector.load %arg6[%c1_27, %c0_28, %c0_29] : memref<4x32x16xbf16, #tpu.memory_space<vmem>>, vector<1x32x16xbf16>
    %56 = vector.shape_cast %55 : vector<1x32x16xbf16> to vector<32x16xbf16>
    %57 = vector.shape_cast %54 : vector<32x16xbf16> to vector<1x32x16xbf16>
    tpu.vector_store %arg6[%c1_27, %c0_28, %c0_29], %57 {strides = array<i32>} : memref<4x32x16xbf16, #tpu.memory_space<vmem>>, vector<1x32x16xbf16>,
    %58 = vector.extract_strided_slice %29 {offsets = [0, 32], sizes = [32, 16], strides = [1, 1]} : vector<32x64xbf16> to vector<32x16xbf16>
    %c2 = arith.constant 2 : index
    %c0_30 = arith.constant 0 : index
    %c0_31 = arith.constant 0 : index
    %59 = vector.load %arg4[%c2, %c0_30, %c0_31] : memref<4x32x16xbf16, #tpu.memory_space<vmem>>, vector<1x32x16xbf16>
    %60 = vector.shape_cast %59 : vector<1x32x16xbf16> to vector<32x16xbf16>
    %61 = vector.shape_cast %58 : vector<32x16xbf16> to vector<1x32x16xbf16>
    tpu.vector_store %arg4[%c2, %c0_30, %c0_31], %61 {strides = array<i32>} : memref<4x32x16xbf16, #tpu.memory_space<vmem>>, vector<1x32x16xbf16>,
    %62 = vector.extract_strided_slice %31 {offsets = [0, 32], sizes = [32, 16], strides = [1, 1]} : vector<32x64xbf16> to vector<32x16xbf16>
    %c2_32 = arith.constant 2 : index
    %c0_33 = arith.constant 0 : index
    %c0_34 = arith.constant 0 : index
    %63 = vector.load %arg5[%c2_32, %c0_33, %c0_34] : memref<4x32x16xbf16, #tpu.memory_space<vmem>>, vector<1x32x16xbf16>
    %64 = vector.shape_cast %63 : vector<1x32x16xbf16> to vector<32x16xbf16>
    %65 = vector.shape_cast %62 : vector<32x16xbf16> to vector<1x32x16xbf16>
    tpu.vector_store %arg5[%c2_32, %c0_33, %c0_34], %65 {strides = array<i32>} : memref<4x32x16xbf16, #tpu.memory_space<vmem>>, vector<1x32x16xbf16>,
    %66 = vector.extract_strided_slice %33 {offsets = [0, 32], sizes = [32, 16], strides = [1, 1]} : vector<32x64xbf16> to vector<32x16xbf16>
    %c2_35 = arith.constant 2 : index
    %c0_36 = arith.constant 0 : index
    %c0_37 = arith.constant 0 : index
    %67 = vector.load %arg6[%c2_35, %c0_36, %c0_37] : memref<4x32x16xbf16, #tpu.memory_space<vmem>>, vector<1x32x16xbf16>
    %68 = vector.shape_cast %67 : vector<1x32x16xbf16> to vector<32x16xbf16>
    %69 = vector.shape_cast %66 : vector<32x16xbf16> to vector<1x32x16xbf16>
    tpu.vector_store %arg6[%c2_35, %c0_36, %c0_37], %69 {strides = array<i32>} : memref<4x32x16xbf16, #tpu.memory_space<vmem>>, vector<1x32x16xbf16>,
    %70 = vector.extract_strided_slice %29 {offsets = [0, 48], sizes = [32, 16], strides = [1, 1]} : vector<32x64xbf16> to vector<32x16xbf16>
    %c3 = arith.constant 3 : index
    %c0_38 = arith.constant 0 : index
    %c0_39 = arith.constant 0 : index
    %71 = vector.load %arg4[%c3, %c0_38, %c0_39] : memref<4x32x16xbf16, #tpu.memory_space<vmem>>, vector<1x32x16xbf16>
    %72 = vector.shape_cast %71 : vector<1x32x16xbf16> to vector<32x16xbf16>
    %73 = vector.shape_cast %70 : vector<32x16xbf16> to vector<1x32x16xbf16>
    tpu.vector_store %arg4[%c3, %c0_38, %c0_39], %73 {strides = array<i32>} : memref<4x32x16xbf16, #tpu.memory_space<vmem>>, vector<1x32x16xbf16>,
    %74 = vector.extract_strided_slice %31 {offsets = [0, 48], sizes = [32, 16], strides = [1, 1]} : vector<32x64xbf16> to vector<32x16xbf16>
    %c3_40 = arith.constant 3 : index
    %c0_41 = arith.constant 0 : index
    %c0_42 = arith.constant 0 : index
    %75 = vector.load %arg5[%c3_40, %c0_41, %c0_42] : memref<4x32x16xbf16, #tpu.memory_space<vmem>>, vector<1x32x16xbf16>
    %76 = vector.shape_cast %75 : vector<1x32x16xbf16> to vector<32x16xbf16>
    %77 = vector.shape_cast %74 : vector<32x16xbf16> to vector<1x32x16xbf16>
    tpu.vector_store %arg5[%c3_40, %c0_41, %c0_42], %77 {strides = array<i32>} : memref<4x32x16xbf16, #tpu.memory_space<vmem>>, vector<1x32x16xbf16>,
    %78 = vector.extract_strided_slice %33 {offsets = [0, 48], sizes = [32, 16], strides = [1, 1]} : vector<32x64xbf16> to vector<32x16xbf16>
    %c3_43 = arith.constant 3 : index
    %c0_44 = arith.constant 0 : index
    %c0_45 = arith.constant 0 : index
    %79 = vector.load %arg6[%c3_43, %c0_44, %c0_45] : memref<4x32x16xbf16, #tpu.memory_space<vmem>>, vector<1x32x16xbf16>
    %80 = vector.shape_cast %79 : vector<1x32x16xbf16> to vector<32x16xbf16>
    %81 = vector.shape_cast %78 : vector<32x16xbf16> to vector<1x32x16xbf16>
    tpu.vector_store %arg6[%c3_43, %c0_44, %c0_45], %81 {strides = array<i32>} : memref<4x32x16xbf16, #tpu.memory_space<vmem>>, vector<1x32x16xbf16>,
    return
  }
  func.func @transform_0(%arg0: i32) -> (i32, i32) {
    %c0_i32 = arith.constant 0 : i32
    %c0_i32_0 = arith.constant 0 : i32
    return %arg0, %c0_i32 : i32, i32
  }
  func.func @transform_1(%arg0: i32) -> (i32, i32) {
    %c0_i32 = arith.constant 0 : i32
    %c0_i32_0 = arith.constant 0 : i32
    %c0_i32_1 = arith.constant 0 : i32
    return %c0_i32, %c0_i32_0 : i32, i32
  }
  func.func @transform_2(%arg0: i32) -> (i32, i32) {
    %c0_i32 = arith.constant 0 : i32
    %c0_i32_0 = arith.constant 0 : i32
    %c0_i32_1 = arith.constant 0 : i32
    return %c0_i32, %c0_i32_0 : i32, i32
  }
  func.func @transform_3(%arg0: i32) -> (i32, i32, i32) {
    %c0_i32 = arith.constant 0 : i32
    %c0_i32_0 = arith.constant 0 : i32
    %c0_i32_1 = arith.constant 0 : i32
    return %c0_i32, %arg0, %c0_i32_0 : i32, i32, i32
  }
  func.func @transform_4(%arg0: i32) -> (i32, i32, i32) {
    %c0_i32 = arith.constant 0 : i32
    %c0_i32_0 = arith.constant 0 : i32
    %c0_i32_1 = arith.constant 0 : i32
    return %c0_i32, %arg0, %c0_i32_0 : i32, i32, i32
  }
  func.func @transform_5(%arg0: i32) -> (i32, i32, i32) {
    %c0_i32 = arith.constant 0 : i32
    %c0_i32_0 = arith.constant 0 : i32
    %c0_i32_1 = arith.constant 0 : i32
    return %c0_i32, %arg0, %c0_i32_0 : i32, i32, i32
  }
  func.func @transform_6(%arg0: i32) -> (i32, i32) {
    %c0_i32 = arith.constant 0 : i32
    %c0_i32_0 = arith.constant 0 : i32
    return %arg0, %c0_i32 : i32, i32
  }
}

module attributes {stable_mosaic.version = 11 : i64} {
  func.func @_dwa_kernel(%arg0: i32, %arg1: memref<2xf32, #tpu.memory_space<smem>>, %arg2: memref<32x64xf32, #tpu.memory_space<vmem>>, %arg3: memref<32x64xf32, #tpu.memory_space<vmem>>, %arg4: memref<32x64xf32, #tpu.memory_space<vmem>>) attributes {dimension_semantics = [#tpu.dimension_semantics<parallel>], iteration_bounds = array<i64: 1>, scalar_prefetch = 1 : i64, scratch_operands = 0 : i64, tpu.core_type = #tpu.core_type<tc>, window_params = [{transform_indices = @transform_0, window_bounds = array<i64: 32, 64>}, {transform_indices = @transform_1, window_bounds = array<i64: 32, 64>}, {transform_indices = @transform_2, window_bounds = array<i64: 32, 64>}]} {
    %c0 = arith.constant 0 : index
    %c0_0 = arith.constant 0 : index
    %0 = vector.load %arg2[%c0, %c0_0] : memref<32x64xf32, #tpu.memory_space<vmem>>, vector<32x64xf32>
    %c0_1 = arith.constant 0 : index
    %1 = memref.load %arg1[%c0_1] : memref<2xf32, #tpu.memory_space<smem>>
    %2 = vector.broadcast %1 : f32 to vector<32x64xf32>
    %3 = arith.mulf %0, %2 : vector<32x64xf32>
    %c0_2 = arith.constant 0 : index
    %c0_3 = arith.constant 0 : index
    %4 = vector.load %arg3[%c0_2, %c0_3] : memref<32x64xf32, #tpu.memory_space<vmem>>, vector<32x64xf32>
    %c1 = arith.constant 1 : index
    %5 = memref.load %arg1[%c1] : memref<2xf32, #tpu.memory_space<smem>>
    %6 = vector.broadcast %5 : f32 to vector<32x64xf32>
    %7 = arith.mulf %4, %6 : vector<32x64xf32>
    %8 = arith.addf %3, %7 : vector<32x64xf32>
    %c0_4 = arith.constant 0 : index
    %c0_5 = arith.constant 0 : index
    %9 = vector.load %arg4[%c0_4, %c0_5] : memref<32x64xf32, #tpu.memory_space<vmem>>, vector<32x64xf32>
    tpu.vector_store %arg4[%c0_4, %c0_5], %8 {strides = array<i32>} : memref<32x64xf32, #tpu.memory_space<vmem>>, vector<32x64xf32>,
    return
  }
  func.func @transform_0(%arg0: i32, %arg1: memref<2xf32, #tpu.memory_space<smem>>) -> (i32, i32) {
    %c0_i32 = arith.constant 0 : i32
    %c0_i32_0 = arith.constant 0 : i32
    return %arg0, %c0_i32 : i32, i32
  }
  func.func @transform_1(%arg0: i32, %arg1: memref<2xf32, #tpu.memory_space<smem>>) -> (i32, i32) {
    %c0_i32 = arith.constant 0 : i32
    %c0_i32_0 = arith.constant 0 : i32
    return %arg0, %c0_i32 : i32, i32
  }
  func.func @transform_2(%arg0: i32, %arg1: memref<2xf32, #tpu.memory_space<smem>>) -> (i32, i32) {
    %c0_i32 = arith.constant 0 : i32
    %c0_i32_0 = arith.constant 0 : i32
    return %arg0, %c0_i32 : i32, i32
  }
}

module attributes {stable_mosaic.version = 11 : i64} {
  func.func @_attn_core_kernel(%arg0: i32, %arg1: i32, %arg2: i32, %arg3: memref<1x1x16x16xbf16, #tpu.memory_space<vmem>>, %arg4: memref<1x1x16x16xbf16, #tpu.memory_space<vmem>>, %arg5: memref<1x1x16x16xbf16, #tpu.memory_space<vmem>>, %arg6: memref<1x15x16xbf16, #tpu.memory_space<vmem>>, %arg7: memref<1x15x16xbf16, #tpu.memory_space<vmem>>, %arg8: memref<16x16xi32, #tpu.memory_space<vmem>>, %arg9: memref<1x1x16xf32, #tpu.memory_space<vmem>>, %arg10: memref<1x1x16x16xbf16, #tpu.memory_space<vmem>>) attributes {dimension_semantics = [#tpu.dimension_semantics<parallel>, #tpu.dimension_semantics<parallel>, #tpu.dimension_semantics<parallel>], iteration_bounds = array<i64: 2, 4, 1>, scalar_prefetch = 0 : i64, scratch_operands = 0 : i64, tpu.core_type = #tpu.core_type<tc>, window_params = [{transform_indices = @transform_0, window_bounds = array<i64: 1, 1, 16, 16>}, {transform_indices = @transform_1, window_bounds = array<i64: 1, 1, 16, 16>}, {transform_indices = @transform_2, window_bounds = array<i64: 1, 1, 16, 16>}, {transform_indices = @transform_3, window_bounds = array<i64: 1, 15, 16>}, {transform_indices = @transform_4, window_bounds = array<i64: 1, 15, 16>}, {transform_indices = @transform_5, window_bounds = array<i64: 16, 16>}, {transform_indices = @transform_6, window_bounds = array<i64: 1, 1, 16>}, {transform_indices = @transform_7, window_bounds = array<i64: 1, 1, 16, 16>}]} {
    %c0 = arith.constant 0 : index
    %c0_0 = arith.constant 0 : index
    %c0_1 = arith.constant 0 : index
    %c0_2 = arith.constant 0 : index
    %0 = vector.load %arg3[%c0, %c0_0, %c0_1, %c0_2] : memref<1x1x16x16xbf16, #tpu.memory_space<vmem>>, vector<1x1x16x16xbf16>
    %1 = vector.shape_cast %0 : vector<1x1x16x16xbf16> to vector<16x16xbf16>
    %c0_3 = arith.constant 0 : index
    %c0_4 = arith.constant 0 : index
    %c0_5 = arith.constant 0 : index
    %c0_6 = arith.constant 0 : index
    %2 = vector.load %arg4[%c0_3, %c0_4, %c0_5, %c0_6] : memref<1x1x16x16xbf16, #tpu.memory_space<vmem>>, vector<1x1x16x16xbf16>
    %3 = vector.shape_cast %2 : vector<1x1x16x16xbf16> to vector<16x16xbf16>
    %c0_7 = arith.constant 0 : index
    %c0_8 = arith.constant 0 : index
    %c0_9 = arith.constant 0 : index
    %c0_10 = arith.constant 0 : index
    %4 = vector.load %arg5[%c0_7, %c0_8, %c0_9, %c0_10] : memref<1x1x16x16xbf16, #tpu.memory_space<vmem>>, vector<1x1x16x16xbf16>
    %5 = vector.shape_cast %4 : vector<1x1x16x16xbf16> to vector<16x16xbf16>
    %c0_11 = arith.constant 0 : index
    %c0_12 = arith.constant 0 : index
    %c0_13 = arith.constant 0 : index
    %6 = vector.load %arg7[%c0_11, %c0_12, %c0_13] : memref<1x15x16xbf16, #tpu.memory_space<vmem>>, vector<1x15x16xbf16>
    %7 = vector.shape_cast %6 : vector<1x15x16xbf16> to vector<15x16xbf16>
    %c0_14 = arith.constant 0 : index
    %c0_15 = arith.constant 0 : index
    %c0_16 = arith.constant 0 : index
    %8 = vector.load %arg6[%c0_14, %c0_15, %c0_16] : memref<1x15x16xbf16, #tpu.memory_space<vmem>>, vector<1x15x16xbf16>
    %9 = vector.shape_cast %8 : vector<1x15x16xbf16> to vector<15x16xbf16>
    %c0_17 = arith.constant 0 : index
    %c0_18 = arith.constant 0 : index
    %c0_19 = arith.constant 0 : index
    %10 = vector.load %arg9[%c0_17, %c0_18, %c0_19] : memref<1x1x16xf32, #tpu.memory_space<vmem>>, vector<1x1x16xf32>
    %11 = vector.shape_cast %10 : vector<1x1x16xf32> to vector<1x16xf32>
    %c0_20 = arith.constant 0 : index
    %c0_21 = arith.constant 0 : index
    %12 = vector.load %arg8[%c0_20, %c0_21] : memref<16x16xi32, #tpu.memory_space<vmem>>, vector<16x16xi32>
    %cst = arith.constant dense<0.000000e+00> : vector<16x16xf32>
    %13 = tpu.matmul %1, %3, %cst {dimension_numbers = #tpu.dot_dimension_numbers<[1], [1], [0], [0], [0, 0, 1, 0], [], []>} : vector<16x16xbf16>, vector<16x16xbf16>, vector<16x16xf32> -> vector<16x16xf32>
    %cst_22 = arith.constant dense<0.000000e+00> : vector<16x15xf32>
    %14 = tpu.matmul %1, %7, %cst_22 {dimension_numbers = #tpu.dot_dimension_numbers<[1], [1], [0], [0], [0, 0, 1, 0], [], []>} : vector<16x16xbf16>, vector<15x16xbf16>, vector<16x15xf32> -> vector<16x15xf32>
    %cst_23 = arith.constant dense<0.000000e+00> : vector<16x15xf32>
    %15 = tpu.matmul %3, %9, %cst_23 {dimension_numbers = #tpu.dot_dimension_numbers<[1], [1], [0], [0], [0, 0, 1, 0], [], []>} : vector<16x16xbf16>, vector<15x16xbf16>, vector<16x15xf32> -> vector<16x15xf32>
    %16 = tpu.iota {dimensions = array<i32: 2>} : vector<16x16x15xi32>
    %17 = vector.shape_cast %12 : vector<16x16xi32> to vector<16x16x1xi32>
    %18 = vector.broadcast %17 : vector<16x16x1xi32> to vector<16x16x15xi32>
    %19 = arith.cmpi eq, %18, %16 : vector<16x16x15xi32>
    %20 = arith.extui %19 : vector<16x16x15xi1> to vector<16x16x15xi32>
    %21 = arith.sitofp %20 : vector<16x16x15xi32> to vector<16x16x15xf32>
    %22 = vector.shape_cast %14 : vector<16x15xf32> to vector<16x1x15xf32>
    %23 = vector.shape_cast %15 : vector<16x15xf32> to vector<1x16x15xf32>
    %24 = vector.broadcast %22 : vector<16x1x15xf32> to vector<16x16x15xf32>
    %25 = vector.broadcast %23 : vector<1x16x15xf32> to vector<16x16x15xf32>
    %26 = arith.addf %24, %25 : vector<16x16x15xf32>
    %27 = arith.mulf %26, %21 : vector<16x16x15xf32>
    %cst_24 = arith.constant dense<0.000000e+00> : vector<16x16xf32>
    %28 = vector.multi_reduction <add>, %27, %cst_24 [2] : vector<16x16x15xf32> to vector<16x16xf32>
    %29 = arith.addf %13, %28 : vector<16x16xf32>
    %30 = vector.broadcast %11 : vector<1x16xf32> to vector<16x16xf32>
    %31 = arith.addf %29, %30 : vector<16x16xf32>
    %cst_25 = arith.constant dense<0xFF800000> : vector<16xf32>
    %32 = vector.multi_reduction <maximumf>, %31, %cst_25 [1] : vector<16x16xf32> to vector<16xf32>
    %33 = vector.shape_cast %32 : vector<16xf32> to vector<16x1xf32>
    %34 = vector.broadcast %33 : vector<16x1xf32> to vector<16x16xf32>
    %35 = arith.subf %31, %34 : vector<16x16xf32>
    %36 = math.exp %35 : vector<16x16xf32>
    %cst_26 = arith.constant dense<0.000000e+00> : vector<16xf32>
    %37 = vector.multi_reduction <add>, %36, %cst_26 [1] : vector<16x16xf32> to vector<16xf32>
    %38 = vector.shape_cast %37 : vector<16xf32> to vector<16x1xf32>
    %39 = tpu.reciprocal %38 {approx = true} : vector<16x1xf32> -> vector<16x1xf32>
    %40 = vector.broadcast %39 : vector<16x1xf32> to vector<16x16xf32>
    %41 = arith.mulf %36, %40 : vector<16x16xf32>
    %cst_27 = arith.constant -1.000000e+00 : f32
    %42 = vector.broadcast %cst_27 : f32 to vector<1x16xf32>
    %43 = arith.cmpf ogt, %11, %42 : vector<1x16xf32>
    %44 = arith.extui %43 : vector<1x16xi1> to vector<1x16xi32>
    %45 = arith.sitofp %44 : vector<1x16xi32> to vector<1x16xf32>
    %46 = vector.broadcast %45 : vector<1x16xf32> to vector<16x16xf32>
    %47 = arith.mulf %41, %46 : vector<16x16xf32>
    %48 = arith.truncf %47 : vector<16x16xf32> to vector<16x16xbf16>
    %cst_28 = arith.constant dense<0.000000e+00> : vector<16x16xf32>
    %49 = tpu.matmul %48, %5, %cst_28 {dimension_numbers = #tpu.dot_dimension_numbers<[1], [0], [0], [1], [0, 0, 1, 1], [], []>} : vector<16x16xbf16>, vector<16x16xbf16>, vector<16x16xf32> -> vector<16x16xf32>
    %50 = arith.truncf %49 : vector<16x16xf32> to vector<16x16xbf16>
    %c0_29 = arith.constant 0 : index
    %c0_30 = arith.constant 0 : index
    %c0_31 = arith.constant 0 : index
    %c0_32 = arith.constant 0 : index
    %51 = vector.load %arg10[%c0_29, %c0_30, %c0_31, %c0_32] : memref<1x1x16x16xbf16, #tpu.memory_space<vmem>>, vector<1x1x16x16xbf16>
    %52 = vector.shape_cast %51 : vector<1x1x16x16xbf16> to vector<16x16xbf16>
    %53 = vector.shape_cast %50 : vector<16x16xbf16> to vector<1x1x16x16xbf16>
    tpu.vector_store %arg10[%c0_29, %c0_30, %c0_31, %c0_32], %53 {strides = array<i32>} : memref<1x1x16x16xbf16, #tpu.memory_space<vmem>>, vector<1x1x16x16xbf16>,
    return
  }
  func.func @transform_0(%arg0: i32, %arg1: i32, %arg2: i32) -> (i32, i32, i32, i32) {
    %c0_i32 = arith.constant 0 : i32
    %c0_i32_0 = arith.constant 0 : i32
    return %arg1, %arg0, %arg2, %c0_i32 : i32, i32, i32, i32
  }
  func.func @transform_1(%arg0: i32, %arg1: i32, %arg2: i32) -> (i32, i32, i32, i32) {
    %c0_i32 = arith.constant 0 : i32
    %c0_i32_0 = arith.constant 0 : i32
    %c0_i32_1 = arith.constant 0 : i32
    return %arg1, %arg0, %c0_i32, %c0_i32_0 : i32, i32, i32, i32
  }
  func.func @transform_2(%arg0: i32, %arg1: i32, %arg2: i32) -> (i32, i32, i32, i32) {
    %c0_i32 = arith.constant 0 : i32
    %c0_i32_0 = arith.constant 0 : i32
    %c0_i32_1 = arith.constant 0 : i32
    return %arg1, %arg0, %c0_i32, %c0_i32_0 : i32, i32, i32, i32
  }
  func.func @transform_3(%arg0: i32, %arg1: i32, %arg2: i32) -> (i32, i32, i32) {
    %c0_i32 = arith.constant 0 : i32
    %c0_i32_0 = arith.constant 0 : i32
    %c0_i32_1 = arith.constant 0 : i32
    return %arg1, %c0_i32, %c0_i32_0 : i32, i32, i32
  }
  func.func @transform_4(%arg0: i32, %arg1: i32, %arg2: i32) -> (i32, i32, i32) {
    %c0_i32 = arith.constant 0 : i32
    %c0_i32_0 = arith.constant 0 : i32
    %c0_i32_1 = arith.constant 0 : i32
    return %arg1, %c0_i32, %c0_i32_0 : i32, i32, i32
  }
  func.func @transform_5(%arg0: i32, %arg1: i32, %arg2: i32) -> (i32, i32) {
    %c0_i32 = arith.constant 0 : i32
    %c0_i32_0 = arith.constant 0 : i32
    return %arg2, %c0_i32 : i32, i32
  }
  func.func @transform_6(%arg0: i32, %arg1: i32, %arg2: i32) -> (i32, i32, i32) {
    %c0_i32 = arith.constant 0 : i32
    %c0_i32_0 = arith.constant 0 : i32
    %c0_i32_1 = arith.constant 0 : i32
    return %arg0, %c0_i32, %c0_i32_0 : i32, i32, i32
  }
  func.func @transform_7(%arg0: i32, %arg1: i32, %arg2: i32) -> (i32, i32, i32, i32) {
    %c0_i32 = arith.constant 0 : i32
    %c0_i32_0 = arith.constant 0 : i32
    return %arg1, %arg0, %arg2, %c0_i32 : i32, i32, i32, i32
  }
}

module attributes {stable_mosaic.version = 11 : i64} {
  func.func @_attn_out_kernel(%arg0: i32, %arg1: memref<32x64xf32, #tpu.memory_space<vmem>>, %arg2: memref<4x32x16xbf16, #tpu.memory_space<vmem>>, %arg3: memref<32x64xbf16, #tpu.memory_space<vmem>>, %arg4: memref<64x64xbf16, #tpu.memory_space<vmem>>, %arg5: memref<1x64xf32, #tpu.memory_space<vmem>>, %arg6: memref<32x64xf32, #tpu.memory_space<vmem>>) attributes {dimension_semantics = [#tpu.dimension_semantics<parallel>], iteration_bounds = array<i64: 1>, scalar_prefetch = 0 : i64, scratch_operands = 0 : i64, tpu.core_type = #tpu.core_type<tc>, window_params = [{transform_indices = @transform_0, window_bounds = array<i64: 32, 64>}, {transform_indices = @transform_1, window_bounds = array<i64: 4, 32, 16>}, {transform_indices = @transform_2, window_bounds = array<i64: 32, 64>}, {pipeline_mode = #tpu.pipeline_mode<synchronous>, transform_indices = @transform_3, window_bounds = array<i64: 64, 64>}, {pipeline_mode = #tpu.pipeline_mode<synchronous>, transform_indices = @transform_4, window_bounds = array<i64: 1, 64>}, {transform_indices = @transform_5, window_bounds = array<i64: 32, 64>}]} {
    %c0 = arith.constant 0 : index
    %c0_0 = arith.constant 0 : index
    %0 = vector.load %arg3[%c0, %c0_0] : memref<32x64xbf16, #tpu.memory_space<vmem>>, vector<32x64xbf16>
    %1 = arith.extf %0 : vector<32x64xbf16> to vector<32x64xf32>
    %cst = arith.constant 5.000000e-01 : f32
    %2 = vector.broadcast %cst : f32 to vector<32x64xf32>
    %3 = arith.mulf %2, %1 : vector<32x64xf32>
    %cst_1 = arith.constant 4.471500e-02 : f32
    %4 = vector.broadcast %cst_1 : f32 to vector<32x64xf32>
    %5 = arith.mulf %4, %1 : vector<32x64xf32>
    %6 = arith.mulf %5, %1 : vector<32x64xf32>
    %7 = arith.mulf %6, %1 : vector<32x64xf32>
    %8 = arith.addf %1, %7 : vector<32x64xf32>
    %cst_2 = arith.constant 0.797884583 : f32
    %9 = vector.broadcast %cst_2 : f32 to vector<32x64xf32>
    %10 = arith.mulf %9, %8 : vector<32x64xf32>
    %11 = math.tanh %10 : vector<32x64xf32>
    %cst_3 = arith.constant 1.000000e+00 : f32
    %12 = vector.broadcast %cst_3 : f32 to vector<32x64xf32>
    %13 = arith.addf %12, %11 : vector<32x64xf32>
    %14 = arith.mulf %3, %13 : vector<32x64xf32>
    %c0_4 = arith.constant 0 : index
    %c0_5 = arith.constant 0 : index
    %c0_6 = arith.constant 0 : index
    %15 = vector.load %arg2[%c0_4, %c0_5, %c0_6] : memref<4x32x16xbf16, #tpu.memory_space<vmem>>, vector<1x32x16xbf16>
    %16 = vector.shape_cast %15 : vector<1x32x16xbf16> to vector<32x16xbf16>
    %17 = arith.extf %16 : vector<32x16xbf16> to vector<32x16xf32>
    %c1 = arith.constant 1 : index
    %c0_7 = arith.constant 0 : index
    %c0_8 = arith.constant 0 : index
    %18 = vector.load %arg2[%c1, %c0_7, %c0_8] : memref<4x32x16xbf16, #tpu.memory_space<vmem>>, vector<1x32x16xbf16>
    %19 = vector.shape_cast %18 : vector<1x32x16xbf16> to vector<32x16xbf16>
    %20 = arith.extf %19 : vector<32x16xbf16> to vector<32x16xf32>
    %c2 = arith.constant 2 : index
    %c0_9 = arith.constant 0 : index
    %c0_10 = arith.constant 0 : index
    %21 = vector.load %arg2[%c2, %c0_9, %c0_10] : memref<4x32x16xbf16, #tpu.memory_space<vmem>>, vector<1x32x16xbf16>
    %22 = vector.shape_cast %21 : vector<1x32x16xbf16> to vector<32x16xbf16>
    %23 = arith.extf %22 : vector<32x16xbf16> to vector<32x16xf32>
    %c3 = arith.constant 3 : index
    %c0_11 = arith.constant 0 : index
    %c0_12 = arith.constant 0 : index
    %24 = vector.load %arg2[%c3, %c0_11, %c0_12] : memref<4x32x16xbf16, #tpu.memory_space<vmem>>, vector<1x32x16xbf16>
    %25 = vector.shape_cast %24 : vector<1x32x16xbf16> to vector<32x16xbf16>
    %26 = arith.extf %25 : vector<32x16xbf16> to vector<32x16xf32>
    %27 = tpu.concatenate %17, %20, %23, %26 in 1 : vector<32x16xf32>, vector<32x16xf32>, vector<32x16xf32>, vector<32x16xf32> -> vector<32x64xf32>
    %28 = arith.mulf %27, %14 : vector<32x64xf32>
    %cst_13 = arith.constant dense<0.000000e+00> : vector<32xf32>
    %29 = vector.multi_reduction <add>, %28, %cst_13 [1] : vector<32x64xf32> to vector<32xf32>
    %30 = vector.shape_cast %29 : vector<32xf32> to vector<32x1xf32>
    %cst_14 = arith.constant 6.400000e+01 : f32
    %31 = vector.broadcast %cst_14 : f32 to vector<32x1xf32>
    %32 = arith.divf %30, %31 : vector<32x1xf32>
    %33 = vector.broadcast %32 : vector<32x1xf32> to vector<32x64xf32>
    %34 = arith.subf %28, %33 : vector<32x64xf32>
    %35 = arith.mulf %34, %34 : vector<32x64xf32>
    %cst_15 = arith.constant dense<0.000000e+00> : vector<32xf32>
    %36 = vector.multi_reduction <add>, %35, %cst_15 [1] : vector<32x64xf32> to vector<32xf32>
    %37 = vector.shape_cast %36 : vector<32xf32> to vector<32x1xf32>
    %cst_16 = arith.constant 6.400000e+01 : f32
    %38 = vector.broadcast %cst_16 : f32 to vector<32x1xf32>
    %39 = arith.divf %37, %38 : vector<32x1xf32>
    %cst_17 = arith.constant 9.99999974E-6 : f32
    %40 = vector.broadcast %cst_17 : f32 to vector<32x1xf32>
    %41 = arith.addf %39, %40 : vector<32x1xf32>
    %42 = math.rsqrt %41 : vector<32x1xf32>
    %43 = vector.broadcast %42 : vector<32x1xf32> to vector<32x64xf32>
    %44 = arith.mulf %34, %43 : vector<32x64xf32>
    %45 = arith.truncf %44 : vector<32x64xf32> to vector<32x64xbf16>
    %c0_18 = arith.constant 0 : index
    %c0_19 = arith.constant 0 : index
    %46 = vector.load %arg1[%c0_18, %c0_19] : memref<32x64xf32, #tpu.memory_space<vmem>>, vector<32x64xf32>
    %c0_20 = arith.constant 0 : index
    %c0_21 = arith.constant 0 : index
    %47 = vector.load %arg4[%c0_20, %c0_21] : memref<64x64xbf16, #tpu.memory_space<vmem>>, vector<64x64xbf16>
    %cst_22 = arith.constant dense<0.000000e+00> : vector<32x64xf32>
    %48 = tpu.matmul %45, %47, %cst_22 {dimension_numbers = #tpu.dot_dimension_numbers<[1], [0], [0], [1], [0, 0, 1, 1], [], []>} : vector<32x64xbf16>, vector<64x64xbf16>, vector<32x64xf32> -> vector<32x64xf32>
    %49 = arith.addf %46, %48 : vector<32x64xf32>
    %c0_23 = arith.constant 0 : index
    %c0_24 = arith.constant 0 : index
    %50 = vector.load %arg5[%c0_23, %c0_24] : memref<1x64xf32, #tpu.memory_space<vmem>>, vector<1x64xf32>
    %51 = vector.broadcast %50 : vector<1x64xf32> to vector<32x64xf32>
    %52 = arith.addf %49, %51 : vector<32x64xf32>
    %c0_25 = arith.constant 0 : index
    %c0_26 = arith.constant 0 : index
    %53 = vector.load %arg6[%c0_25, %c0_26] : memref<32x64xf32, #tpu.memory_space<vmem>>, vector<32x64xf32>
    tpu.vector_store %arg6[%c0_25, %c0_26], %52 {strides = array<i32>} : memref<32x64xf32, #tpu.memory_space<vmem>>, vector<32x64xf32>,
    return
  }
  func.func @transform_0(%arg0: i32) -> (i32, i32) {
    %c0_i32 = arith.constant 0 : i32
    %c0_i32_0 = arith.constant 0 : i32
    return %arg0, %c0_i32 : i32, i32
  }
  func.func @transform_1(%arg0: i32) -> (i32, i32, i32) {
    %c0_i32 = arith.constant 0 : i32
    %c0_i32_0 = arith.constant 0 : i32
    %c0_i32_1 = arith.constant 0 : i32
    return %c0_i32, %arg0, %c0_i32_0 : i32, i32, i32
  }
  func.func @transform_2(%arg0: i32) -> (i32, i32) {
    %c0_i32 = arith.constant 0 : i32
    %c0_i32_0 = arith.constant 0 : i32
    return %arg0, %c0_i32 : i32, i32
  }
  func.func @transform_3(%arg0: i32) -> (i32, i32) {
    %c0_i32 = arith.constant 0 : i32
    %c0_i32_0 = arith.constant 0 : i32
    %c0_i32_1 = arith.constant 0 : i32
    return %c0_i32, %c0_i32_0 : i32, i32
  }
  func.func @transform_4(%arg0: i32) -> (i32, i32) {
    %c0_i32 = arith.constant 0 : i32
    %c0_i32_0 = arith.constant 0 : i32
    %c0_i32_1 = arith.constant 0 : i32
    return %c0_i32, %c0_i32_0 : i32, i32
  }
  func.func @transform_5(%arg0: i32) -> (i32, i32) {
    %c0_i32 = arith.constant 0 : i32
    %c0_i32_0 = arith.constant 0 : i32
    return %arg0, %c0_i32 : i32, i32
  }
}

module attributes {stable_mosaic.version = 11 : i64} {
  func.func @_ffn_kernel(%arg0: i32, %arg1: memref<32x64xf32, #tpu.memory_space<vmem>>, %arg2: memref<64x192xbf16, #tpu.memory_space<vmem>>, %arg3: memref<96x64xbf16, #tpu.memory_space<vmem>>, %arg4: memref<32x64xf32, #tpu.memory_space<vmem>>) attributes {dimension_semantics = [#tpu.dimension_semantics<parallel>], iteration_bounds = array<i64: 1>, scalar_prefetch = 0 : i64, scratch_operands = 0 : i64, tpu.core_type = #tpu.core_type<tc>, window_params = [{transform_indices = @transform_0, window_bounds = array<i64: 32, 64>}, {pipeline_mode = #tpu.pipeline_mode<synchronous>, transform_indices = @transform_1, window_bounds = array<i64: 64, 192>}, {pipeline_mode = #tpu.pipeline_mode<synchronous>, transform_indices = @transform_2, window_bounds = array<i64: 96, 64>}, {transform_indices = @transform_3, window_bounds = array<i64: 32, 64>}]} {
    %c0 = arith.constant 0 : index
    %c0_0 = arith.constant 0 : index
    %0 = vector.load %arg1[%c0, %c0_0] : memref<32x64xf32, #tpu.memory_space<vmem>>, vector<32x64xf32>
    %cst = arith.constant dense<0.000000e+00> : vector<32xf32>
    %1 = vector.multi_reduction <add>, %0, %cst [1] : vector<32x64xf32> to vector<32xf32>
    %2 = vector.shape_cast %1 : vector<32xf32> to vector<32x1xf32>
    %cst_1 = arith.constant 6.400000e+01 : f32
    %3 = vector.broadcast %cst_1 : f32 to vector<32x1xf32>
    %4 = arith.divf %2, %3 : vector<32x1xf32>
    %5 = vector.broadcast %4 : vector<32x1xf32> to vector<32x64xf32>
    %6 = arith.subf %0, %5 : vector<32x64xf32>
    %7 = arith.mulf %6, %6 : vector<32x64xf32>
    %cst_2 = arith.constant dense<0.000000e+00> : vector<32xf32>
    %8 = vector.multi_reduction <add>, %7, %cst_2 [1] : vector<32x64xf32> to vector<32xf32>
    %9 = vector.shape_cast %8 : vector<32xf32> to vector<32x1xf32>
    %cst_3 = arith.constant 6.400000e+01 : f32
    %10 = vector.broadcast %cst_3 : f32 to vector<32x1xf32>
    %11 = arith.divf %9, %10 : vector<32x1xf32>
    %cst_4 = arith.constant 9.99999974E-6 : f32
    %12 = vector.broadcast %cst_4 : f32 to vector<32x1xf32>
    %13 = arith.addf %11, %12 : vector<32x1xf32>
    %14 = math.rsqrt %13 : vector<32x1xf32>
    %15 = vector.broadcast %14 : vector<32x1xf32> to vector<32x64xf32>
    %16 = arith.mulf %6, %15 : vector<32x64xf32>
    %17 = arith.truncf %16 : vector<32x64xf32> to vector<32x64xbf16>
    %c0_5 = arith.constant 0 : index
    %c0_6 = arith.constant 0 : index
    %18 = vector.load %arg2[%c0_5, %c0_6] : memref<64x192xbf16, #tpu.memory_space<vmem>>, vector<64x192xbf16>
    %cst_7 = arith.constant dense<0.000000e+00> : vector<32x192xf32>
    %19 = tpu.matmul %17, %18, %cst_7 {dimension_numbers = #tpu.dot_dimension_numbers<[1], [0], [0], [1], [0, 0, 1, 1], [], []>} : vector<32x64xbf16>, vector<64x192xbf16>, vector<32x192xf32> -> vector<32x192xf32>
    %20 = vector.extract_strided_slice %19 {offsets = [0, 0], sizes = [32, 96], strides = [1, 1]} : vector<32x192xf32> to vector<32x96xf32>
    %21 = vector.extract_strided_slice %19 {offsets = [0, 96], sizes = [32, 96], strides = [1, 1]} : vector<32x192xf32> to vector<32x96xf32>
    %cst_8 = arith.constant 5.000000e-01 : f32
    %22 = vector.broadcast %cst_8 : f32 to vector<32x96xf32>
    %23 = arith.mulf %22, %21 : vector<32x96xf32>
    %cst_9 = arith.constant 4.471500e-02 : f32
    %24 = vector.broadcast %cst_9 : f32 to vector<32x96xf32>
    %25 = arith.mulf %24, %21 : vector<32x96xf32>
    %26 = arith.mulf %25, %21 : vector<32x96xf32>
    %27 = arith.mulf %26, %21 : vector<32x96xf32>
    %28 = arith.addf %21, %27 : vector<32x96xf32>
    %cst_10 = arith.constant 0.797884583 : f32
    %29 = vector.broadcast %cst_10 : f32 to vector<32x96xf32>
    %30 = arith.mulf %29, %28 : vector<32x96xf32>
    %31 = math.tanh %30 : vector<32x96xf32>
    %cst_11 = arith.constant 1.000000e+00 : f32
    %32 = vector.broadcast %cst_11 : f32 to vector<32x96xf32>
    %33 = arith.addf %32, %31 : vector<32x96xf32>
    %34 = arith.mulf %23, %33 : vector<32x96xf32>
    %35 = arith.mulf %20, %34 : vector<32x96xf32>
    %cst_12 = arith.constant dense<0.000000e+00> : vector<32xf32>
    %36 = vector.multi_reduction <add>, %35, %cst_12 [1] : vector<32x96xf32> to vector<32xf32>
    %37 = vector.shape_cast %36 : vector<32xf32> to vector<32x1xf32>
    %cst_13 = arith.constant 9.600000e+01 : f32
    %38 = vector.broadcast %cst_13 : f32 to vector<32x1xf32>
    %39 = arith.divf %37, %38 : vector<32x1xf32>
    %40 = vector.broadcast %39 : vector<32x1xf32> to vector<32x96xf32>
    %41 = arith.subf %35, %40 : vector<32x96xf32>
    %42 = arith.mulf %41, %41 : vector<32x96xf32>
    %cst_14 = arith.constant dense<0.000000e+00> : vector<32xf32>
    %43 = vector.multi_reduction <add>, %42, %cst_14 [1] : vector<32x96xf32> to vector<32xf32>
    %44 = vector.shape_cast %43 : vector<32xf32> to vector<32x1xf32>
    %cst_15 = arith.constant 9.600000e+01 : f32
    %45 = vector.broadcast %cst_15 : f32 to vector<32x1xf32>
    %46 = arith.divf %44, %45 : vector<32x1xf32>
    %cst_16 = arith.constant 9.99999974E-6 : f32
    %47 = vector.broadcast %cst_16 : f32 to vector<32x1xf32>
    %48 = arith.addf %46, %47 : vector<32x1xf32>
    %49 = math.rsqrt %48 : vector<32x1xf32>
    %50 = vector.broadcast %49 : vector<32x1xf32> to vector<32x96xf32>
    %51 = arith.mulf %41, %50 : vector<32x96xf32>
    %52 = arith.truncf %51 : vector<32x96xf32> to vector<32x96xbf16>
    %c0_17 = arith.constant 0 : index
    %c0_18 = arith.constant 0 : index
    %53 = vector.load %arg3[%c0_17, %c0_18] : memref<96x64xbf16, #tpu.memory_space<vmem>>, vector<96x64xbf16>
    %cst_19 = arith.constant dense<0.000000e+00> : vector<32x64xf32>
    %54 = tpu.matmul %52, %53, %cst_19 {dimension_numbers = #tpu.dot_dimension_numbers<[1], [0], [0], [1], [0, 0, 1, 1], [], []>} : vector<32x96xbf16>, vector<96x64xbf16>, vector<32x64xf32> -> vector<32x64xf32>
    %55 = arith.addf %0, %54 : vector<32x64xf32>
    %c0_20 = arith.constant 0 : index
    %c0_21 = arith.constant 0 : index
    %56 = vector.load %arg4[%c0_20, %c0_21] : memref<32x64xf32, #tpu.memory_space<vmem>>, vector<32x64xf32>
    tpu.vector_store %arg4[%c0_20, %c0_21], %55 {strides = array<i32>} : memref<32x64xf32, #tpu.memory_space<vmem>>, vector<32x64xf32>,
    return
  }
  func.func @transform_0(%arg0: i32) -> (i32, i32) {
    %c0_i32 = arith.constant 0 : i32
    %c0_i32_0 = arith.constant 0 : i32
    return %arg0, %c0_i32 : i32, i32
  }
  func.func @transform_1(%arg0: i32) -> (i32, i32) {
    %c0_i32 = arith.constant 0 : i32
    %c0_i32_0 = arith.constant 0 : i32
    %c0_i32_1 = arith.constant 0 : i32
    return %c0_i32, %c0_i32_0 : i32, i32
  }
  func.func @transform_2(%arg0: i32) -> (i32, i32) {
    %c0_i32 = arith.constant 0 : i32
    %c0_i32_0 = arith.constant 0 : i32
    %c0_i32_1 = arith.constant 0 : i32
    return %c0_i32, %c0_i32_0 : i32, i32
  }
  func.func @transform_3(%arg0: i32) -> (i32, i32) {
    %c0_i32 = arith.constant 0 : i32
    %c0_i32_0 = arith.constant 0 : i32
    return %arg0, %c0_i32 : i32, i32
  }
}

module attributes {stable_mosaic.version = 11 : i64} {
  func.func @_dwa_kernel(%arg0: i32, %arg1: memref<3xf32, #tpu.memory_space<smem>>, %arg2: memref<32x64xf32, #tpu.memory_space<vmem>>, %arg3: memref<32x64xf32, #tpu.memory_space<vmem>>, %arg4: memref<32x64xf32, #tpu.memory_space<vmem>>, %arg5: memref<32x64xf32, #tpu.memory_space<vmem>>) attributes {dimension_semantics = [#tpu.dimension_semantics<parallel>], iteration_bounds = array<i64: 1>, scalar_prefetch = 1 : i64, scratch_operands = 0 : i64, tpu.core_type = #tpu.core_type<tc>, window_params = [{transform_indices = @transform_0, window_bounds = array<i64: 32, 64>}, {transform_indices = @transform_1, window_bounds = array<i64: 32, 64>}, {transform_indices = @transform_2, window_bounds = array<i64: 32, 64>}, {transform_indices = @transform_3, window_bounds = array<i64: 32, 64>}]} {
    %c0 = arith.constant 0 : index
    %c0_0 = arith.constant 0 : index
    %0 = vector.load %arg2[%c0, %c0_0] : memref<32x64xf32, #tpu.memory_space<vmem>>, vector<32x64xf32>
    %c0_1 = arith.constant 0 : index
    %1 = memref.load %arg1[%c0_1] : memref<3xf32, #tpu.memory_space<smem>>
    %2 = vector.broadcast %1 : f32 to vector<32x64xf32>
    %3 = arith.mulf %0, %2 : vector<32x64xf32>
    %c0_2 = arith.constant 0 : index
    %c0_3 = arith.constant 0 : index
    %4 = vector.load %arg3[%c0_2, %c0_3] : memref<32x64xf32, #tpu.memory_space<vmem>>, vector<32x64xf32>
    %c1 = arith.constant 1 : index
    %5 = memref.load %arg1[%c1] : memref<3xf32, #tpu.memory_space<smem>>
    %6 = vector.broadcast %5 : f32 to vector<32x64xf32>
    %7 = arith.mulf %4, %6 : vector<32x64xf32>
    %8 = arith.addf %3, %7 : vector<32x64xf32>
    %c0_4 = arith.constant 0 : index
    %c0_5 = arith.constant 0 : index
    %9 = vector.load %arg4[%c0_4, %c0_5] : memref<32x64xf32, #tpu.memory_space<vmem>>, vector<32x64xf32>
    %c2 = arith.constant 2 : index
    %10 = memref.load %arg1[%c2] : memref<3xf32, #tpu.memory_space<smem>>
    %11 = vector.broadcast %10 : f32 to vector<32x64xf32>
    %12 = arith.mulf %9, %11 : vector<32x64xf32>
    %13 = arith.addf %8, %12 : vector<32x64xf32>
    %c0_6 = arith.constant 0 : index
    %c0_7 = arith.constant 0 : index
    %14 = vector.load %arg5[%c0_6, %c0_7] : memref<32x64xf32, #tpu.memory_space<vmem>>, vector<32x64xf32>
    tpu.vector_store %arg5[%c0_6, %c0_7], %13 {strides = array<i32>} : memref<32x64xf32, #tpu.memory_space<vmem>>, vector<32x64xf32>,
    return
  }
  func.func @transform_0(%arg0: i32, %arg1: memref<3xf32, #tpu.memory_space<smem>>) -> (i32, i32) {
    %c0_i32 = arith.constant 0 : i32
    %c0_i32_0 = arith.constant 0 : i32
    return %arg0, %c0_i32 : i32, i32
  }
  func.func @transform_1(%arg0: i32, %arg1: memref<3xf32, #tpu.memory_space<smem>>) -> (i32, i32) {
    %c0_i32 = arith.constant 0 : i32
    %c0_i32_0 = arith.constant 0 : i32
    return %arg0, %c0_i32 : i32, i32
  }
  func.func @transform_2(%arg0: i32, %arg1: memref<3xf32, #tpu.memory_space<smem>>) -> (i32, i32) {
    %c0_i32 = arith.constant 0 : i32
    %c0_i32_0 = arith.constant 0 : i32
    return %arg0, %c0_i32 : i32, i32
  }
  func.func @transform_3(%arg0: i32, %arg1: memref<3xf32, #tpu.memory_space<smem>>) -> (i32, i32) {
    %c0_i32 = arith.constant 0 : i32
    %c0_i32_0 = arith.constant 0 : i32
    return %arg0, %c0_i32 : i32, i32
  }
}

module attributes {stable_mosaic.version = 11 : i64} {
  func.func @_dwa_kernel(%arg0: i32, %arg1: memref<4xf32, #tpu.memory_space<smem>>, %arg2: memref<32x64xf32, #tpu.memory_space<vmem>>, %arg3: memref<32x64xf32, #tpu.memory_space<vmem>>, %arg4: memref<32x64xf32, #tpu.memory_space<vmem>>, %arg5: memref<32x64xf32, #tpu.memory_space<vmem>>, %arg6: memref<32x64xf32, #tpu.memory_space<vmem>>) attributes {dimension_semantics = [#tpu.dimension_semantics<parallel>], iteration_bounds = array<i64: 1>, scalar_prefetch = 1 : i64, scratch_operands = 0 : i64, tpu.core_type = #tpu.core_type<tc>, window_params = [{transform_indices = @transform_0, window_bounds = array<i64: 32, 64>}, {transform_indices = @transform_1, window_bounds = array<i64: 32, 64>}, {transform_indices = @transform_2, window_bounds = array<i64: 32, 64>}, {transform_indices = @transform_3, window_bounds = array<i64: 32, 64>}, {transform_indices = @transform_4, window_bounds = array<i64: 32, 64>}]} {
    %c0 = arith.constant 0 : index
    %c0_0 = arith.constant 0 : index
    %0 = vector.load %arg2[%c0, %c0_0] : memref<32x64xf32, #tpu.memory_space<vmem>>, vector<32x64xf32>
    %c0_1 = arith.constant 0 : index
    %1 = memref.load %arg1[%c0_1] : memref<4xf32, #tpu.memory_space<smem>>
    %2 = vector.broadcast %1 : f32 to vector<32x64xf32>
    %3 = arith.mulf %0, %2 : vector<32x64xf32>
    %c0_2 = arith.constant 0 : index
    %c0_3 = arith.constant 0 : index
    %4 = vector.load %arg3[%c0_2, %c0_3] : memref<32x64xf32, #tpu.memory_space<vmem>>, vector<32x64xf32>
    %c1 = arith.constant 1 : index
    %5 = memref.load %arg1[%c1] : memref<4xf32, #tpu.memory_space<smem>>
    %6 = vector.broadcast %5 : f32 to vector<32x64xf32>
    %7 = arith.mulf %4, %6 : vector<32x64xf32>
    %8 = arith.addf %3, %7 : vector<32x64xf32>
    %c0_4 = arith.constant 0 : index
    %c0_5 = arith.constant 0 : index
    %9 = vector.load %arg4[%c0_4, %c0_5] : memref<32x64xf32, #tpu.memory_space<vmem>>, vector<32x64xf32>
    %c2 = arith.constant 2 : index
    %10 = memref.load %arg1[%c2] : memref<4xf32, #tpu.memory_space<smem>>
    %11 = vector.broadcast %10 : f32 to vector<32x64xf32>
    %12 = arith.mulf %9, %11 : vector<32x64xf32>
    %13 = arith.addf %8, %12 : vector<32x64xf32>
    %c0_6 = arith.constant 0 : index
    %c0_7 = arith.constant 0 : index
    %14 = vector.load %arg5[%c0_6, %c0_7] : memref<32x64xf32, #tpu.memory_space<vmem>>, vector<32x64xf32>
    %c3 = arith.constant 3 : index
    %15 = memref.load %arg1[%c3] : memref<4xf32, #tpu.memory_space<smem>>
    %16 = vector.broadcast %15 : f32 to vector<32x64xf32>
    %17 = arith.mulf %14, %16 : vector<32x64xf32>
    %18 = arith.addf %13, %17 : vector<32x64xf32>
    %c0_8 = arith.constant 0 : index
    %c0_9 = arith.constant 0 : index
    %19 = vector.load %arg6[%c0_8, %c0_9] : memref<32x64xf32, #tpu.memory_space<vmem>>, vector<32x64xf32>
    tpu.vector_store %arg6[%c0_8, %c0_9], %18 {strides = array<i32>} : memref<32x64xf32, #tpu.memory_space<vmem>>, vector<32x64xf32>,
    return
  }
  func.func @transform_0(%arg0: i32, %arg1: memref<4xf32, #tpu.memory_space<smem>>) -> (i32, i32) {
    %c0_i32 = arith.constant 0 : i32
    %c0_i32_0 = arith.constant 0 : i32
    return %arg0, %c0_i32 : i32, i32
  }
  func.func @transform_1(%arg0: i32, %arg1: memref<4xf32, #tpu.memory_space<smem>>) -> (i32, i32) {
    %c0_i32 = arith.constant 0 : i32
    %c0_i32_0 = arith.constant 0 : i32
    return %arg0, %c0_i32 : i32, i32
  }
  func.func @transform_2(%arg0: i32, %arg1: memref<4xf32, #tpu.memory_space<smem>>) -> (i32, i32) {
    %c0_i32 = arith.constant 0 : i32
    %c0_i32_0 = arith.constant 0 : i32
    return %arg0, %c0_i32 : i32, i32
  }
  func.func @transform_3(%arg0: i32, %arg1: memref<4xf32, #tpu.memory_space<smem>>) -> (i32, i32) {
    %c0_i32 = arith.constant 0 : i32
    %c0_i32_0 = arith.constant 0 : i32
    return %arg0, %c0_i32 : i32, i32
  }
  func.func @transform_4(%arg0: i32, %arg1: memref<4xf32, #tpu.memory_space<smem>>) -> (i32, i32) {
    %c0_i32 = arith.constant 0 : i32
    %c0_i32_0 = arith.constant 0 : i32
    return %arg0, %c0_i32 : i32, i32
  }
}

module attributes {stable_mosaic.version = 11 : i64} {
  func.func @_dwa_kernel(%arg0: i32, %arg1: memref<5xf32, #tpu.memory_space<smem>>, %arg2: memref<32x64xf32, #tpu.memory_space<vmem>>, %arg3: memref<32x64xf32, #tpu.memory_space<vmem>>, %arg4: memref<32x64xf32, #tpu.memory_space<vmem>>, %arg5: memref<32x64xf32, #tpu.memory_space<vmem>>, %arg6: memref<32x64xf32, #tpu.memory_space<vmem>>, %arg7: memref<32x64xf32, #tpu.memory_space<vmem>>) attributes {dimension_semantics = [#tpu.dimension_semantics<parallel>], iteration_bounds = array<i64: 1>, scalar_prefetch = 1 : i64, scratch_operands = 0 : i64, tpu.core_type = #tpu.core_type<tc>, window_params = [{transform_indices = @transform_0, window_bounds = array<i64: 32, 64>}, {transform_indices = @transform_1, window_bounds = array<i64: 32, 64>}, {transform_indices = @transform_2, window_bounds = array<i64: 32, 64>}, {transform_indices = @transform_3, window_bounds = array<i64: 32, 64>}, {transform_indices = @transform_4, window_bounds = array<i64: 32, 64>}, {transform_indices = @transform_5, window_bounds = array<i64: 32, 64>}]} {
    %c0 = arith.constant 0 : index
    %c0_0 = arith.constant 0 : index
    %0 = vector.load %arg2[%c0, %c0_0] : memref<32x64xf32, #tpu.memory_space<vmem>>, vector<32x64xf32>
    %c0_1 = arith.constant 0 : index
    %1 = memref.load %arg1[%c0_1] : memref<5xf32, #tpu.memory_space<smem>>
    %2 = vector.broadcast %1 : f32 to vector<32x64xf32>
    %3 = arith.mulf %0, %2 : vector<32x64xf32>
    %c0_2 = arith.constant 0 : index
    %c0_3 = arith.constant 0 : index
    %4 = vector.load %arg3[%c0_2, %c0_3] : memref<32x64xf32, #tpu.memory_space<vmem>>, vector<32x64xf32>
    %c1 = arith.constant 1 : index
    %5 = memref.load %arg1[%c1] : memref<5xf32, #tpu.memory_space<smem>>
    %6 = vector.broadcast %5 : f32 to vector<32x64xf32>
    %7 = arith.mulf %4, %6 : vector<32x64xf32>
    %8 = arith.addf %3, %7 : vector<32x64xf32>
    %c0_4 = arith.constant 0 : index
    %c0_5 = arith.constant 0 : index
    %9 = vector.load %arg4[%c0_4, %c0_5] : memref<32x64xf32, #tpu.memory_space<vmem>>, vector<32x64xf32>
    %c2 = arith.constant 2 : index
    %10 = memref.load %arg1[%c2] : memref<5xf32, #tpu.memory_space<smem>>
    %11 = vector.broadcast %10 : f32 to vector<32x64xf32>
    %12 = arith.mulf %9, %11 : vector<32x64xf32>
    %13 = arith.addf %8, %12 : vector<32x64xf32>
    %c0_6 = arith.constant 0 : index
    %c0_7 = arith.constant 0 : index
    %14 = vector.load %arg5[%c0_6, %c0_7] : memref<32x64xf32, #tpu.memory_space<vmem>>, vector<32x64xf32>
    %c3 = arith.constant 3 : index
    %15 = memref.load %arg1[%c3] : memref<5xf32, #tpu.memory_space<smem>>
    %16 = vector.broadcast %15 : f32 to vector<32x64xf32>
    %17 = arith.mulf %14, %16 : vector<32x64xf32>
    %18 = arith.addf %13, %17 : vector<32x64xf32>
    %c0_8 = arith.constant 0 : index
    %c0_9 = arith.constant 0 : index
    %19 = vector.load %arg6[%c0_8, %c0_9] : memref<32x64xf32, #tpu.memory_space<vmem>>, vector<32x64xf32>
    %c4 = arith.constant 4 : index
    %20 = memref.load %arg1[%c4] : memref<5xf32, #tpu.memory_space<smem>>
    %21 = vector.broadcast %20 : f32 to vector<32x64xf32>
    %22 = arith.mulf %19, %21 : vector<32x64xf32>
    %23 = arith.addf %18, %22 : vector<32x64xf32>
    %c0_10 = arith.constant 0 : index
    %c0_11 = arith.constant 0 : index
    %24 = vector.load %arg7[%c0_10, %c0_11] : memref<32x64xf32, #tpu.memory_space<vmem>>, vector<32x64xf32>
    tpu.vector_store %arg7[%c0_10, %c0_11], %23 {strides = array<i32>} : memref<32x64xf32, #tpu.memory_space<vmem>>, vector<32x64xf32>,
    return
  }
  func.func @transform_0(%arg0: i32, %arg1: memref<5xf32, #tpu.memory_space<smem>>) -> (i32, i32) {
    %c0_i32 = arith.constant 0 : i32
    %c0_i32_0 = arith.constant 0 : i32
    return %arg0, %c0_i32 : i32, i32
  }
  func.func @transform_1(%arg0: i32, %arg1: memref<5xf32, #tpu.memory_space<smem>>) -> (i32, i32) {
    %c0_i32 = arith.constant 0 : i32
    %c0_i32_0 = arith.constant 0 : i32
    return %arg0, %c0_i32 : i32, i32
  }
  func.func @transform_2(%arg0: i32, %arg1: memref<5xf32, #tpu.memory_space<smem>>) -> (i32, i32) {
    %c0_i32 = arith.constant 0 : i32
    %c0_i32_0 = arith.constant 0 : i32
    return %arg0, %c0_i32 : i32, i32
  }
  func.func @transform_3(%arg0: i32, %arg1: memref<5xf32, #tpu.memory_space<smem>>) -> (i32, i32) {
    %c0_i32 = arith.constant 0 : i32
    %c0_i32_0 = arith.constant 0 : i32
    return %arg0, %c0_i32 : i32, i32
  }
  func.func @transform_4(%arg0: i32, %arg1: memref<5xf32, #tpu.memory_space<smem>>) -> (i32, i32) {
    %c0_i32 = arith.constant 0 : i32
    %c0_i32_0 = arith.constant 0 : i32
    return %arg0, %c0_i32 : i32, i32
  }
  func.func @transform_5(%arg0: i32, %arg1: memref<5xf32, #tpu.memory_space<smem>>) -> (i32, i32) {
    %c0_i32 = arith.constant 0 : i32
    %c0_i32_0 = arith.constant 0 : i32
    return %arg0, %c0_i32 : i32, i32
  }
}

</mosaic_0001>

<bundles_post_ra>
// kernel: encoder_forward.15
= control target key start
LH: loop header
LB: loop body
LE: loop exit
PB: predicated region body
PF: predicated region fallthrough
CT: control target
= control target key end

     0   :  { %s69_s15 = smov [#allocation3]   ;;  %s129_s0 = inlined_call_operand.vmem [shape: f32[2], index: 0, kind: input, shape index: {}]   ;;  %s130_s1 = inlined_call_operand.vmem [shape: f32[32,64], index: 1, kind: input, shape index: {}]   ;;  %s131_s2 = inlined_call_operand.vmem [shape: f32[32,64], index: 2, kind: input, shape index: {}]   ;;  %s132_s3 = inlined_call_operand.vmem [shape: f32[32,64], index: 3, kind: output, shape index: {}]  }
   0x1   :  { %s9_s14 = sshll.u32 %s129_s0, 4  ;;  %s10_s14 = int_to_ptr.vmem [resolvable:$true] %s9_s14 }
   0x2   :  { %12 = dma.vmem_to_smem %s10_s14, 16, %s69_s15, [#allocation2] }
   0x3   :  { %67 = dma.done.wait [#allocation2], 16 }
   0x4   :  { %68 = vsyncadd [#allocation2], 4294967280 }
   0x5   :  { %15 = sfence }
   0x6   :  { %s24_s16 = sld [smem:[#allocation3]]  ;;  %v20_v0 = vld [vmem:[%s130_s1] sm:$0xff]  ;;  %v21_v2 = vld [vmem:[%s130_s1 + $0x8] sm:$0xff]  ;;  %v22_v3 = vld [vmem:[%s130_s1 + $0x10] sm:$0xff]  ;;  %vm44_vm0 = vcmask 523264  }
   0x7   :  { %s53_s17 = sld [smem:[#allocation3 + $0x1]]  ;;  %v30_v1 = vld [vmem:[%s131_s2] sm:$0xff]  ;;  %v31_v4 = vld [vmem:[%s131_s2 + $0x8] sm:$0xff]  ;;  %v32_v5 = vld [vmem:[%s131_s2 + $0x10] sm:$0xff] }
   0x8   :  { %v23_v6 = vld [vmem:[%s130_s1 + $0x18] sm:$0xff] }
   0x9   :  { %v33_v8 = vld [vmem:[%s131_s2 + $0x18] sm:$0xff] }
   0xc   :  { %v25_v7 = vstv %s24_s16 }
   0xd   :  { %v26_v9 = vmul.f32 %v25_v7, %v20_v0  ;;  %v35_v10 = vstv %s53_s17  ;;  %v27_v11 = vmul.f32 %v25_v7, %v21_v2  ;;  %v28_v12 = vmul.f32 %v25_v7, %v22_v3 }
   0xe   :  { %v36_v13 = vmul.f32 %v35_v10, %v30_v1  ;;  %v37_v14 = vmul.f32 %v35_v10, %v31_v4  ;;  %v38_v15 = vmul.f32 %v35_v10, %v32_v5  ;;  %v29_v16 = vmul.f32 %v25_v7, %v23_v6 }
   0xf   :  { %v39_v17 = vmul.f32 %v35_v10, %v33_v8 }
  0x10   :  { %v40_v18 = vadd.f32 %v36_v13, %v26_v9  ;;  %v41_v19 = vadd.f32 %v37_v14, %v27_v11  ;;  %v42_v20 = vadd.f32 %v38_v15, %v28_v12 }
  0x11   :  { %v43_v21 = vadd.f32 %v39_v17, %v29_v16 }
  0x12   :  { %45 = vst.msk [vmem:[%s132_s3] sm:$0xff] %vm44_vm0, %v40_v18 }
  0x13   :  { %46 = vst.msk [vmem:[%s132_s3 + $0x8] sm:$0xff] %vm44_vm0, %v41_v19 }
  0x14   :  { %47 = vst.msk [vmem:[%s132_s3 + $0x10] sm:$0xff] %vm44_vm0, %v42_v20 }
  0x15   :  { %48 = vst.msk [vmem:[%s132_s3 + $0x18] sm:$0xff] %vm44_vm0, %v43_v21 }

// kernel: encoder_forward.13
= control target key start
LH: loop header
LB: loop body
LE: loop exit
PB: predicated region body
PF: predicated region fallthrough
CT: control target
= control target key end

     0   :  { %s1708_s24 = smov 0   ;;  %s1710_s25 = smov 0   ;;  %s2173_s0 = inlined_call_operand.vmem [shape: bf16[4,2,16,16], index: 0, kind: input, shape index: {}]   ;;  %s2174_s1 = inlined_call_operand.vmem [shape: bf16[4,2,16,16], index: 1, kind: input, shape index: {}]   ;;  %s2175_s2 = inlined_call_operand.vmem [shape: bf16[4,2,16,16], index: 2, kind: input, shape index: {}]   ;;  %s2176_s3 = inlined_call_operand.vmem [shape: bf16[4,15,16], index: 3, kind: input, shape index: {}]   ;;  %s2177_s4 = inlined_call_operand.vmem [shape: bf16[4,15,16], index: 4, kind: input, shape index: {}]   ;;  %s2178_s5 = inlined_call_operand.vmem [shape: s32[16,16], index: 5, kind: input, shape index: {}]   ;;  %s2179_s6 = inlined_call_operand.vmem [shape: f32[2,1,16], index: 6, kind: input, shape index: {}]   ;;  %s2180_s7 = inlined_call_operand.vmem [shape: bf16[4,2,16,16], index: 7, kind: output, shape index: {}]  }
   0x1   :  { %s1712_s26 = smov 0   ;;  %s1714_s27 = smov 0  }
   0x2   :  { %s1716_s28 = smov 0  }
   0x3 LB: > { %s32_s29 = sadd.s32 1, %s1657_s26  ;;  %s36_s30 = sadd.s32 1, %s1661_s27  ;;  %s1665_s28 = sphi %s1716_s28, %s17_s28   ;;  %s1661_s27 = sphi %s1714_s27, %s2184_s27   ;;  %s1657_s26 = sphi %s1712_s26, %s2183_s26   ;;  %s1653_s25 = sphi %s1710_s25, %s2182_s25   ;;  %s1649_s24 = sphi %s1708_s24, %s2181_s24  }
   0x4   : > { %p34_p0 = scmp.ge.s32.totalorder %s32_s29, 4  ;;  %p1476_p1 = scmp.ge.s32.totalorder %s1665_s28, 1 }
   0x5   : > { %p344_p2 = scmp.lt.s32.totalorder %s1665_s28, 9 }
   0x6   : > { %s2186_s29 = smov (%p34_p0, %s32_s29), 0  ;;  %s2188_s30 = smov (!%p34_p0, %s36_s30), %s1661_s27 }
   0x7   : > { %p345_p3 = pnand %p1476_p1, %p344_p2  ;;  %p38_p4 = scmp.ge.s32.totalorder %s2188_s30, 2 }
   0x8   : > { %p429_p5 = scmp.lt.s32.totalorder (!%p345_p3), %s1649_s24, 3  ;;  %p431_p6 = scmp.lt.s32.totalorder (!%p345_p3), %s1653_s25, 1 }
   0x9   : > { %s2190_s30 = smov (%p38_p4, %s2188_s30), 0  ;;  %348 = sbr.rel (%p345_p3) target bundleno = 823 (0x337), region = 48 }
   0xe   : > { %v568_v0 = vlaneseq  ;;  %s2192_s24 = smov (!%p429_p5, %s1649_s24), 3  ;;  %s2194_s25 = smov (!%p431_p6, %s1653_s25), 1  ;;  %vm517_vm0 = vcmask 130048   ;;  %v1755_v3 = vld [vmem:[%s2178_s5 + $0x8] sm:$0xff]  ;;  %v1760_v4 = vld [vmem:[%s2178_s5] sm:$0xff]  ;;  %v1667_v58 = vmov 0.0  }
   0xf   : > { %s1478_s8 = sshll.u32 %s2192_s24, 2  ;;  %s1552_s9 = sshll.u32 %s2192_s24, 3  ;;  %v674_v8 = vperm.slane %v1755_v3, 0  ;;  %v583_v9 = vperm.slane %v1760_v4, 1  ;;  %v570_v11 = vperm.slane %v1760_v4, 0  ;;  %v609_v14 = vperm.slane %v1760_v4, 3 }
  0x10   : > { %v1739_v1 = vshrl.u32 %v568_v0, 7  ;;  %s1477_s10 = sshll.u32 %s2194_s25, 1  ;;  %s469_s13 = scalar_lea.vmem %s2177_s4, %s1552_s9  ;;  %v739_v15 = vperm.slane %v1755_v3, 5  ;;  %v687_v16 = vperm.slane %v1755_v3, 1  ;;  %v700_v17 = vperm.slane %v1755_v3, 2 }
  0x11   : > { %s438_s18 = sadd.s32 %s1478_s8, %s1477_s10  ;;  %v1557_v5 = vld [vmem:[%s469_s13] sm:$0xff]  ;;  %s464_s21 = scalar_lea.vmem %s2176_s3, %s1552_s9  ;;  %v596_v18 = vperm.slane %v1760_v4, 2  ;;  %v726_v19 = vperm.slane %v1755_v3, 4  ;;  %v661_v20 = vperm.slane %v1760_v4, 7  ;;  %v713_v21 = vperm.slane %v1755_v3, 3 }
  0x12   : > { %1602 = vset.pattern.permute.xlu2 %v1739_v1  ;;  %1601 = vset.pattern.permute.xlu1 %v1739_v1  ;;  %v1746_v2 = vadd.s32 8, %v1739_v1  ;;  %v1558_v6 = vld [vmem:[%s464_s21] sm:$0xff]  ;;  %s1766_s22 = sshll.u32 %s438_s18, 2  ;;  %v522_v7 = vsel %vm517_vm0, %v1557_v5, 0  ;;  %v622_v22 = vperm.slane %v1760_v4, 4  ;;  %v635_v23 = vperm.slane %v1760_v4, 5  ;;  %s2107_s14 = scalar_lea.vmem %s2179_s6, %s2194_s25 }
  0x13   : > { %531 = vmatpush.bf16.xpose.msra.mxu0 %v522_v7  ;;  %v552_v10 = vsel %vm517_vm0, %v1558_v6, 0  ;;  %s440_s8 = scalar_lea.vmem %s2173_s0, %s1766_s22  ;;  %s450_s11 = scalar_lea.vmem %s2174_s1, %s1766_s22  ;;  %v648_v24 = vperm.slane %v1760_v4, 6  ;;  %v752_v25 = vperm.slane %v1755_v3, 6  ;;  %v765_v29 = vperm.slane %v1755_v3, 7 }
  0x14   : > { %1600 = vset.pattern.permute.xlu0 %v1746_v2  ;;  %561 = vmatpush.bf16.xpose.msra.mxu1 %v552_v10  ;;  %v1781_v12 = vld [vmem:[%s440_s8] sm:$0xff]  ;;  %v1845_v47 = vand.u32 127, %v568_v0  ;;  %vm986_vm3 = vcmask 121856   ;;  %s459_s16 = scalar_lea.vmem %s2175_s2, %s1766_s22  ;;  %s491_s19 = scalar_lea.vmem %s2180_s7, %s1766_s22 }
  0x15   : > { %v1783_v13 = vld [vmem:[%s450_s11] sm:$0xff] }
  0x1a   : > { %679 = vperm.xlu2 %1602, %v674_v8   ;;  %588 = vperm.xlu1 %1601, %v583_v9  }
  0x1b   : > { %1501 = vmatmul.msk.bf16.vlgmr.msra.gmra.mxu0 %vm517_vm0, %v1781_v12  ;;  %1510 = vmatmul.msk.bf16.vlgmr.msra.gmra.mxu1 %vm517_vm0, %v1783_v13 }
  0x1c   : > { %581 = vperm.xlu0 %1600, %v570_v11  }
  0x22   : > { %1605 = vset.pattern.permute.xlu2 %v1746_v2  ;;  %1603 = vset.pattern.permute.xlu1 %v1746_v2 }
  0x24   : > { %620 = vperm.xlu0 %1600, %v609_v14  }
  0x2a   : > { %685 = vperm.xlu2 %1605, %v674_v8   ;;  %594 = vperm.xlu1 %1603, %v583_v9  }
  0x2c   : > { %750 = vperm.xlu0 %1600, %v739_v15  }
  0x32   : > { %698 = vperm.xlu2 %1605, %v687_v16   ;;  %1604 = vset.pattern.permute.xlu1 %v1739_v1 }
  0x34   : > { %1612 = vset.pattern.permute.xlu0 %v1739_v1 }
  0x3a   : > { %1607 = vset.pattern.permute.xlu2 %v1739_v1  ;;  %692 = vperm.xlu1 %1604, %v687_v16  }
  0x3c   : > { %575 = vperm.xlu0 %1612, %v570_v11  }
  0x42   : > { %705 = vperm.xlu2 %1607, %v700_v17   ;;  %1606 = vset.pattern.permute.xlu1 %v1746_v2 }
  0x44   : > { %601 = vperm.xlu0 %1612, %v596_v18  }
  0x4a   : > { %614 = vperm.xlu2 %1607, %v609_v14   ;;  %607 = vperm.xlu1 %1606, %v596_v18  }
  0x4c   : > { %731 = vperm.xlu0 %1612, %v726_v19  }
  0x52   : > { %1609 = vset.pattern.permute.xlu2 %v1746_v2  ;;  %711 = vperm.xlu1 %1606, %v700_v17  }
  0x54   : > { %666 = vperm.xlu0 %1612, %v661_v20  }
  0x5a   : > { %724 = vperm.xlu2 %1609, %v713_v21   ;;  %1608 = vset.pattern.permute.xlu1 %v1739_v1 }
  0x5c   : > { %1617 = vset.pattern.permute.xlu0 %v1746_v2 }
  0x62   : > { %633 = vperm.xlu2 %1609, %v622_v22   ;;  %718 = vperm.xlu1 %1608, %v713_v21  }
  0x6a   : > { %1611 = vset.pattern.permute.xlu2 %v1739_v1  ;;  %627 = vperm.xlu1 %1608, %v622_v22  }
  0x72   : > { %640 = vperm.xlu2 %1611, %v635_v23   ;;  %1610 = vset.pattern.permute.xlu1 %v1746_v2 }
  0x74   : > { %v1817_v28 = vpop.permute.xlu2 %679 }
  0x75   : > { %vm794_vm8 = vcmp.eq.s32.totalorder %v1817_v28, %v1845_v47 }
  0x76   : > { %v1527_v28 = vsel %vm794_vm8, 1.0, %v1667_v58 }
  0x7a   : > { %744 = vperm.xlu2 %1611, %v739_v15   ;;  %737 = vperm.xlu1 %1610, %v726_v19  }
  0x82   : > { %1614 = vset.pattern.permute.xlu2 %v1746_v2  ;;  %646 = vperm.xlu1 %1610, %v635_v23  }
  0x84   : > { %v686_v33 = vpop.permute.xlu2 %685 }
  0x85   : > { %vm795_vm5 = vcmp.eq.s32.totalorder %v686_v33, %v1845_v47 }
  0x86   : > { %v1528_v19 = vsel %vm795_vm5, 1.0, %v1667_v58 }
  0x8a   : > { %659 = vperm.xlu2 %1614, %v648_v24   ;;  %1613 = vset.pattern.permute.xlu1 %v1739_v1 }
  0x8c   : > { %v1821_v30 = vpop.permute.xlu1 %588  ;;  %v1836_v40 = vpop.permute.xlu2 %698 }
  0x8d   : > { %vm780_vm9 = vcmp.eq.s32.totalorder %v1821_v30, %v1845_v47  ;;  %vm797_vm13 = vcmp.eq.s32.totalorder %v1836_v40, %v1845_v47 }
  0x8e   : > { %v582_v26 = vpop.permute.xlu0 %581  ;;  %v1513_v30 = vsel %vm780_vm9, 1.0, %v1667_v58 }
  0x8f   : > { %vm779_vm2 = vcmp.eq.s32.totalorder %v582_v26, %v1845_v47 }
  0x90   : > { %v1512_v5 = vsel %vm779_vm2, 1.0, %v1667_v58 }
  0x92   : > { %763 = vperm.xlu2 %1614, %v752_v25   ;;  %653 = vperm.xlu1 %1613, %v648_v24  }
  0x96   : > { %v1815_v27 = vpop.permute.xlu0 %620 }
  0x97   : > { %vm785_vm2 = vcmp.eq.s32.totalorder %v1815_v27, %v1845_v47 }
  0x98   : > { %v1825_v32 = vpop.f32.mrf.mxu0  ;;  %v1827_v34 = vpop.f32.mrf.mxu1 }
  0x99   : > { %v877_v36 = vrot.slane %v1825_v32, 2  ;;  %v881_v42 = vrot.slane %v1825_v32, 6  ;;  %v882_v43 = vrot.slane %v1825_v32, 7  ;;  %v890_v55 = vperm.slane %v1825_v32, 0 }
  0x9a   : > { %1616 = vset.pattern.permute.xlu2 %v1739_v1  ;;  %757 = vperm.xlu1 %1613, %v752_v25   ;;  %v876_v17 = vrot.slane %v1825_v32, 1 }
  0x9b   : > { %v1834_v39 = vperm.slane %v877_v36, 0  ;;  %v896_v50 = vperm.slane %v881_v42, 0  ;;  %v897_v53 = vperm.slane %v882_v43, 0  ;;  %v922_v9 = vadd.f32 %v890_v55, %v1827_v34 }
  0x9c   : > { %v1829_v35 = vpop.permute.xlu1 %594  ;;  %v1873_v0 = vpop.permute.xlu2 %705  ;;  %v891_v23 = vperm.slane %v876_v17, 0 }
  0x9d   : > { %v926_v49 = vadd.f32 %v1834_v39, %v1827_v34  ;;  %v1863_v57 = vadd.f32 %v896_v50, %v1827_v34  ;;  %v1867_v60 = vadd.f32 %v897_v53, %v1827_v34  ;;  %vm781_vm7 = vcmp.eq.s32.totalorder %v1829_v35, %v1845_v47 }
  0x9e   : > { %v1823_v31 = vpop.permute.xlu0 %750  ;;  %vm798_vm14 = vcmp.eq.s32.totalorder %v1873_v0, %v1845_v47  ;;  %v1518_v0 = vsel %vm785_vm2, 1.0, %v1667_v58 }
  0x9f   : > { %vm805_vm5 = vcmp.eq.s32.totalorder %v1823_v31, %v1845_v47 }
  0xa0   : > { %v1832_v38 = vpop.f32.mrf.mxu0  ;;  %v1847_v48 = vpop.f32.mrf.mxu1  ;;  %v1538_v31 = vsel %vm805_vm5, 1.0, %v1667_v58 }
  0xa1   : > { %v888_v41 = vrot.slane %v1832_v38, 6  ;;  %v889_v46 = vrot.slane %v1832_v38, 7  ;;  %v1860_v56 = vadd.f32 %v896_v50, %v1847_v48  ;;  %v1870_v61 = vadd.f32 %v897_v53, %v1847_v48 }
  0xa2   : > { %770 = vperm.xlu2 %1616, %v765_v29   ;;  %1615 = vset.pattern.permute.xlu1 %v1746_v2  ;;  %v923_v4 = vadd.f32 %v890_v55, %v1847_v48  ;;  %v898_v8 = vperm.slane %v1832_v38, 0  ;;  %v884_v18 = vrot.slane %v1832_v38, 2  ;;  %v925_v25 = vadd.f32 %v891_v23, %v1847_v48 }
  0xa3   : > { %v904_v45 = vperm.slane %v888_v41, 0  ;;  %v905_v62 = vperm.slane %v889_v46, 0  ;;  %v885_v43 = vrot.slane %v1832_v38, 3  ;;  %v924_v46 = vadd.f32 %v891_v23, %v1827_v34 }
  0xa4   : > { %v955_v7 = vmul.f32 %v1512_v5, %v923_v4  ;;  %v939_v14 = vadd.f32 %v898_v8, %v1847_v48  ;;  %v1893_v15 = vpop.permute.xlu2 %614  ;;  %v900_v24 = vperm.slane %v884_v18, 0  ;;  %v879_v53 = vrot.slane %v1825_v32, 4 }
  0xa5   : > { %v1852_v52 = vadd.f32 %v904_v45, %v1827_v34  ;;  %v1855_v54 = vadd.f32 %v904_v45, %v1847_v48  ;;  %v1876_v1 = vadd.f32 %v905_v62, %v1827_v34  ;;  %v1879_v2 = vadd.f32 %v905_v62, %v1847_v48 }
  0xa6   : > { %v990_v11 = vsel %vm986_vm3, %v955_v7, 0.0  ;;  %v971_v21 = vmul.f32 %v1528_v19, %v939_v14  ;;  %v938_v45 = vadd.f32 %v898_v8, %v1827_v34  ;;  %v956_v4 = vmul.f32 %v1513_v30, %v924_v46 }
  0xa7   : > { %v1928_v8 = vperm.slane %v879_v53, 0  ;;  %v1530_v19 = vsel %vm797_vm13, 1.0, %v1667_v58 }
  0xa8   : > { %v1038_v26 = vsel %vm986_vm3, %v971_v21, 0.0 }
  0xa9   : > { %v931_v17 = vadd.f32 %v1928_v8, %v1847_v48 }
  0xaa   : > { %672 = vperm.xlu1 %1615, %v661_v20  }
  0xac   : > { %v1841_v44 = vpop.permute.xlu1 %692 }
  0xad   : > { %vm796_vm15 = vcmp.eq.s32.totalorder %v1841_v44, %v1845_v47 }
  0xae   : > { %v576_v37 = vpop.permute.xlu0 %575 }
  0xaf   : > { %vm778_vm4 = vcmp.eq.s32.totalorder %v576_v37, %v1845_v47  ;;  %v1514_v37 = vsel %vm781_vm7, 1.0, %v1667_v58 }
  0xb0   : > { %v1511_v10 = vsel %vm778_vm4, 1.0, %v1667_v58  ;;  %v957_v41 = vmul.f32 %v1514_v37, %v925_v25  ;;  %vm784_vm4 = vcmp.eq.s32.totalorder %v1893_v15, %v1845_v47 }
  0xb1   : > { %v954_v16 = vmul.f32 %v1511_v10, %v922_v9  ;;  %v993_v10 = vsel %vm986_vm3, %v956_v4, 0.0 }
  0xb2   : > { %776 = vperm.xlu1 %1615, %v765_v29   ;;  %v943_v29 = vadd.f32 %v900_v24, %v1847_v48  ;;  %v996_v35 = vsel %vm986_vm3, %v957_v41, 0.0 }
  0xb3   : > { %v987_v22 = vsel %vm986_vm3, %v954_v16, 0.0  ;;  %v927_v16 = vadd.f32 %v1834_v39, %v1847_v48 }
  0xb4   : > { %v1905_v33 = vpop.permute.xlu2 %724 }
  0xb5   : > { %vm801_vm7 = vcmp.eq.s32.totalorder %v1905_v33, %v1845_v47  ;;  %v930_v33 = vadd.f32 %v1928_v8, %v1827_v34 }
  0xb6   : > { %v602_v51 = vpop.permute.xlu0 %601 }
  0xb7   : > { %vm782_vm1 = vcmp.eq.s32.totalorder %v602_v51, %v1845_v47  ;;  %v1919_v51 = vperm.slane %v885_v43, 0  ;;  %v1529_v43 = vsel %vm796_vm15, 1.0, %v1667_v58 }
  0xb8   : > { %v1515_v59 = vsel %vm782_vm1, 1.0, %v1667_v58 }
  0xb9   : > { %v958_v63 = vmul.f32 %v1515_v59, %v926_v49  ;;  %v883_v49 = vrot.slane %v1832_v38, 1  ;;  %v944_v59 = vadd.f32 %v1919_v51, %v1827_v34 }
  0xbb   : > { %v999_v3 = vsel %vm986_vm3, %v958_v63, 0.0  ;;  %v899_v5 = vperm.slane %v883_v49, 0 }
  0xbc   : > { %v1884_v6 = vpop.permute.xlu1 %607  ;;  %1000 = vadd.xlane.f32.xlu0 %v999_v3  ;;  %v634_v62 = vpop.permute.xlu2 %633  ;;  %v970_v3 = vmul.f32 %v1527_v28, %v938_v45  ;;  %v549_v45 = vsel %vm517_vm0, %v1783_v13, 0 }
  0xbd   : > { %vm787_vm11 = vcmp.eq.s32.totalorder %v634_v62, %v1845_v47  ;;  %vm783_vm12 = vcmp.eq.s32.totalorder %v1884_v6, %v1845_v47  ;;  %v880_v6 = vrot.slane %v1825_v32, 5  ;;  %v940_v44 = vadd.f32 %v899_v5, %v1827_v34  ;;  %1195 = vmatpush.bf16.xpose.msra.mxu2 %v549_v45 }
  0xbe   : > { %v1035_v9 = vsel %vm986_vm3, %v970_v3, 0.0  ;;  %v1520_v18 = vsel %vm787_vm11, 1.0, %v1667_v58  ;;  %v1516_v40 = vsel %vm783_vm12, 1.0, %v1667_v58  ;;  %v1517_v62 = vsel %vm784_vm4, 1.0, %v1667_v58 }
  0xbf   : > { %v963_v23 = vmul.f32 %v1520_v18, %v931_v17  ;;  %v1947_v25 = vperm.slane %v880_v6, 0  ;;  %v972_v49 = vmul.f32 %v1529_v43, %v940_v44 }
  0xc1   : > { %v1014_v41 = vsel %vm986_vm3, %v963_v23, 0.0  ;;  %v1041_v30 = vsel %vm986_vm3, %v972_v49, 0.0 }
  0xc4   : > { %991 = vadd.xlane.f32.xlu0 %v990_v11  ;;  %v712_v20 = vpop.permute.xlu1 %711  ;;  %v941_v11 = vadd.f32 %v899_v5, %v1847_v48  ;;  %1543 = vmatmul.msk.bf16.vlgmr.msra.gmra.mxu2 %vm517_vm0, %v1781_v12 }
  0xc5   : > { %vm799_vm6 = vcmp.eq.s32.totalorder %v712_v20, %v1845_v47 }
  0xc6   : > { %v1532_v36 = vsel %vm799_vm6, 1.0, %v1667_v58  ;;  %v973_v21 = vmul.f32 %v1530_v19, %v941_v11 }
  0xc7   : > { %v975_v42 = vmul.f32 %v1532_v36, %v943_v29  ;;  %v878_v29 = vrot.slane %v1825_v32, 3  ;;  %v887_v36 = vrot.slane %v1832_v38, 5  ;;  %v1531_v32 = vsel %vm798_vm14, 1.0, %v1667_v58 }
  0xc8   : > { %v1044_v39 = vsel %vm986_vm3, %v973_v21, 0.0 }
  0xc9   : > { %v1050_v50 = vsel %vm986_vm3, %v975_v42, 0.0  ;;  %v932_v42 = vadd.f32 %v1947_v25, %v1827_v34  ;;  %v1973_v53 = vperm.slane %v887_v36, 0 }
  0xcb   : > { %988 = vadd.xlane.f32.xlu2 %v987_v22  ;;  %v959_v22 = vmul.f32 %v1516_v40, %v927_v16  ;;  %v1534_v16 = vsel %vm801_vm7, 1.0, %v1667_v58  ;;  %v948_v43 = vadd.f32 %v1973_v53, %v1827_v34  ;;  %vm1165_vm7 = vcmask 1041409  }
  0xcc   : > { %1039 = vadd.xlane.f32.xlu0 %v1038_v26  ;;  %v641_v20 = vpop.permute.xlu2 %640  ;;  %v942_v26 = vadd.f32 %v900_v24, %v1827_v34 }
  0xcd   : > { %vm788_vm1 = vcmp.eq.s32.totalorder %v641_v20, %v1845_v47  ;;  %v1002_v37 = vsel %vm986_vm3, %v959_v22, 0.0 }
  0xce   : > { %v974_v24 = vmul.f32 %v1531_v32, %v942_v26 }
  0xd0   : > { %v1047_v27 = vsel %vm986_vm3, %v974_v24, 0.0 }
  0xd3   : > { %997 = vadd.xlane.f32.xlu2 %v996_v35  ;;  %v1521_v35 = vsel %vm788_vm1, 1.0, %v1667_v58 }
  0xd4   : > { %v719_v55 = vpop.permute.xlu1 %718  ;;  %1051 = vadd.xlane.f32.xlu0 %v1050_v50  ;;  %v964_v46 = vmul.f32 %v1521_v35, %v932_v42  ;;  %v893_v50 = vperm.slane %v878_v29, 0  ;;  %v745_v8 = vpop.permute.xlu2 %744  ;;  %v933_v35 = vadd.f32 %v1947_v25, %v1847_v48 }
  0xd5   : > { %vm800_vm10 = vcmp.eq.s32.totalorder %v719_v55, %v1845_v47 }
  0xd6   : > { %v1533_v63 = vsel %vm800_vm10, 1.0, %v1667_v58  ;;  %v929_v28 = vadd.f32 %v893_v50, %v1847_v48  ;;  %v1017_v13 = vsel %vm986_vm3, %v964_v46, 0.0  ;;  %v928_v15 = vadd.f32 %v893_v50, %v1827_v34 }
  0xd7   : > { %v976_v7 = vmul.f32 %v1533_v63, %v944_v59  ;;  %v949_v59 = vadd.f32 %v1973_v53, %v1847_v48  ;;  %vm804_vm10 = vcmp.eq.s32.totalorder %v745_v8, %v1845_v47 }
  0xd8   : > { %v961_v63 = vmul.f32 %v1518_v0, %v929_v28  ;;  %v960_v4 = vmul.f32 %v1517_v62, %v928_v15  ;;  %v1537_v36 = vsel %vm804_vm10, 1.0, %v1667_v58  ;;  %vm1173_vm10 = vcmask 1045509  }
  0xd9   : > { %v1053_v14 = vsel %vm986_vm3, %v976_v7, 0.0  ;;  %v981_v3 = vmul.f32 %v1538_v31, %v949_v59  ;;  %v980_v32 = vmul.f32 %v1537_v36, %v948_v43 }
  0xda   : > { %v1008_v7 = vsel %vm986_vm3, %v961_v63, 0.0  ;;  %v1005_v12 = vsel %vm986_vm3, %v960_v4, 0.0 }
  0xdb   : > { %1036 = vadd.xlane.f32.xlu2 %v1035_v9  ;;  %v945_v9 = vadd.f32 %v1919_v51, %v1847_v48  ;;  %v1068_v11 = vsel %vm986_vm3, %v981_v3, 0.0  ;;  %v732_v51 = vpop.permute.xlu0 %731  ;;  %v1065_v45 = vsel %vm986_vm3, %v980_v32, 0.0 }
  0xdc   : > { %994 = vadd.xlane.f32.xlu1 %v993_v10  ;;  %1054 = vadd.xlane.f32.xlu0 %v1053_v14  ;;  %v628_v55 = vpop.permute.xlu1 %627  ;;  %v886_v14 = vrot.slane %v1832_v38, 4  ;;  %vm802_vm9 = vcmp.eq.s32.totalorder %v732_v51, %v1845_v47 }
  0xdd   : > { %vm786_vm6 = vcmp.eq.s32.totalorder %v628_v55, %v1845_v47  ;;  %v977_v6 = vmul.f32 %v1534_v16, %v945_v9  ;;  %v1535_v21 = vsel %vm802_vm9, 1.0, %v1667_v58  ;;  %vm1171_vm9 = vcmask 1044484  }
  0xde   : > { %v1519_v10 = vsel %vm786_vm6, 1.0, %v1667_v58  ;;  %v902_v18 = vperm.slane %v886_v14, 0  ;;  %vm1118_vm6 = vcmask 130112  }
  0xdf   : > { %v962_v17 = vmul.f32 %v1519_v10, %v930_v33  ;;  %v1056_v38 = vsel %vm986_vm3, %v977_v6, 0.0  ;;  %v2057_v33 = vadd.s32 4294967288, %v1845_v47 }
  0xe0   : > { %v946_v20 = vadd.f32 %v902_v18, %v1827_v34  ;;  %v947_v23 = vadd.f32 %v902_v18, %v1847_v48 }
  0xe1   : > { %v1011_v40 = vsel %vm986_vm3, %v962_v17, 0.0 }
  0xe2   : > { %v978_v26 = vmul.f32 %v1535_v21, %v946_v20 }
  0xe3   : > { %1045 = vadd.xlane.f32.xlu2 %v1044_v39  ;;  %v667_v34 = vpop.permute.xlu0 %666 }
  0xe4   : > { %1003 = vadd.xlane.f32.xlu1 %v1002_v37  ;;  %1015 = vadd.xlane.f32.xlu0 %v1014_v41  ;;  %v1059_v37 = vsel %vm986_vm3, %v978_v26, 0.0  ;;  %v660_v41 = vpop.permute.xlu2 %659  ;;  %vm792_vm15 = vcmp.eq.s32.totalorder %v667_v34, %v1845_v47 }
  0xe5   : > { %vm791_vm12 = vcmp.eq.s32.totalorder %v660_v41, %v1845_v47 }
  0xe6   : > { %v1524_v46 = vsel %vm791_vm12, 1.0, %v1667_v58  ;;  %vm1177_vm12 = vcmask 1047559  }
  0xe7   : > { %v967_v53 = vmul.f32 %v1524_v46, %v1860_v56 }
  0xeb   : > { %1048 = vadd.xlane.f32.xlu2 %v1047_v27 }
  0xec   : > { %1018 = vadd.xlane.f32.xlu0 %v1017_v13  ;;  %1042 = vadd.xlane.f32.xlu1 %v1041_v30  ;;  %v738_v5 = vpop.permute.xlu1 %737  ;;  %v764_v48 = vpop.permute.xlu2 %763  ;;  %v1026_v13 = vsel %vm986_vm3, %v967_v53, 0.0  ;;  %v1525_v30 = vsel %vm792_vm15, 1.0, %v1667_v58 }
  0xed   : > { %vm803_vm8 = vcmp.eq.s32.totalorder %v738_v5, %v1845_v47  ;;  %vm807_vm1 = vcmp.eq.s32.totalorder %v764_v48, %v1845_v47 }
  0xee   : > { %v1536_v19 = vsel %vm803_vm8, 1.0, %v1667_v58  ;;  %v1540_v56 = vsel %vm807_vm1, 1.0, %v1667_v58  ;;  %vm1169_vm8 = vcmask 1043459  }
  0xef   : > { %v979_v39 = vmul.f32 %v1536_v19, %v947_v23  ;;  %v983_v15 = vmul.f32 %v1540_v56, %v1855_v54 }
  0xf1   : > { %v1062_v29 = vsel %vm986_vm3, %v979_v39, 0.0  ;;  %v1074_v31 = vsel %vm986_vm3, %v983_v15, 0.0 }
  0xf3   : > { %1009 = vadd.xlane.f32.xlu2 %v1008_v7 }
  0xf4   : > { %1069 = vadd.xlane.f32.xlu0 %v1068_v11  ;;  %1006 = vadd.xlane.f32.xlu1 %v1005_v12  ;;  %v647_v22 = vpop.permute.xlu1 %646 }
  0xf5   : > { %vm789_vm11 = vcmp.eq.s32.totalorder %v647_v22, %v1845_v47 }
  0xf6   : > { %v1522_v42 = vsel %vm789_vm11, 1.0, %v1667_v58  ;;  %vm1175_vm11 = vcmask 1046534  }
  0xf7   : > { %v965_v24 = vmul.f32 %v1522_v42, %v933_v35 }
  0xf9   : > { %v1020_v49 = vsel %vm986_vm3, %v965_v24, 0.0 }
  0xfb   : > { %1012 = vadd.xlane.f32.xlu2 %v1011_v40 }
  0xfc   : > { %1057 = vadd.xlane.f32.xlu1 %v1056_v38 }
 0x103   : > { %1063 = vadd.xlane.f32.xlu2 %v1062_v29 }
 0x104   : > { %v654_v44 = vpop.permute.xlu1 %653  ;;  %1060 = vadd.xlane.f32.xlu1 %v1059_v37 }
 0x105   : > { %vm790_vm13 = vcmp.eq.s32.totalorder %v654_v44, %v1845_v47 }
 0x106   : > { %v1523_v50 = vsel %vm790_vm13, 1.0, %v1667_v58 }
 0x107   : > { %v966_v27 = vmul.f32 %v1523_v50, %v1863_v57  ;;  %v968_v57 = vmul.f32 %v1525_v30, %v1867_v60 }
 0x109   : > { %v1023_v59 = vsel %vm986_vm3, %v966_v27, 0.0  ;;  %v1029_v62 = vsel %vm986_vm3, %v968_v57, 0.0 }
 0x10b   : > { %1066 = vadd.xlane.f32.xlu2 %v1065_v45 }
 0x10c   : > { %v758_v0 = vpop.permute.xlu1 %757  ;;  %1021 = vadd.xlane.f32.xlu1 %v1020_v49 }
 0x10d   : > { %vm806_vm14 = vcmp.eq.s32.totalorder %v758_v0, %v1845_v47 }
 0x10e   : > { %v1539_v25 = vsel %vm806_vm14, 1.0, %v1667_v58  ;;  %vm1263_vm14 = vcmask 125952  }
 0x10f   : > { %v982_v55 = vmul.f32 %v1539_v25, %v1852_v52  ;;  %v771_v52 = vpop.permute.xlu2 %770 }
 0x110   : > { %vm808_vm2 = vcmp.eq.s32.totalorder %v771_v52, %v1845_v47 }
 0x111   : > { %v1071_v28 = vsel %vm986_vm3, %v982_v55, 0.0  ;;  %v1541_v63 = vsel %vm808_vm2, 1.0, %v1667_v58 }
 0x112   : > { %1072 = vadd.xlane.f32.xlu0 %v1071_v28  ;;  %v984_v60 = vmul.f32 %v1541_v63, %v1876_v1 }
 0x113   : > { %1027 = vadd.xlane.f32.xlu2 %v1026_v13 }
 0x114   : > { %1024 = vadd.xlane.f32.xlu1 %v1023_v59  ;;  %v1077_v7 = vsel %vm986_vm3, %v984_v60, 0.0 }
 0x11b   : > { %1030 = vadd.xlane.f32.xlu2 %v1029_v62 }
 0x11c   : > { %v673_v3 = vpop.permute.xlu1 %672  ;;  %1075 = vadd.xlane.f32.xlu1 %v1074_v31 }
 0x11d   : > { %vm793_vm4 = vcmp.eq.s32.totalorder %v673_v3, %v1845_v47 }
 0x11e   : > { %v1526_v4 = vsel %vm793_vm4, 1.0, %v1667_v58 }
 0x11f   : > { %v969_v5 = vmul.f32 %v1526_v4, %v1870_v61 }
 0x121   : > { %v1032_v54 = vsel %vm986_vm3, %v969_v5, 0.0 }
 0x122   : > { %1033 = vadd.xlane.f32.xlu0 %v1032_v54 }
 0x124   : > { %v777_v9 = vpop.permute.xlu1 %776  ;;  %1078 = vadd.xlane.f32.xlu1 %v1077_v7 }
 0x125   : > { %vm809_vm5 = vcmp.eq.s32.totalorder %v777_v9, %v1845_v47 }
 0x126   : > { %v1542_v10 = vsel %vm809_vm5, 1.0, %v1667_v58 }
 0x127   : > { %v985_v11 = vmul.f32 %v1542_v10, %v1879_v2 }
 0x129   : > { %v1080_v12 = vsel %vm986_vm3, %v985_v11, 0.0  ;;  %vm1167_vm3 = vcmask 1042434  }
 0x12a   : > { %1081 = vadd.xlane.f32.xlu2 %v1080_v12 }
 0x12f   : > { %v1001_v61 = vpop.xlane.xlu0 %1000 }
 0x130   : > { %v1123_v23 = vperm.slane %v1001_v61, %v1845_v47 }
 0x137   : > { %v992_v1 = vpop.xlane.xlu0 %991 }
 0x138   : > { %v1117_v51 = vperm.slane %v992_v1, %v2057_v33 }
 0x13e   : > { %v989_v14 = vpop.xlane.xlu2 %988 }
 0x13f   : > { %v1115_v17 = vperm.slane %v989_v14, %v1845_v47  ;;  %v2067_v20 = vpop.xlane.xlu0 %1039 }
 0x140   : > { %v1142_v63 = vperm.slane %v2067_v20, %v2057_v33  ;;  %v1618_v20 = vld [vmem:[%s2107_s14] ss:$0 sm:$0xff] }
 0x141   : > { %v1119_v19 = vsel %vm1118_vm6, %v1117_v51, %v1115_v17 }
 0x146   : > { %v998_v16 = vpop.xlane.xlu2 %997 }
 0x147   : > { %v1121_v2 = vperm.slane %v998_v16, %v2057_v33  ;;  %v2074_v36 = vpop.xlane.xlu0 %1051  ;;  %v1197_v51 = vpop.f32.mrf.mxu2 }
 0x14e   : > { %v2060_v6 = vpop.xlane.xlu2 %1036 }
 0x14f   : > { %v995_v18 = vpop.xlane.xlu1 %994  ;;  %v2078_v44 = vpop.xlane.xlu0 %1054  ;;  %v1141_v3 = vperm.slane %v2060_v6, %v1845_v47 }
 0x150   : > { %v1120_v40 = vperm.slane %v995_v18, %v1845_v47  ;;  %v1150_v60 = vperm.slane %v2078_v44, %v1845_v47 }
 0x152   : > { %v1122_v38 = vsel %vm1118_vm6, %v1121_v2, %v1120_v40  ;;  %v1143_v2 = vsel %vm1118_vm6, %v1142_v63, %v1141_v3  ;;  %v1556_v63 = vld [vmem:[%s459_s16] sm:$0xff] }
 0x153   : > { %v1166_v21 = vsel %vm1165_vm7, %v1122_v38, %v1119_v19  ;;  %1254 = vmatpush.bf16.msra.mxu3 %v1556_v63 }
 0x156   : > { %v1046_v8 = vpop.xlane.xlu2 %1045 }
 0x157   : > { %v1004_v22 = vpop.xlane.xlu1 %1003  ;;  %v1016_v24 = vpop.xlane.xlu0 %1015  ;;  %v1145_v15 = vperm.slane %v1046_v8, %v2057_v33 }
 0x158   : > { %v1124_v39 = vperm.slane %v1004_v22, %v2057_v33  ;;  %v1130_v59 = vperm.slane %v1016_v24, %v2057_v33 }
 0x15a   : > { %v1125_v26 = vsel %vm1118_vm6, %v1124_v39, %v1123_v23 }
 0x15b   : > { %v1168_v29 = vsel %vm1167_vm3, %v1125_v26, %v1166_v21  ;;  %v1148_v21 = vperm.slane %v2074_v36, %v2057_v33 }
 0x15e   : > { %v2076_v37 = vpop.xlane.xlu2 %1048 }
 0x15f   : > { %v1043_v41 = vpop.xlane.xlu1 %1042  ;;  %v1019_v49 = vpop.xlane.xlu0 %1018  ;;  %v1147_v1 = vperm.slane %v2076_v37, %v1845_v47 }
 0x160   : > { %v1144_v13 = vperm.slane %v1043_v41, %v1845_v47  ;;  %v1132_v62 = vperm.slane %v1019_v49, %v1845_v47 }
 0x161   : > { %v1149_v37 = vsel %vm1118_vm6, %v1148_v21, %v1147_v1 }
 0x162   : > { %v1146_v54 = vsel %vm1118_vm6, %v1145_v15, %v1144_v13 }
 0x163   : > { %v1179_v8 = vsel %vm1165_vm7, %v1146_v54, %v1143_v2 }
 0x164   : > { %v1180_v36 = vsel %vm1167_vm3, %v1149_v37, %v1179_v8 }
 0x166   : > { %v1010_v42 = vpop.xlane.xlu2 %1009 }
 0x167   : > { %v1007_v43 = vpop.xlane.xlu1 %1006  ;;  %v1070_v34 = vpop.xlane.xlu0 %1069  ;;  %v1127_v55 = vperm.slane %v1010_v42, %v2057_v33 }
 0x168   : > { %v1126_v27 = vperm.slane %v1007_v43, %v1845_v47  ;;  %v1157_v39 = vperm.slane %v1070_v34, %v2057_v33 }
 0x16a   : > { %v1128_v31 = vsel %vm1118_vm6, %v1127_v55, %v1126_v27 }
 0x16b   : > { %v1170_v9 = vsel %vm1169_vm8, %v1128_v31, %v1168_v29 }
 0x16e   : > { %v1013_v35 = vpop.xlane.xlu2 %1012 }
 0x16f   : > { %v1058_v32 = vpop.xlane.xlu1 %1057  ;;  %v1129_v28 = vperm.slane %v1013_v35, %v1845_v47 }
 0x170   : > { %v1151_v10 = vperm.slane %v1058_v32, %v2057_v33 }
 0x171   : > { %v1131_v4 = vsel %vm1118_vm6, %v1130_v59, %v1129_v28 }
 0x172   : > { %v1172_v14 = vsel %vm1171_vm9, %v1131_v4, %v1170_v9  ;;  %v1152_v26 = vsel %vm1118_vm6, %v1151_v10, %v1150_v60  ;;  %v504_v4 = vld [vmem:[%s2107_s14] sm:$0x1] }
 0x173   : > { %v1181_v32 = vsel %vm1169_vm8, %v1152_v26, %v1180_v36  ;;  %vm1229_vm13 = vcmp.gt.f32.partialorder %v504_v4, -1.0 }
 0x174   : > { %v1544_v54 = vsel %vm1229_vm13, 1.0, %v1667_v58 }
 0x176   : > { %v1064_v45 = vpop.xlane.xlu2 %1063 }
 0x177   : > { %v1061_v46 = vpop.xlane.xlu1 %1060  ;;  %v1154_v17 = vperm.slane %v1064_v45, %v2057_v33 }
 0x178   : > { %v1153_v6 = vperm.slane %v1061_v46, %v1845_v47 }
 0x17a   : > { %v1155_v41 = vsel %vm1118_vm6, %v1154_v17, %v1153_v6 }
 0x17b   : > { %v1182_v46 = vsel %vm1171_vm9, %v1155_v41, %v1181_v32 }
 0x17e   : > { %v1067_v50 = vpop.xlane.xlu2 %1066 }
 0x17f   : > { %v1022_v0 = vpop.xlane.xlu1 %1021  ;;  %v1156_v40 = vperm.slane %v1067_v50, %v1845_v47 }
 0x180   : > { %v1133_v30 = vperm.slane %v1022_v0, %v2057_v33 }
 0x181   : > { %v1158_v43 = vsel %vm1118_vm6, %v1157_v39, %v1156_v40 }
 0x182   : > { %v1134_v7 = vsel %vm1118_vm6, %v1133_v30, %v1132_v62  ;;  %v1183_v34 = vsel %vm1173_vm10, %v1158_v43, %v1182_v46 }
 0x183   : > { %v1174_v18 = vsel %vm1173_vm10, %v1134_v7, %v1172_v14  ;;  %v1233_v7 = vperm.slane %v1544_v54, 0 }
 0x185   : > { %v1073_v53 = vpop.xlane.xlu0 %1072 }
 0x186   : > { %v1028_v25 = vpop.xlane.xlu2 %1027  ;;  %v1159_v42 = vperm.slane %v1073_v53, %v1845_v47  ;;  %v1199_v53 = vpop.f32.mrf.mxu2 }
 0x187   : > { %v1025_v48 = vpop.xlane.xlu1 %1024  ;;  %v1136_v56 = vperm.slane %v1028_v25, %v2057_v33 }
 0x188   : > { %v1135_v52 = vperm.slane %v1025_v48, %v1845_v47 }
 0x18a   : > { %v1137_v11 = vsel %vm1118_vm6, %v1136_v56, %v1135_v52 }
 0x18b   : > { %v1176_v19 = vsel %vm1175_vm11, %v1137_v11, %v1174_v18 }
 0x18e   : > { %v1031_v5 = vpop.xlane.xlu2 %1030 }
 0x18f   : > { %v1076_v57 = vpop.xlane.xlu1 %1075  ;;  %v1138_v61 = vperm.slane %v1031_v5, %v1845_v47 }
 0x190   : > { %v1160_v22 = vperm.slane %v1076_v57, %v2057_v33 }
 0x192   : > { %v1161_v24 = vsel %vm1118_vm6, %v1160_v22, %v1159_v42 }
 0x193   : > { %v1184_v48 = vsel %vm1175_vm11, %v1161_v24, %v1183_v34 }
 0x195   : > { %v1034_v12 = vpop.xlane.xlu0 %1033 }
 0x196   : > { %v1139_v16 = vperm.slane %v1034_v12, %v2057_v33 }
 0x197   : > { %v1079_v44 = vpop.xlane.xlu1 %1078 }
 0x198   : > { %v1140_v38 = vsel %vm1118_vm6, %v1139_v16, %v1138_v61  ;;  %v1162_v49 = vperm.slane %v1079_v44, %v1845_v47 }
 0x199   : > { %v1178_v23 = vsel %vm1177_vm12, %v1140_v38, %v1176_v19 }
 0x19a   : > { %v1198_v29 = vadd.f32 %v1197_v51, %v1178_v23 }
 0x19c   : > { %v1205_v35 = vadd.f32 %v1618_v20, %v1198_v29 }
 0x19d   : > { %v1082_v45 = vpop.xlane.xlu2 %1081 }
 0x19e   : > { %v1163_v50 = vperm.slane %v1082_v45, %v2057_v33  ;;  %v1207_v0 = vsel %vm517_vm0, %v1205_v35, -inf }
 0x19f   : > { %1208 = vmax.xlane.f32.xlu0 %v1207_v0 }
 0x1a0   : > { %v1164_v25 = vsel %vm1118_vm6, %v1163_v50, %v1162_v49 }
 0x1a1   : > { %v1185_v55 = vsel %vm1177_vm12, %v1164_v25, %v1184_v48 }
 0x1a2   : > { %v1200_v27 = vadd.f32 %v1199_v53, %v1185_v55 }
 0x1a4   : > { %v1206_v28 = vadd.f32 %v1618_v20, %v1200_v27 }
 0x1a6   : > { %v1210_v13 = vsel %vm517_vm0, %v1206_v28, -inf }
 0x1a7   : > { %1211 = vmax.xlane.f32.xlu1 %v1210_v13 }
 0x212   : > { %v1209_v47 = vpop.xlane.xlu0 %1208 }
 0x213   : > { %v1213_v33 = vsub.f32 %v1205_v35, %v1209_v47 }
 0x215   : > { %v1215_v30 = vmul.f32 1.442695, %v1213_v33 }
 0x217   : > { %1619 = vpow2.f32 %v1215_v30 }
 0x21a   : > { %v1212_v59 = vpop.xlane.xlu1 %1211 }
 0x21b   : > { %v1214_v56 = vsub.f32 %v1206_v28, %v1212_v59 }
 0x21d   : > { %v1620_v52 = vpop.eup %1619  ;;  %v1217_v57 = vmul.f32 1.442695, %v1214_v56 }
 0x21e   : > { %v1219_v15 = vsel %vm517_vm0, %v1620_v52, 0.0 }
 0x21f   : > { %1621 = vpow2.f32 %v1217_v57  ;;  %1220 = vadd.xlane.f32.xlu2 %v1219_v15 }
 0x225   : > { %v1622_v62 = vpop.eup %1621 }
 0x226   : > { %v1222_v31 = vsel %vm517_vm0, %v1622_v62, 0.0 }
 0x227   : > { %1223 = vadd.xlane.f32.xlu0 %v1222_v31 }
 0x292   : > { %v1221_v3 = vpop.xlane.xlu2 %1220 }
 0x293   : > { %1623 = vrcp.f32 %v1221_v3 }
 0x299   : > { %v1624_v60 = vpop.eup %1623 }
 0x29a   : > { %v1224_v5 = vpop.xlane.xlu0 %1223  ;;  %v1227_v9 = vmul.f32 %v1624_v60, %v1620_v52 }
 0x29b   : > { %1625 = vrcp.f32 %v1224_v5 }
 0x29c   : > { %v1235_v12 = vmul.f32 %v1233_v7, %v1227_v9 }
 0x2a1   : > { %v1626_v10 = vpop.eup %1625 }
 0x2a2   : > { %v1228_v11 = vmul.f32 %v1626_v10, %v1622_v62 }
 0x2a4   : > { %v1236_v14 = vmul.f32 %v1233_v7, %v1228_v11 }
 0x2a6   : > { %v1237_v61 = vpack.c.bf16 %v1236_v14, %v1235_v12 }
 0x2a8   : > { %1549 = vmatmul.msk.bf16.vlgmr.msra.gmra.mxu3 %vm517_vm0, %v1237_v61 }
 0x32b   : > { %v1256_v16 = vpop.f32.mrf.mxu3 }
 0x32c   : > { %v1261_v1 = vpack.c.bf16 %v1256_v16, %v1256_v16 }
 0x32e   : > { %1264 = vst.msk [vmem:[%s491_s19] sm:$0xf] %vm1263_vm14, %v1261_v1 }
 0x333   : > { %v1258_v17 = vpop.f32.mrf.mxu3 }
 0x334   : > { %v1262_v6 = vpack.c.bf16 %v1258_v17, %v1258_v17 }
 0x336   : > { %1265 = vst.msk [vmem:[%s491_s19 + $0x4] sm:$0xf] %vm1263_vm14, %v1262_v6 }
 0x337 PF: > { %s17_s28 = sadd.s32 1, %s1665_s28   ;;  %s2181_s24 = smov %s1657_s26 }
 0x338   : > { %p14_p7 = scmp.ge.s32.totalorder %s17_s28, 10   ;;  %s2182_s25 = smov %s1661_s27 }
 0x339   : > { %s2183_s26 = smov %s2186_s29  ;;  %s2184_s27 = smov %s2190_s30 }
 0x33a   :  { %16 = sbr.rel (!%p14_p7) target bundleno = 3 (0x3), region = 96 }

// kernel: encoder_forward.12
= control target key start
LH: loop header
LB: loop body
LE: loop exit
PB: predicated region body
PF: predicated region fallthrough
CT: control target
= control target key end

     0   :  { %vm23_vm0 = vcmask 523264   ;;  %v564_v8 = vmov 64.0   ;;  %vm256_vm14 = vcmask 125952   ;;  %s565_s14 = smov 64   ;;  %s567_s23 = smov 32   ;;  %vm239_vm15 = vcmask 519168   ;;  %s984_s0 = inlined_call_operand.vmem [shape: f32[32,64], index: 0, kind: input, shape index: {}]   ;;  %s985_s1 = inlined_call_operand.vmem [shape: bf16[64,256], index: 1, kind: input, shape index: {}]   ;;  %s986_s2 = inlined_call_operand.vmem [shape: f32[1,256], index: 2, kind: input, shape index: {}]   ;;  %s987_s5 = inlined_call_operand.vmem [shape: bf16[4,32,16], index: 5, kind: output, shape index: {2}]   ;;  %s988_s3 = inlined_call_operand.vmem [shape: bf16[4,32,16], index: 3, kind: output, shape index: {0}]   ;;  %s989_s6 = inlined_call_operand.vmem [shape: bf16[32,64], index: 6, kind: output, shape index: {3}]   ;;  %s990_s4 = inlined_call_operand.vmem [shape: bf16[4,32,16], index: 4, kind: output, shape index: {1}]  }
   0x1   :  { %v21_v0 = vld [vmem:[%s984_s0 + $0x10] sm:$0xff]  ;;  %v19_v1 = vld [vmem:[%s984_s0] sm:$0xff]  ;;  %v22_v4 = vld [vmem:[%s984_s0 + $0x18] sm:$0xff]  ;;  %554 = vrcp.f32 %v564_v8  ;;  %s568_s24 = smov 112   ;;  %s569_s30 = smov 16  }
   0x2   :  { %v30_v2 = vsel %vm23_vm0, %v21_v0, 0.0  ;;  %v24_v3 = vsel %vm23_vm0, %v19_v1, 0.0  ;;  %v20_v5 = vld [vmem:[%s984_s0 + $0x8] sm:$0xff]  ;;  %v33_v6 = vsel %vm23_vm0, %v22_v4, 0.0  ;;  %v484_v35 = vld [vmem:[%s985_s1 + $0x30] sm:$0xf] }
   0x3   :  { %31 = vadd.xlane.f32.xlu0 %v30_v2  ;;  %25 = vadd.xlane.f32.xlu1 %v24_v3  ;;  %v27_v7 = vsel %vm23_vm0, %v20_v5, 0.0  ;;  %v537_v36 = vld [vmem:[%s985_s1 + $0x34] sm:$0xf0]  ;;  %v536_v37 = vld [vmem:[%s985_s1 + $0x34] sm:$0xf]  ;;  %s570_s7 = smov 96  }
   0x4   :  { %v485_v38 = vor.u32 %v537_v36, %v484_v35  ;;  %v486_v39 = vld [vmem:[%s985_s1 + $0x38] sm:$0xf0]  ;;  %v476_v41 = vld [vmem:[%s985_s1 + $0x20] sm:$0xf]  ;;  %v535_v42 = vld [vmem:[%s985_s1 + $0x24] sm:$0xf0] }
   0x5   :  { %v489_v40 = vor.u32 %v536_v37, %v486_v39  ;;  %v534_v43 = vld [vmem:[%s985_s1 + $0x24] sm:$0xf]  ;;  %v477_v44 = vor.u32 %v535_v42, %v476_v41  ;;  %v478_v45 = vld [vmem:[%s985_s1 + $0x28] sm:$0xf0]  ;;  %v468_v47 = vld [vmem:[%s985_s1 + $0x10] sm:$0xf] }
   0x6   :  { %185 = vmatpush.bf16.msra.mxu0 %v485_v38  ;;  %538 = vmatpush.bf16.msra.mxu2 %v485_v38  ;;  %v481_v46 = vor.u32 %v534_v43, %v478_v45  ;;  %v533_v48 = vld [vmem:[%s985_s1 + $0x14] sm:$0xf0]  ;;  %v532_v49 = vld [vmem:[%s985_s1 + $0x14] sm:$0xf]  ;;  %v470_v51 = vld [vmem:[%s985_s1 + $0x18] sm:$0xf0] }
   0x7   :  { %v555_v9 = vpop.eup %554  ;;  %204 = vmatpush.bf16.msra.mxu1 %v489_v40  ;;  %542 = vmatpush.bf16.msra.mxu3 %v489_v40  ;;  %v469_v50 = vor.u32 %v533_v48, %v468_v47  ;;  %v473_v52 = vor.u32 %v532_v49, %v470_v51  ;;  %v460_v53 = vld [vmem:[%s985_s1] sm:$0xf]  ;;  %v531_v54 = vld [vmem:[%s985_s1 + $0x4] sm:$0xf0]  ;;  %v530_v55 = vld [vmem:[%s985_s1 + $0x4] sm:$0xf] }
   0x8   :  { %v37_v10 = vmul.f32 64.0, %v555_v9  ;;  %vm41_vm1 = vweird.f32 %v555_v9  ;;  %v461_v56 = vor.u32 %v531_v54, %v460_v53  ;;  %v462_v57 = vld [vmem:[%s985_s1 + $0x8] sm:$0xf0]  ;;  %s571_s8 = smov 80  }
   0x9   :  { %v465_v58 = vor.u32 %v530_v55, %v462_v57 }
   0xa   :  { %v38_v11 = vsub.f32 1.0, %v37_v10  ;;  %186 = vmatpush.bf16.msra.mxu0 %v477_v44  ;;  %539 = vmatpush.bf16.msra.mxu2 %v477_v44 }
   0xb   :  { %34 = vadd.xlane.f32.xlu0 %v33_v6  ;;  %28 = vadd.xlane.f32.xlu1 %v27_v7 }
   0xc   :  { %v39_v12 = vmul.f32 %v555_v9, %v38_v11  ;;  %205 = vmatpush.bf16.msra.mxu1 %v481_v46  ;;  %543 = vmatpush.bf16.msra.mxu3 %v481_v46 }
   0xe   :  { %v40_v13 = vadd.f32 %v555_v9, %v39_v12  ;;  %187 = vmatpush.bf16.msra.mxu0 %v469_v50  ;;  %540 = vmatpush.bf16.msra.mxu2 %v469_v50 }
  0x10   :  { %v623_v14 = vsel %vm41_vm1, %v555_v9, %v40_v13  ;;  %206 = vmatpush.bf16.msra.mxu1 %v473_v52  ;;  %544 = vmatpush.bf16.msra.mxu3 %v473_v52 }
  0x12   :  { %188 = vmatpush.bf16.msra.mxu0 %v461_v56  ;;  %541 = vmatpush.bf16.msra.mxu2 %v461_v56 }
  0x14   :  { %207 = vmatpush.bf16.msra.mxu1 %v465_v58  ;;  %545 = vmatpush.bf16.msra.mxu3 %v465_v58 }
  0x76   :  { %v32_v15 = vpop.xlane.xlu0 %31  ;;  %v26_v16 = vpop.xlane.xlu1 %25 }
  0x77   :  { %v45_v17 = vmul.f32 %v623_v14, %v32_v15  ;;  %v43_v18 = vmul.f32 %v623_v14, %v26_v16 }
  0x79   :  { %v627_v19 = vsub.f32 %v21_v0, %v45_v17  ;;  %v629_v20 = vsub.f32 %v19_v1, %v43_v18 }
  0x7b   :  { %v53_v21 = vmul.f32 %v627_v19, %v627_v19  ;;  %v51_v22 = vmul.f32 %v629_v20, %v629_v20 }
  0x7d   :  { %v61_v23 = vsel %vm23_vm0, %v53_v21, 0.0  ;;  %v55_v24 = vsel %vm23_vm0, %v51_v22, 0.0 }
  0x7e   :  { %62 = vadd.xlane.f32.xlu2 %v61_v23  ;;  %v35_v25 = vpop.xlane.xlu0 %34  ;;  %56 = vadd.xlane.f32.xlu0 %v55_v24  ;;  %v29_v26 = vpop.xlane.xlu1 %28 }
  0x7f   :  { %v46_v27 = vmul.f32 %v623_v14, %v35_v25  ;;  %v44_v28 = vmul.f32 %v623_v14, %v29_v26 }
  0x81   :  { %v639_v29 = vsub.f32 %v22_v4, %v46_v27  ;;  %v641_v30 = vsub.f32 %v20_v5, %v44_v28 }
  0x83   :  { %v54_v31 = vmul.f32 %v639_v29, %v639_v29  ;;  %v52_v32 = vmul.f32 %v641_v30, %v641_v30 }
  0x85   :  { %v64_v33 = vsel %vm23_vm0, %v54_v31, 0.0  ;;  %v58_v34 = vsel %vm23_vm0, %v52_v32, 0.0 }
  0x86   :  { %65 = vadd.xlane.f32.xlu2 %v64_v33  ;;  %59 = vadd.xlane.f32.xlu1 %v58_v34 }
  0xf1   :  { %v63_v59 = vpop.xlane.xlu2 %62  ;;  %v57_v60 = vpop.xlane.xlu0 %56 }
  0xf2   :  { %v69_v61 = vmul.f32 %v63_v59, %v623_v14  ;;  %v67_v62 = vmul.f32 %v57_v60, %v623_v14 }
  0xf4   :  { %v73_v63 = vadd.f32 1e-05, %v69_v61  ;;  %v71_v0 = vadd.f32 1e-05, %v67_v62 }
  0xf6   :  { %556 = vrsqrt.f32 %v73_v63  ;;  %vm101_vm2 = vweird.f32 %v73_v63  ;;  %vm81_vm8 = vweird.f32 %v71_v0 }
  0xf7   :  { %558 = vrsqrt.f32 %v71_v0 }
  0xf9   :  { %v66_v1 = vpop.xlane.xlu2 %65  ;;  %v60_v2 = vpop.xlane.xlu1 %59 }
  0xfa   :  { %v70_v3 = vmul.f32 %v66_v1, %v623_v14  ;;  %v68_v4 = vmul.f32 %v60_v2, %v623_v14 }
  0xfc   :  { %v557_v5 = vpop.eup %556  ;;  %v74_v6 = vadd.f32 1e-05, %v70_v3  ;;  %v72_v7 = vadd.f32 1e-05, %v68_v4 }
  0xfd   :  { %v559_v8 = vpop.eup %558  ;;  %v96_v9 = vmul.f32 %v557_v5, %v73_v63  ;;  %vm102_vm3 = vweird.f32 %v557_v5 }
  0xfe   :  { %v76_v10 = vmul.f32 %v559_v8, %v71_v0  ;;  %560 = vrsqrt.f32 %v74_v6  ;;  %vm111_vm4 = vweird.f32 %v74_v6  ;;  %vm701_vm6 = vmor %vm101_vm2, %vm102_vm3  ;;  %vm82_vm7 = vweird.f32 %v559_v8 }
  0xff   :  { %v97_v11 = vmul.f32 %v557_v5, %v96_v9  ;;  %562 = vrsqrt.f32 %v72_v7  ;;  %vm83_vm11 = vmor %vm81_vm8, %vm82_vm7  ;;  %vm91_vm12 = vweird.f32 %v72_v7 }
 0x100   :  { %v77_v12 = vmul.f32 %v559_v8, %v76_v10 }
 0x101   :  { %v98_v13 = vmul.f32 0.5, %v97_v11 }
 0x102   :  { %v78_v15 = vmul.f32 0.5, %v77_v12 }
 0x103   :  { %v99_v18 = vsub.f32 1.5, %v98_v13 }
 0x104   :  { %v561_v16 = vpop.eup %560  ;;  %v79_v22 = vsub.f32 1.5, %v78_v15 }
 0x105   :  { %v563_v17 = vpop.eup %562  ;;  %v106_v21 = vmul.f32 %v561_v16, %v74_v6  ;;  %v100_v25 = vmul.f32 %v557_v5, %v99_v18  ;;  %vm112_vm5 = vweird.f32 %v561_v16 }
 0x106   :  { %v86_v23 = vmul.f32 %v563_v17, %v72_v7  ;;  %v80_v28 = vmul.f32 %v559_v8, %v79_v22  ;;  %vm113_vm9 = vmor %vm111_vm4, %vm112_vm5  ;;  %vm92_vm10 = vweird.f32 %v563_v17 }
 0x107   :  { %v107_v14 = vmul.f32 %v561_v16, %v106_v21  ;;  %v104_v35 = vsel %vm701_vm6, %v557_v5, %v100_v25  ;;  %vm93_vm13 = vmor %vm91_vm12, %vm92_vm10 }
 0x108   :  { %v87_v24 = vmul.f32 %v563_v17, %v86_v23  ;;  %v84_v37 = vsel %vm83_vm11, %v559_v8, %v80_v28  ;;  %v117_v40 = vmul.f32 %v104_v35, %v627_v19  ;;  %v129_v19 = vld [vmem:[%s986_s2] sm:$0x3]  ;;  %s566_s2 = smov 48  }
 0x109   :  { %v108_v26 = vmul.f32 0.5, %v107_v14  ;;  %v115_v42 = vmul.f32 %v84_v37, %v629_v20  ;;  %v131_v46 = vperm.slane %v129_v19, 0 }
 0x10a   :  { %v88_v31 = vmul.f32 0.5, %v87_v24 }
 0x10b   :  { %v109_v32 = vsub.f32 1.5, %v108_v26 }
 0x10c   :  { %v89_v33 = vsub.f32 1.5, %v88_v31 }
 0x10d   :  { %v110_v34 = vmul.f32 %v561_v16, %v109_v32 }
 0x10e   :  { %v90_v36 = vmul.f32 %v563_v17, %v89_v33 }
 0x10f   :  { %v114_v38 = vsel %vm113_vm9, %v561_v16, %v110_v34 }
 0x110   :  { %v94_v39 = vsel %vm93_vm13, %v563_v17, %v90_v36  ;;  %v118_v41 = vmul.f32 %v114_v38, %v639_v29  ;;  %v132_v29 = vperm.slane %v129_v19, 1 }
 0x111   :  { %v116_v43 = vmul.f32 %v94_v39, %v641_v30 }
 0x112   :  { %v120_v44 = vpack.c.bf16 %v118_v41, %v117_v40 }
 0x113   :  { %v119_v45 = vpack.c.bf16 %v116_v43, %v115_v42 }
 0x114   :  { %491 = vmatmul.msk.bf16.vlgmr.msra.gmra.mxu2 %vm23_vm0, %v120_v44  ;;  %493 = vmatmul.msk.bf16.vlgmr.msra.gmra.mxu3 %vm23_vm0, %v120_v44 }
 0x115   :  { %490 = vmatmul.msk.bf16.vlgmr.msra.gmra.mxu0 %vm23_vm0, %v119_v45  ;;  %492 = vmatmul.msk.bf16.vlgmr.msra.gmra.mxu1 %vm23_vm0, %v119_v45 }
 0x192   :  { %v190_v47 = vpop.f32.mrf.mxu0  ;;  %v209_v20 = vpop.f32.mrf.mxu1 }
 0x193   :  { %v191_v48 = vadd.f32 %v190_v47, %v131_v46  ;;  %v210_v30 = vadd.f32 %v209_v20, %v132_v29 }
 0x195   :  { %v244_v49 = vmul.f32 0.14433756, %v191_v48  ;;  %v252_v50 = vpack.c.bf16 %v191_v48, %v191_v48  ;;  %v219_v51 = vpack.c.bf16 %v210_v30, %v210_v30 }
 0x197   :  { %v248_v52 = vpack.c.bf16 %v244_v49, %v244_v49  ;;  %281 = vst.msk [vmem:[%s987_s5] sm:$0xf] %vm256_vm14, %v219_v51  ;;  %227 = vrot.lane.b32.xlu2 %v219_v51, %s565_s14  ;;  %306 = vrot.lane.b32.xlu1 %v252_v50, %s566_s2  ;;  %v195_v53 = vpop.f32.mrf.mxu2  ;;  %v214_v54 = vpop.f32.mrf.mxu3 }
 0x198   :  { %265 = vrot.lane.b32.xlu0 %v252_v50, %s565_s14  ;;  %v196_v55 = vadd.f32 %v195_v53, %v131_v46  ;;  %v215_v56 = vadd.f32 %v214_v54, %v132_v29 }
 0x199   :  { %257 = vst.msk [vmem:[%s988_s3] sm:$0xf] %vm256_vm14, %v248_v52 }
 0x19a   :  { %v246_v57 = vmul.f32 0.14433756, %v196_v55  ;;  %v729_v58 = vpack.c.bf16 %v215_v56, %v215_v56  ;;  %v192_v59 = vpop.f32.mrf.mxu0  ;;  %v211_v60 = vpop.f32.mrf.mxu1  ;;  %v254_v10 = vpack.c.bf16 %v196_v55, %v196_v55 }
 0x19b   :  { %v193_v61 = vadd.f32 %v192_v59, %v131_v46  ;;  %v212_v62 = vadd.f32 %v211_v60, %v132_v29 }
 0x19c   :  { %v250_v63 = vpack.c.bf16 %v246_v57, %v246_v57  ;;  %283 = vst.msk [vmem:[%s987_s5 + $0x8] sm:$0xf] %vm256_vm14, %v729_v58 }
 0x19d   :  { %v245_v0 = vmul.f32 0.14433756, %v193_v61  ;;  %v736_v1 = vpack.c.bf16 %v212_v62, %v212_v62  ;;  %v253_v11 = vpack.c.bf16 %v193_v61, %v193_v61 }
 0x19e   :  { %259 = vst.msk [vmem:[%s988_s3 + $0x8] sm:$0xf] %vm256_vm14, %v250_v63 }
 0x19f   :  { %v249_v2 = vpack.c.bf16 %v245_v0, %v245_v0  ;;  %282 = vst.msk [vmem:[%s987_s5 + $0x4] sm:$0xf] %vm256_vm14, %v736_v1  ;;  %357 = vrot.lane.b32.xlu1 %v252_v50, %s567_s23  ;;  %289 = vrot.lane.b32.xlu2 %v248_v52, %s568_s24  ;;  %v197_v3 = vpop.f32.mrf.mxu2  ;;  %v216_v4 = vpop.f32.mrf.mxu3 }
 0x1a0   :  { %323 = vrot.lane.b32.xlu0 %v219_v51, %s568_s24  ;;  %v198_v5 = vadd.f32 %v197_v3, %v131_v46  ;;  %v217_v6 = vadd.f32 %v216_v4, %v132_v29 }
 0x1a1   :  { %258 = vst.msk [vmem:[%s988_s3 + $0x4] sm:$0xf] %vm256_vm14, %v249_v2 }
 0x1a2   :  { %v247_v7 = vmul.f32 0.14433756, %v198_v5  ;;  %v222_v8 = vpack.c.bf16 %v217_v6, %v217_v6  ;;  %v255_v12 = vpack.c.bf16 %v198_v5, %v198_v5 }
 0x1a4   :  { %v251_v9 = vpack.c.bf16 %v247_v7, %v247_v7  ;;  %284 = vst.msk [vmem:[%s987_s5 + $0xc] sm:$0xf] %vm256_vm14, %v222_v8 }
 0x1a6   :  { %260 = vst.msk [vmem:[%s988_s3 + $0xc] sm:$0xf] %vm256_vm14, %v251_v9 }
 0x1a7   :  { %408 = vrot.lane.b32.xlu1 %v252_v50, %s569_s30  ;;  %340 = vrot.lane.b32.xlu2 %v248_v52, %s570_s7 }
 0x1a8   :  { %374 = vrot.lane.b32.xlu0 %v219_v51, %s570_s7 }
 0x1af   :  { %231 = vrot.lane.b32.xlu1 %v729_v58, %s565_s14  ;;  %391 = vrot.lane.b32.xlu2 %v248_v52, %s571_s8 }
 0x1b0   :  { %425 = vrot.lane.b32.xlu0 %v219_v51, %s571_s8 }
 0x1b7   :  { %269 = vrot.lane.b32.xlu1 %v254_v10, %s565_s14  ;;  %310 = vrot.lane.b32.xlu2 %v254_v10, %s566_s2 }
 0x1b8   :  { %229 = vrot.lane.b32.xlu0 %v736_v1, %s565_s14 }
 0x1bf   :  { %327 = vrot.lane.b32.xlu1 %v729_v58, %s568_s24  ;;  %361 = vrot.lane.b32.xlu2 %v254_v10, %s567_s23 }
 0x1c0   :  { %293 = vrot.lane.b32.xlu0 %v250_v63, %s568_s24 }
 0x1c7   :  { %378 = vrot.lane.b32.xlu1 %v729_v58, %s570_s7  ;;  %412 = vrot.lane.b32.xlu2 %v254_v10, %s569_s30 }
 0x1c8   :  { %308 = vrot.lane.b32.xlu0 %v253_v11, %s566_s2 }
 0x1cf   :  { %291 = vrot.lane.b32.xlu1 %v249_v2, %s568_s24  ;;  %267 = vrot.lane.b32.xlu2 %v253_v11, %s565_s14 }
 0x1d0   :  { %344 = vrot.lane.b32.xlu0 %v250_v63, %s570_s7 }
 0x1d7   :  { %342 = vrot.lane.b32.xlu1 %v249_v2, %s570_s7  ;;  %325 = vrot.lane.b32.xlu2 %v736_v1, %s568_s24 }
 0x1d8   :  { %359 = vrot.lane.b32.xlu0 %v253_v11, %s567_s23 }
 0x1df   :  { %393 = vrot.lane.b32.xlu1 %v249_v2, %s571_s8  ;;  %376 = vrot.lane.b32.xlu2 %v736_v1, %s570_s7 }
 0x1e0   :  { %395 = vrot.lane.b32.xlu0 %v250_v63, %s571_s8 }
 0x1e7   :  { %312 = vrot.lane.b32.xlu1 %v255_v12, %s566_s2  ;;  %233 = vrot.lane.b32.xlu2 %v222_v8, %s565_s14 }
 0x1e8   :  { %410 = vrot.lane.b32.xlu0 %v253_v11, %s569_s30 }
 0x1ef   :  { %363 = vrot.lane.b32.xlu1 %v255_v12, %s567_s23  ;;  %295 = vrot.lane.b32.xlu2 %v251_v9, %s568_s24 }
 0x1f0   :  { %271 = vrot.lane.b32.xlu0 %v255_v12, %s565_s14 }
 0x1f1   :  { %v228_v13 = vpop.permute.xlu2 %227 }
 0x1f2   :  { %240 = vst.msk [vmem:[%s989_s6] sm:$0xf] %vm239_vm15, %v228_v13 }
 0x1f7   :  { %414 = vrot.lane.b32.xlu1 %v255_v12, %s569_s30  ;;  %346 = vrot.lane.b32.xlu2 %v251_v9, %s570_s7 }
 0x1f8   :  { %329 = vrot.lane.b32.xlu0 %v222_v8, %s568_s24 }
 0x1f9   :  { %v290_v15 = vpop.permute.xlu2 %289 }
 0x1fa   :  { %494 = vst.msk [vmem:[%s988_s3 + $0x10] sm:$0xf] %vm256_vm14, %v290_v15 }
 0x1ff   :  { %429 = vrot.lane.b32.xlu1 %v729_v58, %s571_s8  ;;  %397 = vrot.lane.b32.xlu2 %v251_v9, %s571_s8 }
 0x200   :  { %380 = vrot.lane.b32.xlu0 %v222_v8, %s570_s7 }
 0x201   :  { %v341_v16 = vpop.permute.xlu2 %340 }
 0x202   :  { %506 = vst.msk [vmem:[%s988_s3 + $0x20] sm:$0xf] %vm256_vm14, %v341_v16 }
 0x207   :  { %427 = vrot.lane.b32.xlu2 %v736_v1, %s571_s8 }
 0x208   :  { %431 = vrot.lane.b32.xlu0 %v222_v8, %s571_s8 }
 0x209   :  { %v307_v17 = vpop.permute.xlu1 %306  ;;  %v392_v18 = vpop.permute.xlu2 %391 }
 0x20a   :  { %498 = vst.msk [vmem:[%s990_s4 + $0x10] sm:$0xf] %vm256_vm14, %v307_v17  ;;  %v266_v21 = vpop.permute.xlu0 %265 }
 0x20b   :  { %277 = vst.msk [vmem:[%s990_s4] sm:$0xf] %vm256_vm14, %v266_v21 }
 0x20c   :  { %518 = vst.msk [vmem:[%s988_s3 + $0x30] sm:$0xf] %vm256_vm14, %v392_v18 }
 0x211   :  { %v358_v22 = vpop.permute.xlu1 %357  ;;  %v311_v23 = vpop.permute.xlu2 %310 }
 0x212   :  { %510 = vst.msk [vmem:[%s990_s4 + $0x20] sm:$0xf] %vm256_vm14, %v358_v22  ;;  %v324_v14 = vpop.permute.xlu0 %323 }
 0x213   :  { %502 = vst.msk [vmem:[%s987_s5 + $0x10] sm:$0xf] %vm256_vm14, %v324_v14 }
 0x214   :  { %500 = vst.msk [vmem:[%s990_s4 + $0x18] sm:$0xf] %vm256_vm14, %v311_v23 }
 0x219   :  { %v409_v24 = vpop.permute.xlu1 %408  ;;  %v362_v25 = vpop.permute.xlu2 %361 }
 0x21a   :  { %522 = vst.msk [vmem:[%s990_s4 + $0x30] sm:$0xf] %vm256_vm14, %v409_v24  ;;  %v375_v26 = vpop.permute.xlu0 %374 }
 0x21b   :  { %514 = vst.msk [vmem:[%s987_s5 + $0x20] sm:$0xf] %vm256_vm14, %v375_v26 }
 0x21c   :  { %512 = vst.msk [vmem:[%s990_s4 + $0x28] sm:$0xf] %vm256_vm14, %v362_v25 }
 0x221   :  { %v232_v27 = vpop.permute.xlu1 %231  ;;  %v413_v28 = vpop.permute.xlu2 %412 }
 0x222   :  { %242 = vst.msk [vmem:[%s989_s6 + $0x8] sm:$0xf] %vm239_vm15, %v232_v27  ;;  %v426_v31 = vpop.permute.xlu0 %425 }
 0x223   :  { %526 = vst.msk [vmem:[%s987_s5 + $0x30] sm:$0xf] %vm256_vm14, %v426_v31 }
 0x224   :  { %524 = vst.msk [vmem:[%s990_s4 + $0x38] sm:$0xf] %vm256_vm14, %v413_v28 }
 0x229   :  { %v270_v32 = vpop.permute.xlu1 %269  ;;  %v268_v33 = vpop.permute.xlu2 %267 }
 0x22a   :  { %279 = vst.msk [vmem:[%s990_s4 + $0x8] sm:$0xf] %vm256_vm14, %v270_v32  ;;  %v230_v34 = vpop.permute.xlu0 %229 }
 0x22b   :  { %241 = vst.msk [vmem:[%s989_s6 + $0x4] sm:$0xf] %vm239_vm15, %v230_v34 }
 0x22c   :  { %278 = vst.msk [vmem:[%s990_s4 + $0x4] sm:$0xf] %vm256_vm14, %v268_v33 }
 0x231   :  { %v328_v35 = vpop.permute.xlu1 %327  ;;  %v326_v36 = vpop.permute.xlu2 %325 }
 0x232   :  { %504 = vst.msk [vmem:[%s987_s5 + $0x18] sm:$0xf] %vm256_vm14, %v328_v35  ;;  %v294_v37 = vpop.permute.xlu0 %293 }
 0x233   :  { %496 = vst.msk [vmem:[%s988_s3 + $0x18] sm:$0xf] %vm256_vm14, %v294_v37 }
 0x234   :  { %503 = vst.msk [vmem:[%s987_s5 + $0x14] sm:$0xf] %vm256_vm14, %v326_v36 }
 0x239   :  { %v379_v38 = vpop.permute.xlu1 %378  ;;  %v377_v39 = vpop.permute.xlu2 %376 }
 0x23a   :  { %516 = vst.msk [vmem:[%s987_s5 + $0x28] sm:$0xf] %vm256_vm14, %v379_v38  ;;  %v309_v40 = vpop.permute.xlu0 %308 }
 0x23b   :  { %499 = vst.msk [vmem:[%s990_s4 + $0x14] sm:$0xf] %vm256_vm14, %v309_v40 }
 0x23c   :  { %515 = vst.msk [vmem:[%s987_s5 + $0x24] sm:$0xf] %vm256_vm14, %v377_v39 }
 0x241   :  { %v292_v41 = vpop.permute.xlu1 %291  ;;  %v234_v42 = vpop.permute.xlu2 %233 }
 0x242   :  { %495 = vst.msk [vmem:[%s988_s3 + $0x14] sm:$0xf] %vm256_vm14, %v292_v41  ;;  %v345_v43 = vpop.permute.xlu0 %344 }
 0x243   :  { %508 = vst.msk [vmem:[%s988_s3 + $0x28] sm:$0xf] %vm256_vm14, %v345_v43 }
 0x244   :  { %243 = vst.msk [vmem:[%s989_s6 + $0xc] sm:$0xf] %vm239_vm15, %v234_v42 }
 0x249   :  { %v343_v44 = vpop.permute.xlu1 %342  ;;  %v296_v45 = vpop.permute.xlu2 %295 }
 0x24a   :  { %507 = vst.msk [vmem:[%s988_s3 + $0x24] sm:$0xf] %vm256_vm14, %v343_v44  ;;  %v360_v19 = vpop.permute.xlu0 %359 }
 0x24b   :  { %511 = vst.msk [vmem:[%s990_s4 + $0x24] sm:$0xf] %vm256_vm14, %v360_v19 }
 0x24c   :  { %497 = vst.msk [vmem:[%s988_s3 + $0x1c] sm:$0xf] %vm256_vm14, %v296_v45 }
 0x251   :  { %v394_v46 = vpop.permute.xlu1 %393  ;;  %v347_v29 = vpop.permute.xlu2 %346 }
 0x252   :  { %519 = vst.msk [vmem:[%s988_s3 + $0x34] sm:$0xf] %vm256_vm14, %v394_v46  ;;  %v396_v47 = vpop.permute.xlu0 %395 }
 0x253   :  { %520 = vst.msk [vmem:[%s988_s3 + $0x38] sm:$0xf] %vm256_vm14, %v396_v47 }
 0x254   :  { %509 = vst.msk [vmem:[%s988_s3 + $0x2c] sm:$0xf] %vm256_vm14, %v347_v29 }
 0x259   :  { %v313_v20 = vpop.permute.xlu1 %312  ;;  %v398_v48 = vpop.permute.xlu2 %397 }
 0x25a   :  { %501 = vst.msk [vmem:[%s990_s4 + $0x1c] sm:$0xf] %vm256_vm14, %v313_v20  ;;  %v411_v30 = vpop.permute.xlu0 %410 }
 0x25b   :  { %523 = vst.msk [vmem:[%s990_s4 + $0x34] sm:$0xf] %vm256_vm14, %v411_v30 }
 0x25c   :  { %521 = vst.msk [vmem:[%s988_s3 + $0x3c] sm:$0xf] %vm256_vm14, %v398_v48 }
 0x261   :  { %v364_v49 = vpop.permute.xlu1 %363  ;;  %v428_v50 = vpop.permute.xlu2 %427 }
 0x262   :  { %513 = vst.msk [vmem:[%s990_s4 + $0x2c] sm:$0xf] %vm256_vm14, %v364_v49  ;;  %v272_v51 = vpop.permute.xlu0 %271 }
 0x263   :  { %280 = vst.msk [vmem:[%s990_s4 + $0xc] sm:$0xf] %vm256_vm14, %v272_v51 }
 0x264   :  { %527 = vst.msk [vmem:[%s987_s5 + $0x34] sm:$0xf] %vm256_vm14, %v428_v50 }
 0x269   :  { %v415_v52 = vpop.permute.xlu1 %414 }
 0x26a   :  { %525 = vst.msk [vmem:[%s990_s4 + $0x3c] sm:$0xf] %vm256_vm14, %v415_v52  ;;  %v330_v53 = vpop.permute.xlu0 %329 }
 0x26b   :  { %505 = vst.msk [vmem:[%s987_s5 + $0x1c] sm:$0xf] %vm256_vm14, %v330_v53 }
 0x271   :  { %v430_v54 = vpop.permute.xlu1 %429 }
 0x272   :  { %528 = vst.msk [vmem:[%s987_s5 + $0x38] sm:$0xf] %vm256_vm14, %v430_v54  ;;  %v381_v55 = vpop.permute.xlu0 %380 }
 0x273   :  { %517 = vst.msk [vmem:[%s987_s5 + $0x2c] sm:$0xf] %vm256_vm14, %v381_v55 }
 0x27a   :  { %v432_v56 = vpop.permute.xlu0 %431 }
 0x27b   :  { %529 = vst.msk [vmem:[%s987_s5 + $0x3c] sm:$0xf] %vm256_vm14, %v432_v56 }

// kernel: encoder_forward.14
= control target key start
LH: loop header
LB: loop body
LE: loop exit
PB: predicated region body
PF: predicated region fallthrough
CT: control target
= control target key end

     0   :  { %s485_s30 = smov 16   ;;  %s486_s6 = smov 32   ;;  %vm148_vm0 = vcmask 130048   ;;  %vm153_vm1 = vcmask 261120   ;;  %vm158_vm2 = vcmask 392192   ;;  %vm167_vm3 = vcmask 523264   ;;  %s641_s1 = inlined_call_operand.vmem [shape: bf16[4,32,16], index: 1, kind: input, shape index: {}]   ;;  %s642_s2 = inlined_call_operand.vmem [shape: bf16[32,64], index: 2, kind: input, shape index: {}]   ;;  %s643_s4 = inlined_call_operand.vmem [shape: f32[1,64], index: 4, kind: input, shape index: {}]   ;;  %s644_s3 = inlined_call_operand.vmem [shape: bf16[64,64], index: 3, kind: input, shape index: {}]   ;;  %s645_s0 = inlined_call_operand.vmem [shape: f32[32,64], index: 0, kind: input, shape index: {}]   ;;  %s646_s5 = inlined_call_operand.vmem [shape: f32[32,64], index: 5, kind: output, shape index: {}]  }
   0x1   :  { %v422_v0 = vld [vmem:[%s641_s1 + $0x10] sm:$0xff]   ;;  %v424_v1 = vld [vmem:[%s641_s1 + $0x20] sm:$0xff]   ;;  %v423_v6 = vld [vmem:[%s641_s1 + $0x18] sm:$0xff]   ;;  %s487_s7 = smov 48  }
   0x2   :  { %v398_v2 = vunpack.c.l.bf16 %v422_v0  ;;  %v399_v3 = vunpack.c.h.bf16 %v422_v0  ;;  %v406_v4 = vunpack.c.l.bf16 %v424_v1  ;;  %v407_v5 = vunpack.c.h.bf16 %v424_v1  ;;  %v426_v7 = vld [vmem:[%s641_s1 + $0x30] sm:$0xff]   ;;  %v425_v8 = vld [vmem:[%s641_s1 + $0x28] sm:$0xff]   ;;  %v427_v14 = vld [vmem:[%s641_s1 + $0x38] sm:$0xff]  }
   0x3   :  { %v414_v11 = vunpack.c.l.bf16 %v426_v7  ;;  %v415_v12 = vunpack.c.h.bf16 %v426_v7  ;;  %v402_v13 = vunpack.c.l.bf16 %v423_v6  ;;  %v403_v15 = vunpack.c.h.bf16 %v423_v6  ;;  %v381_v24 = vld [vmem:[%s642_s2] sm:$0xff]   ;;  %v420_v29 = vld [vmem:[%s642_s2 + $0x8] sm:$0xff]  }
   0x4   :  { %v436_v9 = vpack.i.bf16 %v399_v3, %v398_v2  ;;  %v446_v10 = vpack.i.bf16 %v407_v5, %v406_v4  ;;  %v410_v16 = vunpack.c.l.bf16 %v425_v8  ;;  %v411_v17 = vunpack.c.h.bf16 %v425_v8  ;;  %v389_v51 = vld [vmem:[%s641_s1] sm:$0xff]  }
   0x5   :  { %v456_v18 = vpack.i.bf16 %v415_v12, %v414_v11  ;;  %v418_v19 = vunpack.c.l.bf16 %v427_v14  ;;  %v419_v20 = vunpack.c.h.bf16 %v427_v14  ;;  %v441_v21 = vpack.i.bf16 %v403_v15, %v402_v13 }
   0x6   :  { %437 = vrot.lane.b32.xlu0 %v436_v9, %s485_s30  ;;  %447 = vrot.lane.b32.xlu1 %v446_v10, %s486_s6  ;;  %v451_v22 = vpack.i.bf16 %v411_v17, %v410_v16  ;;  %v383_v25 = vunpack.c.h.bf16 %v381_v24  ;;  %v382_v26 = vunpack.c.l.bf16 %v381_v24  ;;  %v386_v32 = vunpack.c.l.bf16 %v420_v29  ;;  %v421_v9 = vld [vmem:[%s641_s1 + $0x8] sm:$0xff]  }
   0x7   :  { %457 = vrot.lane.b32.xlu2 %v456_v18, %s487_s7  ;;  %v461_v23 = vpack.i.bf16 %v419_v20, %v418_v19  ;;  %v543_v36 = vunpack.c.h.bf16 %v420_v29  ;;  %v390_v57 = vunpack.c.l.bf16 %v389_v51  ;;  %v391_v58 = vunpack.c.h.bf16 %v389_v51 }
   0x8   :  { %v34_v27 = vmul.f32 0.044715, %v383_v25  ;;  %v33_v28 = vmul.f32 0.044715, %v382_v26  ;;  %v35_v35 = vmul.f32 0.044715, %v386_v32  ;;  %v394_v19 = vunpack.c.l.bf16 %v421_v9 }
   0x9   :  { %v36_v40 = vmul.f32 0.044715, %v543_v36  ;;  %v30_v53 = vmul.f32 0.5, %v383_v25  ;;  %v29_v55 = vmul.f32 0.5, %v382_v26  ;;  %v31_v17 = vmul.f32 0.5, %v386_v32 }
   0xa   :  { %v38_v30 = vmul.f32 %v383_v25, %v34_v27  ;;  %v37_v31 = vmul.f32 %v382_v26, %v33_v28  ;;  %v39_v39 = vmul.f32 %v386_v32, %v35_v35  ;;  %v395_v20 = vunpack.c.h.bf16 %v421_v9  ;;  %v379_v9 = vld [vmem:[%s644_s3 + $0x18] sm:$0xff] }
   0xb   :  { %v40_v44 = vmul.f32 %v543_v36, %v36_v40  ;;  %v32_v35 = vmul.f32 0.5, %v543_v36  ;;  %311 = vmatpush.bf16.msra.mxu0 %v379_v9  ;;  %428 = vmatpush.bf16.msra.mxu1 %v379_v9 }
   0xc   :  { %v42_v33 = vmul.f32 %v383_v25, %v38_v30  ;;  %v41_v34 = vmul.f32 %v382_v26, %v37_v31  ;;  %v43_v43 = vmul.f32 %v386_v32, %v39_v39 }
   0xd   :  { %v44_v46 = vmul.f32 %v543_v36, %v40_v44 }
   0xe   :  { %442 = vrot.lane.b32.xlu0 %v441_v21, %s485_s30  ;;  %452 = vrot.lane.b32.xlu1 %v451_v22, %s486_s6  ;;  %v46_v37 = vadd.f32 %v383_v25, %v42_v33  ;;  %v45_v38 = vadd.f32 %v382_v26, %v41_v34  ;;  %v47_v45 = vadd.f32 %v386_v32, %v43_v43 }
   0xf   :  { %462 = vrot.lane.b32.xlu2 %v461_v23, %s487_s7  ;;  %v48_v50 = vadd.f32 %v543_v36, %v44_v46 }
  0x10   :  { %v50_v41 = vmul.f32 0.7978846, %v46_v37  ;;  %v49_v42 = vmul.f32 0.7978846, %v45_v38  ;;  %v51_v47 = vmul.f32 0.7978846, %v47_v45 }
  0x11   :  { %v52_v59 = vmul.f32 0.7978846, %v48_v50 }
  0x12   :  { %467 = vtanh.f32 %v50_v41 }
  0x13   :  { %469 = vtanh.f32 %v49_v42 }
  0x14   :  { %471 = vtanh.f32 %v51_v47  ;;  %v488_v47 = vmov 64.0  }
  0x15   :  { %473 = vtanh.f32 %v52_v59 }
  0x16   :  { %475 = vrcp.f32 %v488_v47 }
  0x18   :  { %v468_v48 = vpop.eup %467 }
  0x19   :  { %v470_v49 = vpop.eup %469  ;;  %v58_v54 = vadd.f32 1.0, %v468_v48 }
  0x1a   :  { %v57_v56 = vadd.f32 1.0, %v470_v49  ;;  %v472_v6 = vpop.eup %471 }
  0x1b   :  { %v62_v4 = vmul.f32 %v58_v54, %v30_v53  ;;  %v59_v18 = vadd.f32 1.0, %v472_v6  ;;  %v474_v25 = vpop.eup %473 }
  0x1c   :  { %v61_v5 = vmul.f32 %v57_v56, %v29_v55  ;;  %v60_v37 = vadd.f32 1.0, %v474_v25  ;;  %v476_v36 = vpop.eup %475 }
  0x1d   :  { %v63_v31 = vmul.f32 %v59_v18, %v31_v17  ;;  %v181_v48 = vmul.f32 64.0, %v476_v36  ;;  %vm185_vm4 = vweird.f32 %v476_v36 }
  0x1e   :  { %v64_v43 = vmul.f32 %v60_v37, %v32_v35 }
  0x1f   :  { %v182_v49 = vsub.f32 1.0, %v181_v48 }
  0x21   :  { %v183_v50 = vmul.f32 %v476_v36, %v182_v49 }
  0x23   :  { %v184_v51 = vadd.f32 %v476_v36, %v183_v50 }
  0x61   :  { %v458_v52 = vpop.permute.xlu2 %457 }
  0x62   :  { %v460_v62 = vunpack.i.h.bf16 %v458_v52  ;;  %v459_v63 = vunpack.i.l.bf16 %v458_v52  ;;  %v186_v52 = vsel %vm185_vm4, %v476_v36, %v184_v51 }
  0x69   :  { %v463_v16 = vpop.permute.xlu2 %462 }
  0x6a   :  { %v464_v29 = vunpack.i.l.bf16 %v463_v16  ;;  %v465_v38 = vunpack.i.h.bf16 %v463_v16 }
  0x78   :  { %v438_v60 = vpop.permute.xlu0 %437  ;;  %v448_v61 = vpop.permute.xlu1 %447 }
  0x79   :  { %v440_v0 = vunpack.i.h.bf16 %v438_v60  ;;  %v439_v1 = vunpack.i.l.bf16 %v438_v60  ;;  %v450_v2 = vunpack.i.h.bf16 %v448_v61  ;;  %v449_v3 = vunpack.i.l.bf16 %v448_v61 }
  0x7b   :  { %v149_v7 = vsel %vm148_vm0, %v390_v57, %v439_v1  ;;  %v150_v8 = vsel %vm148_vm0, %v391_v58, %v440_v0 }
  0x7c   :  { %v155_v10 = vsel %vm153_vm1, %v150_v8, %v450_v2  ;;  %v154_v11 = vsel %vm153_vm1, %v149_v7, %v449_v3 }
  0x7d   :  { %v160_v12 = vsel %vm158_vm2, %v155_v10, %v460_v62  ;;  %v159_v13 = vsel %vm158_vm2, %v154_v11, %v459_v63  ;;  %v378_v10 = vld [vmem:[%s644_s3 + $0x10] sm:$0xff]  ;;  %v377_v11 = vld [vmem:[%s644_s3 + $0x8] sm:$0xff] }
  0x7e   :  { %v164_v14 = vmul.f32 %v160_v12, %v62_v4  ;;  %v163_v15 = vmul.f32 %v159_v13, %v61_v5  ;;  %312 = vmatpush.bf16.msra.mxu0 %v378_v10  ;;  %429 = vmatpush.bf16.msra.mxu1 %v378_v10  ;;  %v376_v12 = vld [vmem:[%s644_s3] sm:$0xff] }
  0x80   :  { %v443_v21 = vpop.permute.xlu0 %442  ;;  %v453_v22 = vpop.permute.xlu1 %452  ;;  %v171_v23 = vsel %vm167_vm3, %v164_v14, 0.0  ;;  %v168_v24 = vsel %vm167_vm3, %v163_v15, 0.0 }
  0x81   :  { %v445_v26 = vunpack.i.h.bf16 %v443_v21  ;;  %v444_v27 = vunpack.i.l.bf16 %v443_v21  ;;  %v454_v28 = vunpack.i.l.bf16 %v453_v22  ;;  %172 = vadd.xlane.f32.xlu1 %v171_v23  ;;  %169 = vadd.xlane.f32.xlu0 %v168_v24  ;;  %v455_v30 = vunpack.i.h.bf16 %v453_v22 }
  0x82   :  { %313 = vmatpush.bf16.msra.mxu0 %v377_v11  ;;  %430 = vmatpush.bf16.msra.mxu1 %v377_v11 }
  0x83   :  { %v151_v32 = vsel %vm148_vm0, %v394_v19, %v444_v27  ;;  %v152_v33 = vsel %vm148_vm0, %v395_v20, %v445_v26 }
  0x84   :  { %v156_v34 = vsel %vm153_vm1, %v151_v32, %v454_v28  ;;  %v157_v41 = vsel %vm153_vm1, %v152_v33, %v455_v30 }
  0x85   :  { %v161_v39 = vsel %vm158_vm2, %v156_v34, %v464_v29  ;;  %v162_v44 = vsel %vm158_vm2, %v157_v41, %v465_v38 }
  0x86   :  { %v165_v40 = vmul.f32 %v161_v39, %v63_v31  ;;  %v166_v45 = vmul.f32 %v162_v44, %v64_v43  ;;  %314 = vmatpush.bf16.msra.mxu0 %v376_v12  ;;  %431 = vmatpush.bf16.msra.mxu1 %v376_v12 }
  0x88   :  { %v174_v42 = vsel %vm167_vm3, %v165_v40, 0.0  ;;  %v177_v46 = vsel %vm167_vm3, %v166_v45, 0.0 }
  0x89   :  { %175 = vadd.xlane.f32.xlu2 %v174_v42 }
  0x91   :  { %178 = vadd.xlane.f32.xlu2 %v177_v46 }
  0xf4   :  { %v173_v53 = vpop.xlane.xlu1 %172  ;;  %v170_v54 = vpop.xlane.xlu0 %169 }
  0xf5   :  { %v188_v55 = vmul.f32 %v186_v52, %v173_v53  ;;  %v187_v56 = vmul.f32 %v186_v52, %v170_v54 }
  0xf7   :  { %v572_v57 = vsub.f32 %v164_v14, %v188_v55  ;;  %v574_v58 = vsub.f32 %v163_v15, %v187_v56 }
  0xf9   :  { %v196_v59 = vmul.f32 %v572_v57, %v572_v57  ;;  %v195_v60 = vmul.f32 %v574_v58, %v574_v58 }
  0xfb   :  { %v202_v61 = vsel %vm167_vm3, %v196_v59, 0.0  ;;  %v199_v62 = vsel %vm167_vm3, %v195_v60, 0.0  ;;  %v265_v59 = vld [vmem:[%s645_s0] sm:$0xff] }
  0xfc   :  { %v176_v63 = vpop.xlane.xlu2 %175  ;;  %203 = vadd.xlane.f32.xlu1 %v202_v61  ;;  %200 = vadd.xlane.f32.xlu0 %v199_v62  ;;  %v466_v60 = vld [vmem:[%s643_s4] ss:$0 sm:$0xff] }
  0xfd   :  { %v189_v0 = vmul.f32 %v186_v52, %v176_v63 }
  0xff   :  { %v582_v1 = vsub.f32 %v165_v40, %v189_v0  ;;  %v266_v0 = vld [vmem:[%s645_s0 + $0x8] sm:$0xff] }
 0x101   :  { %v197_v2 = vmul.f32 %v582_v1, %v582_v1 }
 0x103   :  { %v205_v3 = vsel %vm167_vm3, %v197_v2, 0.0 }
 0x104   :  { %206 = vadd.xlane.f32.xlu2 %v205_v3  ;;  %v179_v4 = vpop.xlane.xlu2 %178 }
 0x105   :  { %v190_v5 = vmul.f32 %v186_v52, %v179_v4  ;;  %v267_v4 = vld [vmem:[%s645_s0 + $0x10] sm:$0xff] }
 0x107   :  { %v587_v6 = vsub.f32 %v166_v45, %v190_v5 }
 0x109   :  { %v198_v7 = vmul.f32 %v587_v6, %v587_v6 }
 0x10b   :  { %v208_v8 = vsel %vm167_vm3, %v198_v7, 0.0 }
 0x10c   :  { %209 = vadd.xlane.f32.xlu0 %v208_v8  ;;  %v268_v8 = vld [vmem:[%s645_s0 + $0x18] sm:$0xff] }
 0x16f   :  { %v204_v13 = vpop.xlane.xlu1 %203  ;;  %v201_v14 = vpop.xlane.xlu0 %200 }
 0x170   :  { %v212_v15 = vmul.f32 %v204_v13, %v186_v52  ;;  %v211_v16 = vmul.f32 %v201_v14, %v186_v52 }
 0x172   :  { %v216_v17 = vadd.f32 1e-05, %v212_v15  ;;  %v215_v18 = vadd.f32 1e-05, %v211_v16 }
 0x174   :  { %477 = vrsqrt.f32 %v216_v17  ;;  %vm235_vm7 = vweird.f32 %v216_v17  ;;  %vm225_vm9 = vweird.f32 %v215_v18 }
 0x175   :  { %479 = vrsqrt.f32 %v215_v18 }
 0x177   :  { %v207_v19 = vpop.xlane.xlu2 %206 }
 0x178   :  { %v213_v20 = vmul.f32 %v207_v19, %v186_v52 }
 0x17a   :  { %v478_v21 = vpop.eup %477  ;;  %v217_v22 = vadd.f32 1e-05, %v213_v20 }
 0x17b   :  { %v480_v23 = vpop.eup %479  ;;  %v230_v24 = vmul.f32 %v478_v21, %v216_v17  ;;  %vm236_vm5 = vweird.f32 %v478_v21 }
 0x17c   :  { %v220_v25 = vmul.f32 %v480_v23, %v215_v18  ;;  %481 = vrsqrt.f32 %v217_v22  ;;  %vm226_vm6 = vweird.f32 %v480_v23  ;;  %vm237_vm8 = vmor %vm235_vm7, %vm236_vm5  ;;  %vm245_vm12 = vweird.f32 %v217_v22 }
 0x17d   :  { %v231_v26 = vmul.f32 %v478_v21, %v230_v24  ;;  %vm227_vm10 = vmor %vm225_vm9, %vm226_vm6 }
 0x17e   :  { %v221_v27 = vmul.f32 %v480_v23, %v220_v25 }
 0x17f   :  { %v232_v28 = vmul.f32 0.5, %v231_v26  ;;  %v210_v29 = vpop.xlane.xlu0 %209 }
 0x180   :  { %v222_v30 = vmul.f32 0.5, %v221_v27  ;;  %v214_v31 = vmul.f32 %v210_v29, %v186_v52 }
 0x181   :  { %v233_v32 = vsub.f32 1.5, %v232_v28 }
 0x182   :  { %v482_v33 = vpop.eup %481  ;;  %v223_v34 = vsub.f32 1.5, %v222_v30  ;;  %v218_v35 = vadd.f32 1e-05, %v214_v31 }
 0x183   :  { %v234_v37 = vmul.f32 %v478_v21, %v233_v32  ;;  %v240_v38 = vmul.f32 %v482_v33, %v217_v22  ;;  %vm246_vm11 = vweird.f32 %v482_v33 }
 0x184   :  { %v224_v39 = vmul.f32 %v480_v23, %v223_v34  ;;  %483 = vrsqrt.f32 %v218_v35  ;;  %vm247_vm14 = vmor %vm245_vm12, %vm246_vm11  ;;  %vm255_vm15 = vweird.f32 %v218_v35 }
 0x185   :  { %v241_v40 = vmul.f32 %v482_v33, %v240_v38  ;;  %v238_v41 = vsel %vm237_vm8, %v478_v21, %v234_v37 }
 0x186   :  { %v228_v42 = vsel %vm227_vm10, %v480_v23, %v224_v39  ;;  %v260_v43 = vmul.f32 %v238_v41, %v572_v57 }
 0x187   :  { %v242_v44 = vmul.f32 0.5, %v241_v40  ;;  %v259_v45 = vmul.f32 %v228_v42, %v574_v58 }
 0x189   :  { %v263_v46 = vpack.c.bf16 %v260_v43, %v259_v45  ;;  %v243_v36 = vsub.f32 1.5, %v242_v44 }
 0x18a   :  { %v484_v47 = vpop.eup %483 }
 0x18b   :  { %v250_v48 = vmul.f32 %v484_v47, %v218_v35  ;;  %374 = vmatmul.msk.bf16.vlgmr.msra.gmra.mxu0 %vm167_vm3, %v263_v46  ;;  %v244_v50 = vmul.f32 %v482_v33, %v243_v36  ;;  %vm256_vm13 = vweird.f32 %v484_v47 }
 0x18c   :  { %vm257_vm0 = vmor %vm255_vm15, %vm256_vm13 }
 0x18d   :  { %v251_v49 = vmul.f32 %v484_v47, %v250_v48  ;;  %v248_v54 = vsel %vm247_vm14, %v482_v33, %v244_v50 }
 0x18e   :  { %v261_v56 = vmul.f32 %v248_v54, %v582_v1 }
 0x18f   :  { %v252_v51 = vmul.f32 0.5, %v251_v49 }
 0x191   :  { %v253_v52 = vsub.f32 1.5, %v252_v51 }
 0x193   :  { %v254_v53 = vmul.f32 %v484_v47, %v253_v52 }
 0x195   :  { %v258_v55 = vsel %vm257_vm0, %v484_v47, %v254_v53 }
 0x196   :  { %v262_v57 = vmul.f32 %v258_v55, %v587_v6 }
 0x198   :  { %v264_v58 = vpack.c.bf16 %v262_v57, %v261_v56 }
 0x19a   :  { %375 = vmatmul.msk.bf16.vlgmr.msra.gmra.mxu1 %vm167_vm3, %v264_v58 }
 0x208   :  { %v316_v61 = vpop.f32.mrf.mxu0 }
 0x209   :  { %v326_v62 = vadd.f32 %v316_v61, %v265_v59 }
 0x20b   :  { %v334_v63 = vadd.f32 %v466_v60, %v326_v62 }
 0x20d   :  { %338 = vst.msk [vmem:[%s646_s5] sm:$0xff] %vm167_vm3, %v334_v63 }
 0x210   :  { %v318_v1 = vpop.f32.mrf.mxu0 }
 0x211   :  { %v327_v2 = vadd.f32 %v318_v1, %v266_v0 }
 0x213   :  { %v335_v3 = vadd.f32 %v466_v60, %v327_v2 }
 0x215   :  { %339 = vst.msk [vmem:[%s646_s5 + $0x8] sm:$0xff] %vm167_vm3, %v335_v3 }
 0x217   :  { %v321_v5 = vpop.f32.mrf.mxu1 }
 0x218   :  { %v328_v6 = vadd.f32 %v321_v5, %v267_v4 }
 0x21a   :  { %v336_v7 = vadd.f32 %v466_v60, %v328_v6 }
 0x21c   :  { %340 = vst.msk [vmem:[%s646_s5 + $0x10] sm:$0xff] %vm167_vm3, %v336_v7 }
 0x21f   :  { %v323_v9 = vpop.f32.mrf.mxu1 }
 0x220   :  { %v329_v10 = vadd.f32 %v323_v9, %v268_v8 }
 0x222   :  { %v337_v11 = vadd.f32 %v466_v60, %v329_v10 }
 0x224   :  { %341 = vst.msk [vmem:[%s646_s5 + $0x18] sm:$0xff] %vm167_vm3, %v337_v11 }

// kernel: encoder_forward.16
= control target key start
LH: loop header
LB: loop body
LE: loop exit
PB: predicated region body
PF: predicated region fallthrough
CT: control target
= control target key end

     0   :  { %vm19_vm0 = vcmask 523264   ;;  %v622_v8 = vmov 64.0   ;;  %vm305_vm14 = vcmask 261120   ;;  %vm318_vm15 = vcmask 785408   ;;  %s885_s0 = inlined_call_operand.vmem [shape: f32[32,64], index: 0, kind: input, shape index: {}]   ;;  %s886_s1 = inlined_call_operand.vmem [shape: bf16[64,192], index: 1, kind: input, shape index: {}]   ;;  %s887_s2 = inlined_call_operand.vmem [shape: bf16[96,64], index: 2, kind: input, shape index: {}]   ;;  %s888_s3 = inlined_call_operand.vmem [shape: f32[32,64], index: 3, kind: output, shape index: {}]  }
   0x1   :  { %v648_v0 = vld [vmem:[%s885_s0 + $0x10] sm:$0xff]  ;;  %v653_v1 = vld [vmem:[%s885_s0] sm:$0xff]  ;;  %v662_v4 = vld [vmem:[%s885_s0 + $0x18] sm:$0xff]  ;;  %586 = vrcp.f32 %v622_v8 }
   0x2   :  { %v26_v2 = vsel %vm19_vm0, %v648_v0, 0.0  ;;  %v20_v3 = vsel %vm19_vm0, %v653_v1, 0.0  ;;  %v667_v5 = vld [vmem:[%s885_s0 + $0x8] sm:$0xff]  ;;  %v29_v6 = vsel %vm19_vm0, %v662_v4, 0.0  ;;  %v527_v35 = vld [vmem:[%s886_s1 + $0x30] sm:$0xf] }
   0x3   :  { %27 = vadd.xlane.f32.xlu1 %v26_v2  ;;  %21 = vadd.xlane.f32.xlu0 %v20_v3  ;;  %v23_v7 = vsel %vm19_vm0, %v667_v5, 0.0  ;;  %v570_v36 = vld [vmem:[%s886_s1 + $0x34] sm:$0xf0]  ;;  %v569_v37 = vld [vmem:[%s886_s1 + $0x34] sm:$0xf] }
   0x4   :  { %v528_v38 = vor.u32 %v570_v36, %v527_v35  ;;  %v529_v39 = vld [vmem:[%s886_s1 + $0x38] sm:$0xf0]  ;;  %v519_v41 = vld [vmem:[%s886_s1 + $0x20] sm:$0xf]  ;;  %v568_v42 = vld [vmem:[%s886_s1 + $0x24] sm:$0xf0] }
   0x5   :  { %v532_v40 = vor.u32 %v569_v37, %v529_v39  ;;  %v567_v43 = vld [vmem:[%s886_s1 + $0x24] sm:$0xf]  ;;  %v520_v44 = vor.u32 %v568_v42, %v519_v41  ;;  %v521_v45 = vld [vmem:[%s886_s1 + $0x28] sm:$0xf0]  ;;  %v511_v47 = vld [vmem:[%s886_s1 + $0x10] sm:$0xf] }
   0x6   :  { %175 = vmatpush.bf16.msra.mxu0 %v528_v38  ;;  %v524_v46 = vor.u32 %v567_v43, %v521_v45  ;;  %v566_v48 = vld [vmem:[%s886_s1 + $0x14] sm:$0xf0]  ;;  %v565_v49 = vld [vmem:[%s886_s1 + $0x14] sm:$0xf]  ;;  %v513_v51 = vld [vmem:[%s886_s1 + $0x18] sm:$0xf0] }
   0x7   :  { %v587_v9 = vpop.eup %586  ;;  %194 = vmatpush.bf16.msra.mxu1 %v532_v40  ;;  %v512_v50 = vor.u32 %v566_v48, %v511_v47  ;;  %v516_v52 = vor.u32 %v565_v49, %v513_v51  ;;  %v503_v53 = vld [vmem:[%s886_s1] sm:$0xf]  ;;  %v564_v54 = vld [vmem:[%s886_s1 + $0x4] sm:$0xf0]  ;;  %v563_v55 = vld [vmem:[%s886_s1 + $0x4] sm:$0xf] }
   0x8   :  { %v33_v10 = vmul.f32 64.0, %v587_v9  ;;  %vm37_vm1 = vweird.f32 %v587_v9  ;;  %v504_v56 = vor.u32 %v564_v54, %v503_v53  ;;  %v505_v57 = vld [vmem:[%s886_s1 + $0x8] sm:$0xf0]  ;;  %s623_s1 = smov 32  }
   0x9   :  { %v508_v58 = vor.u32 %v563_v55, %v505_v57 }
   0xa   :  { %v34_v11 = vsub.f32 1.0, %v33_v10  ;;  %176 = vmatpush.bf16.msra.mxu0 %v520_v44 }
   0xb   :  { %30 = vadd.xlane.f32.xlu1 %v29_v6  ;;  %24 = vadd.xlane.f32.xlu0 %v23_v7 }
   0xc   :  { %v35_v12 = vmul.f32 %v587_v9, %v34_v11  ;;  %195 = vmatpush.bf16.msra.mxu1 %v524_v46 }
   0xe   :  { %v36_v13 = vadd.f32 %v587_v9, %v35_v12  ;;  %177 = vmatpush.bf16.msra.mxu0 %v512_v50 }
  0x10   :  { %v673_v14 = vsel %vm37_vm1, %v587_v9, %v36_v13  ;;  %196 = vmatpush.bf16.msra.mxu1 %v516_v52 }
  0x12   :  { %178 = vmatpush.bf16.msra.mxu0 %v504_v56 }
  0x14   :  { %197 = vmatpush.bf16.msra.mxu1 %v508_v58 }
  0x76   :  { %v28_v15 = vpop.xlane.xlu1 %27  ;;  %v22_v16 = vpop.xlane.xlu0 %21 }
  0x77   :  { %v41_v17 = vmul.f32 %v673_v14, %v28_v15  ;;  %v39_v18 = vmul.f32 %v673_v14, %v22_v16 }
  0x79   :  { %v678_v19 = vsub.f32 %v648_v0, %v41_v17  ;;  %v681_v20 = vsub.f32 %v653_v1, %v39_v18 }
  0x7b   :  { %v49_v21 = vmul.f32 %v678_v19, %v678_v19  ;;  %v47_v22 = vmul.f32 %v681_v20, %v681_v20 }
  0x7d   :  { %v57_v23 = vsel %vm19_vm0, %v49_v21, 0.0  ;;  %v51_v24 = vsel %vm19_vm0, %v47_v22, 0.0 }
  0x7e   :  { %v31_v25 = vpop.xlane.xlu1 %30  ;;  %58 = vadd.xlane.f32.xlu0 %v57_v23  ;;  %52 = vadd.xlane.f32.xlu2 %v51_v24  ;;  %v25_v26 = vpop.xlane.xlu0 %24 }
  0x7f   :  { %v42_v27 = vmul.f32 %v673_v14, %v31_v25  ;;  %v40_v28 = vmul.f32 %v673_v14, %v25_v26 }
  0x81   :  { %v692_v29 = vsub.f32 %v662_v4, %v42_v27  ;;  %v695_v30 = vsub.f32 %v667_v5, %v40_v28 }
  0x83   :  { %v50_v31 = vmul.f32 %v692_v29, %v692_v29  ;;  %v48_v32 = vmul.f32 %v695_v30, %v695_v30 }
  0x85   :  { %v60_v33 = vsel %vm19_vm0, %v50_v31, 0.0  ;;  %v54_v34 = vsel %vm19_vm0, %v48_v32, 0.0 }
  0x86   :  { %61 = vadd.xlane.f32.xlu1 %v60_v33  ;;  %55 = vadd.xlane.f32.xlu2 %v54_v34 }
  0xf1   :  { %v53_v59 = vpop.xlane.xlu2 %52  ;;  %v59_v62 = vpop.xlane.xlu0 %58 }
  0xf2   :  { %v63_v60 = vmul.f32 %v53_v59, %v673_v14  ;;  %v65_v63 = vmul.f32 %v59_v62, %v673_v14 }
  0xf4   :  { %v67_v61 = vadd.f32 1e-05, %v63_v60  ;;  %v69_v12 = vadd.f32 1e-05, %v65_v63 }
  0xf6   :  { %588 = vrsqrt.f32 %v67_v61  ;;  %vm77_vm3 = vweird.f32 %v67_v61  ;;  %vm97_vm10 = vweird.f32 %v69_v12 }
  0xf9   :  { %v62_v2 = vpop.xlane.xlu1 %61  ;;  %v56_v3 = vpop.xlane.xlu2 %55 }
  0xfa   :  { %v66_v6 = vmul.f32 %v62_v2, %v673_v14  ;;  %v64_v7 = vmul.f32 %v56_v3, %v673_v14 }
  0xfc   :  { %v589_v8 = vpop.eup %588  ;;  %v70_v9 = vadd.f32 1e-05, %v66_v6  ;;  %v68_v10 = vadd.f32 1e-05, %v64_v7 }
  0xfd   :  { %v72_v11 = vmul.f32 %v589_v8, %v67_v61  ;;  %vm78_vm2 = vweird.f32 %v589_v8 }
  0xfe   :  { %590 = vrsqrt.f32 %v70_v9  ;;  %vm79_vm5 = vmor %vm77_vm3, %vm78_vm2  ;;  %vm87_vm6 = vweird.f32 %v68_v10  ;;  %vm107_vm8 = vweird.f32 %v70_v9 }
  0xff   :  { %v73_v13 = vmul.f32 %v589_v8, %v72_v11  ;;  %592 = vrsqrt.f32 %v68_v10 }
 0x100   :  { %594 = vrsqrt.f32 %v69_v12 }
 0x101   :  { %v74_v15 = vmul.f32 0.5, %v73_v13 }
 0x103   :  { %v75_v18 = vsub.f32 1.5, %v74_v15 }
 0x104   :  { %v591_v16 = vpop.eup %590 }
 0x105   :  { %v593_v17 = vpop.eup %592  ;;  %v102_v23 = vmul.f32 %v591_v16, %v70_v9  ;;  %v76_v25 = vmul.f32 %v589_v8, %v75_v18  ;;  %vm108_vm9 = vweird.f32 %v591_v16 }
 0x106   :  { %v82_v21 = vmul.f32 %v593_v17, %v68_v10  ;;  %v595_v22 = vpop.eup %594  ;;  %vm88_vm4 = vweird.f32 %v593_v17  ;;  %vm109_vm12 = vmor %vm107_vm8, %vm108_vm9 }
 0x107   :  { %v92_v14 = vmul.f32 %v595_v22, %v69_v12  ;;  %v103_v27 = vmul.f32 %v591_v16, %v102_v23  ;;  %v80_v33 = vsel %vm79_vm5, %v589_v8, %v76_v25  ;;  %vm89_vm7 = vmor %vm87_vm6, %vm88_vm4  ;;  %vm98_vm11 = vweird.f32 %v595_v22 }
 0x108   :  { %v83_v24 = vmul.f32 %v593_v17, %v82_v21  ;;  %v111_v36 = vmul.f32 %v80_v33, %v681_v20  ;;  %vm99_vm13 = vmor %vm97_vm10, %vm98_vm11 }
 0x109   :  { %v93_v31 = vmul.f32 %v595_v22, %v92_v14  ;;  %v104_v34 = vmul.f32 0.5, %v103_v27 }
 0x10a   :  { %v84_v26 = vmul.f32 0.5, %v83_v24 }
 0x10b   :  { %v94_v38 = vmul.f32 0.5, %v93_v31  ;;  %v105_v40 = vsub.f32 1.5, %v104_v34 }
 0x10c   :  { %v85_v28 = vsub.f32 1.5, %v84_v26 }
 0x10d   :  { %v95_v41 = vsub.f32 1.5, %v94_v38  ;;  %v106_v42 = vmul.f32 %v591_v16, %v105_v40 }
 0x10e   :  { %v86_v32 = vmul.f32 %v593_v17, %v85_v28 }
 0x10f   :  { %v96_v43 = vmul.f32 %v595_v22, %v95_v41  ;;  %v110_v44 = vsel %vm109_vm12, %v591_v16, %v106_v42 }
 0x110   :  { %v90_v35 = vsel %vm89_vm7, %v593_v17, %v86_v32 }
 0x111   :  { %v112_v37 = vmul.f32 %v90_v35, %v695_v30  ;;  %v100_v20 = vsel %vm99_vm13, %v595_v22, %v96_v43  ;;  %v114_v30 = vmul.f32 %v110_v44, %v692_v29 }
 0x112   :  { %v113_v45 = vmul.f32 %v100_v20, %v678_v19 }
 0x113   :  { %v115_v39 = vpack.c.bf16 %v112_v37, %v111_v36 }
 0x114   :  { %v116_v46 = vpack.c.bf16 %v114_v30, %v113_v45 }
 0x115   :  { %533 = vmatmul.msk.bf16.vlgmr.msra.gmra.mxu0 %vm19_vm0, %v115_v39  ;;  %535 = vmatmul.msk.bf16.vlgmr.msra.gmra.mxu1 %vm19_vm0, %v115_v39 }
 0x125   :  { %534 = vmatmul.msk.bf16.gmra.mxu0 %vm19_vm0, %v116_v46  ;;  %536 = vmatmul.msk.bf16.gmra.mxu1 %vm19_vm0, %v116_v46 }
 0x192   :  { %v763_v47 = vpop.f32.mrf.mxu0  ;;  %v199_v48 = vpop.f32.mrf.mxu1 }
 0x193   :  { %v217_v49 = vmul.f32 0.044715, %v763_v47  ;;  %v218_v50 = vmul.f32 0.044715, %v199_v48  ;;  %v210_v15 = vmul.f32 0.5, %v199_v48  ;;  %v209_v17 = vmul.f32 0.5, %v763_v47 }
 0x195   :  { %v225_v51 = vmul.f32 %v217_v49, %v763_v47  ;;  %v226_v52 = vmul.f32 %v218_v50, %v199_v48 }
 0x197   :  { %v234_v53 = vmul.f32 %v226_v52, %v199_v48  ;;  %v233_v54 = vmul.f32 %v225_v51, %v763_v47 }
 0x199   :  { %v242_v29 = vadd.f32 %v234_v53, %v199_v48  ;;  %v241_v19 = vadd.f32 %v233_v54, %v763_v47 }
 0x19a   :  { %v769_v55 = vpop.f32.mrf.mxu0  ;;  %v201_v56 = vpop.f32.mrf.mxu1 }
 0x19b   :  { %v219_v57 = vmul.f32 0.044715, %v769_v55  ;;  %v220_v58 = vmul.f32 0.044715, %v201_v56  ;;  %v250_v59 = vmul.f32 0.7978846, %v242_v29 }
 0x19c   :  { %v249_v60 = vmul.f32 0.7978846, %v241_v19  ;;  %v212_v37 = vmul.f32 0.5, %v201_v56  ;;  %v211_v43 = vmul.f32 0.5, %v769_v55 }
 0x19d   :  { %v227_v61 = vmul.f32 %v219_v57, %v769_v55  ;;  %v228_v62 = vmul.f32 %v220_v58, %v201_v56  ;;  %596 = vtanh.f32 %v250_v59 }
 0x19e   :  { %598 = vtanh.f32 %v249_v60 }
 0x19f   :  { %v236_v63 = vmul.f32 %v228_v62, %v201_v56  ;;  %v235_v2 = vmul.f32 %v227_v61, %v769_v55 }
 0x1a1   :  { %v244_v3 = vadd.f32 %v236_v63, %v201_v56  ;;  %v243_v6 = vadd.f32 %v235_v2, %v769_v55 }
 0x1a2   :  { %v775_v7 = vpop.f32.mrf.mxu0  ;;  %v204_v8 = vpop.f32.mrf.mxu1 }
 0x1a3   :  { %v597_v9 = vpop.eup %596  ;;  %v221_v10 = vmul.f32 0.044715, %v775_v7  ;;  %v222_v11 = vmul.f32 0.044715, %v204_v8  ;;  %v252_v12 = vmul.f32 0.7978846, %v244_v3 }
 0x1a4   :  { %v599_v13 = vpop.eup %598  ;;  %v266_v16 = vadd.f32 1.0, %v597_v9  ;;  %v251_v18 = vmul.f32 0.7978846, %v243_v6  ;;  %v214_v54 = vmul.f32 0.5, %v204_v8  ;;  %v213_v19 = vmul.f32 0.5, %v775_v7 }
 0x1a5   :  { %v229_v21 = vmul.f32 %v221_v10, %v775_v7  ;;  %v230_v22 = vmul.f32 %v222_v11, %v204_v8  ;;  %v265_v23 = vadd.f32 1.0, %v599_v13  ;;  %600 = vtanh.f32 %v252_v12 }
 0x1a6   :  { %v274_v24 = vmul.f32 %v266_v16, %v210_v15  ;;  %602 = vtanh.f32 %v251_v18 }
 0x1a7   :  { %v238_v25 = vmul.f32 %v230_v22, %v204_v8  ;;  %v273_v14 = vmul.f32 %v265_v23, %v209_v17  ;;  %v237_v26 = vmul.f32 %v229_v21, %v775_v7 }
 0x1a8   :  { %291 = vrot.lane.b32.xlu0 %v274_v24, %s623_s1 }
 0x1a9   :  { %v246_v27 = vadd.f32 %v238_v25, %v204_v8  ;;  %289 = vrot.lane.b32.xlu2 %v273_v14, %s623_s1  ;;  %v245_v28 = vadd.f32 %v237_v26, %v775_v7 }
 0x1aa   :  { %v784_v31 = vpop.f32.mrf.mxu0  ;;  %v206_v32 = vpop.f32.mrf.mxu1 }
 0x1ab   :  { %v601_v33 = vpop.eup %600  ;;  %v223_v34 = vmul.f32 0.044715, %v784_v31  ;;  %v224_v35 = vmul.f32 0.044715, %v206_v32  ;;  %v254_v39 = vmul.f32 0.7978846, %v246_v27 }
 0x1ac   :  { %v603_v36 = vpop.eup %602  ;;  %v268_v38 = vadd.f32 1.0, %v601_v33  ;;  %v253_v40 = vmul.f32 0.7978846, %v245_v28  ;;  %v216_v61 = vmul.f32 0.5, %v206_v32  ;;  %v215_v63 = vmul.f32 0.5, %v784_v31 }
 0x1ad   :  { %v231_v41 = vmul.f32 %v223_v34, %v784_v31  ;;  %v232_v42 = vmul.f32 %v224_v35, %v206_v32  ;;  %v267_v44 = vadd.f32 1.0, %v603_v36  ;;  %604 = vtanh.f32 %v254_v39 }
 0x1ae   :  { %v276_v20 = vmul.f32 %v268_v38, %v212_v37  ;;  %606 = vtanh.f32 %v253_v40  ;;  %v624_v28 = vmov 96.0  }
 0x1af   :  { %v239_v30 = vmul.f32 %v231_v41, %v784_v31  ;;  %v240_v45 = vmul.f32 %v232_v42, %v206_v32  ;;  %v275_v46 = vmul.f32 %v267_v44, %v211_v43 }
 0x1b1   :  { %v247_v48 = vadd.f32 %v239_v30, %v784_v31  ;;  %v248_v49 = vadd.f32 %v240_v45, %v206_v32  ;;  %295 = vrot.lane.b32.xlu2 %v276_v20, %s623_s1  ;;  %293 = vrot.lane.b32.xlu1 %v275_v46, %s623_s1 }
 0x1b3   :  { %v256_v50 = vmul.f32 0.7978846, %v248_v49  ;;  %v255_v51 = vmul.f32 0.7978846, %v247_v48  ;;  %v605_v52 = vpop.eup %604 }
 0x1b4   :  { %v607_v53 = vpop.eup %606  ;;  %v270_v29 = vadd.f32 1.0, %v605_v52 }
 0x1b5   :  { %608 = vtanh.f32 %v256_v50  ;;  %v269_v56 = vadd.f32 1.0, %v607_v53 }
 0x1b6   :  { %610 = vtanh.f32 %v255_v51  ;;  %v278_v57 = vmul.f32 %v270_v29, %v214_v54  ;;  %v576_v29 = vld [vmem:[%s887_s2 + $0x28] sm:$0xff] }
 0x1b7   :  { %v277_v58 = vmul.f32 %v269_v56, %v213_v19  ;;  %612 = vrcp.f32 %v624_v28  ;;  %472 = vmatpush.bf16.msra.mxu2 %v576_v29  ;;  %577 = vmatpush.bf16.msra.mxu3 %v576_v29  ;;  %v575_v19 = vld [vmem:[%s887_s2 + $0x20] sm:$0xff]  ;;  %v574_v56 = vld [vmem:[%s887_s2 + $0x18] sm:$0xff] }
 0x1b9   :  { %299 = vrot.lane.b32.xlu2 %v278_v57, %s623_s1  ;;  %297 = vrot.lane.b32.xlu0 %v277_v58, %s623_s1  ;;  %v573_v57 = vld [vmem:[%s887_s2 + $0x10] sm:$0xff]  ;;  %v572_v58 = vld [vmem:[%s887_s2 + $0x8] sm:$0xff] }
 0x1bb   :  { %v609_v59 = vpop.eup %608  ;;  %473 = vmatpush.bf16.msra.mxu2 %v575_v19  ;;  %578 = vmatpush.bf16.msra.mxu3 %v575_v19 }
 0x1bc   :  { %v611_v60 = vpop.eup %610  ;;  %v272_v62 = vadd.f32 1.0, %v609_v59 }
 0x1bd   :  { %v271_v2 = vadd.f32 1.0, %v611_v60  ;;  %v613_v32 = vpop.eup %612  ;;  %v571_v60 = vld [vmem:[%s887_s2] sm:$0xff] }
 0x1be   :  { %v280_v3 = vmul.f32 %v272_v62, %v216_v61  ;;  %v332_v33 = vmul.f32 96.0, %v613_v32  ;;  %vm336_vm1 = vweird.f32 %v613_v32 }
 0x1bf   :  { %v279_v6 = vmul.f32 %v271_v2, %v215_v63  ;;  %474 = vmatpush.bf16.msra.mxu2 %v574_v56  ;;  %579 = vmatpush.bf16.msra.mxu3 %v574_v56 }
 0x1c0   :  { %v333_v34 = vsub.f32 1.0, %v332_v33 }
 0x1c1   :  { %301 = vrot.lane.b32.xlu1 %v279_v6, %s623_s1  ;;  %303 = vrot.lane.b32.xlu0 %v280_v3, %s623_s1 }
 0x1c2   :  { %v334_v35 = vmul.f32 %v613_v32, %v333_v34 }
 0x1c3   :  { %475 = vmatpush.bf16.msra.mxu2 %v573_v57  ;;  %580 = vmatpush.bf16.msra.mxu3 %v573_v57 }
 0x1c4   :  { %v335_v36 = vadd.f32 %v613_v32, %v334_v35 }
 0x1c7   :  { %476 = vmatpush.bf16.msra.mxu2 %v572_v58  ;;  %581 = vmatpush.bf16.msra.mxu3 %v572_v58 }
 0x1cb   :  { %477 = vmatpush.bf16.msra.mxu2 %v571_v60  ;;  %582 = vmatpush.bf16.msra.mxu3 %v571_v60 }
 0x203   :  { %v290_v8 = vpop.permute.xlu2 %289 }
 0x20b   :  { %v296_v13 = vpop.permute.xlu2 %295 }
 0x213   :  { %v300_v21 = vpop.permute.xlu2 %299 }
 0x21a   :  { %v292_v9 = vpop.permute.xlu0 %291 }
 0x21b   :  { %v306_v10 = vsel %vm305_vm14, %v290_v8, %v292_v9 }
 0x21c   :  { %v314_v11 = vmul.f32 %v306_v10, %v763_v47 }
 0x21e   :  { %v319_v12 = vsel %vm318_vm15, %v314_v11, 0.0 }
 0x21f   :  { %320 = vadd.xlane.f32.xlu2 %v319_v12 }
 0x223   :  { %v294_v15 = vpop.permute.xlu1 %293 }
 0x224   :  { %v307_v16 = vsel %vm305_vm14, %v294_v15, %v296_v13 }
 0x225   :  { %v315_v17 = vmul.f32 %v307_v16, %v769_v55 }
 0x227   :  { %v322_v18 = vsel %vm318_vm15, %v315_v17, 0.0 }
 0x228   :  { %323 = vadd.xlane.f32.xlu1 %v322_v18 }
 0x22b   :  { %v298_v22 = vpop.permute.xlu0 %297 }
 0x22c   :  { %v308_v23 = vsel %vm305_vm14, %v298_v22, %v300_v21 }
 0x22d   :  { %v316_v24 = vmul.f32 %v308_v23, %v775_v7  ;;  %v811_v7 = vsel %vm336_vm1, %v613_v32, %v335_v36 }
 0x22f   :  { %v325_v47 = vsel %vm318_vm15, %v316_v24, 0.0 }
 0x230   :  { %326 = vadd.xlane.f32.xlu0 %v325_v47 }
 0x233   :  { %v302_v25 = vpop.permute.xlu1 %301  ;;  %v304_v14 = vpop.permute.xlu0 %303 }
 0x234   :  { %v309_v26 = vsel %vm305_vm14, %v302_v25, %v304_v14 }
 0x235   :  { %v317_v27 = vmul.f32 %v309_v26, %v784_v31 }
 0x237   :  { %v328_v55 = vsel %vm318_vm15, %v317_v27, 0.0 }
 0x238   :  { %329 = vadd.xlane.f32.xlu2 %v328_v55 }
 0x292   :  { %v321_v37 = vpop.xlane.xlu2 %320 }
 0x293   :  { %v338_v38 = vmul.f32 %v811_v7, %v321_v37 }
 0x295   :  { %v814_v39 = vsub.f32 %v314_v11, %v338_v38 }
 0x297   :  { %v346_v31 = vmul.f32 %v814_v39, %v814_v39 }
 0x299   :  { %v350_v40 = vsel %vm318_vm15, %v346_v31, 0.0 }
 0x29a   :  { %351 = vadd.xlane.f32.xlu1 %v350_v40 }
 0x29b   :  { %v324_v41 = vpop.xlane.xlu1 %323 }
 0x29c   :  { %v339_v42 = vmul.f32 %v811_v7, %v324_v41 }
 0x29e   :  { %v820_v43 = vsub.f32 %v315_v17, %v339_v42 }
 0x2a0   :  { %v347_v44 = vmul.f32 %v820_v43, %v820_v43 }
 0x2a2   :  { %v353_v20 = vsel %vm318_vm15, %v347_v44, 0.0 }
 0x2a3   :  { %354 = vadd.xlane.f32.xlu0 %v353_v20  ;;  %v327_v30 = vpop.xlane.xlu0 %326 }
 0x2a4   :  { %v340_v45 = vmul.f32 %v811_v7, %v327_v30 }
 0x2a6   :  { %v826_v46 = vsub.f32 %v316_v24, %v340_v45 }
 0x2a8   :  { %v348_v48 = vmul.f32 %v826_v46, %v826_v46 }
 0x2aa   :  { %v356_v49 = vsel %vm318_vm15, %v348_v48, 0.0 }
 0x2ab   :  { %v330_v50 = vpop.xlane.xlu2 %329  ;;  %357 = vadd.xlane.f32.xlu2 %v356_v49 }
 0x2ac   :  { %v341_v51 = vmul.f32 %v811_v7, %v330_v50 }
 0x2ae   :  { %v832_v52 = vsub.f32 %v317_v27, %v341_v51 }
 0x2b0   :  { %v349_v53 = vmul.f32 %v832_v52, %v832_v52 }
 0x2b2   :  { %v359_v54 = vsel %vm318_vm15, %v349_v53, 0.0 }
 0x2b3   :  { %360 = vadd.xlane.f32.xlu1 %v359_v54 }
 0x30d   :  { %v352_v59 = vpop.xlane.xlu1 %351 }
 0x30e   :  { %v362_v61 = vmul.f32 %v352_v59, %v811_v7 }
 0x310   :  { %v366_v62 = vadd.f32 1e-05, %v362_v61 }
 0x312   :  { %614 = vrsqrt.f32 %v366_v62  ;;  %vm376_vm3 = vweird.f32 %v366_v62 }
 0x316   :  { %v355_v63 = vpop.xlane.xlu0 %354 }
 0x317   :  { %v363_v2 = vmul.f32 %v355_v63, %v811_v7 }
 0x318   :  { %v615_v3 = vpop.eup %614 }
 0x319   :  { %v371_v6 = vmul.f32 %v615_v3, %v366_v62  ;;  %v367_v8 = vadd.f32 1e-05, %v363_v2  ;;  %vm377_vm2 = vweird.f32 %v615_v3 }
 0x31a   :  { %vm378_vm5 = vmor %vm376_vm3, %vm377_vm2 }
 0x31b   :  { %v372_v9 = vmul.f32 %v615_v3, %v371_v6  ;;  %616 = vrsqrt.f32 %v367_v8  ;;  %vm386_vm6 = vweird.f32 %v367_v8 }
 0x31d   :  { %v373_v10 = vmul.f32 0.5, %v372_v9 }
 0x31e   :  { %v358_v11 = vpop.xlane.xlu2 %357 }
 0x31f   :  { %v364_v12 = vmul.f32 %v358_v11, %v811_v7  ;;  %v374_v15 = vsub.f32 1.5, %v373_v10 }
 0x321   :  { %v617_v13 = vpop.eup %616  ;;  %v368_v17 = vadd.f32 1e-05, %v364_v12  ;;  %v375_v21 = vmul.f32 %v615_v3, %v374_v15 }
 0x322   :  { %v381_v16 = vmul.f32 %v617_v13, %v367_v8  ;;  %vm387_vm4 = vweird.f32 %v617_v13 }
 0x323   :  { %618 = vrsqrt.f32 %v368_v17  ;;  %v379_v27 = vsel %vm378_vm5, %v615_v3, %v375_v21  ;;  %vm388_vm7 = vmor %vm386_vm6, %vm387_vm4  ;;  %vm396_vm9 = vweird.f32 %v368_v17 }
 0x324   :  { %v382_v18 = vmul.f32 %v617_v13, %v381_v16  ;;  %v410_v33 = vmul.f32 %v379_v27, %v814_v39 }
 0x326   :  { %v383_v22 = vmul.f32 0.5, %v382_v18  ;;  %v361_v23 = vpop.xlane.xlu1 %360 }
 0x327   :  { %v365_v47 = vmul.f32 %v361_v23, %v811_v7 }
 0x328   :  { %v384_v24 = vsub.f32 1.5, %v383_v22 }
 0x329   :  { %v619_v25 = vpop.eup %618  ;;  %v369_v26 = vadd.f32 1e-05, %v365_v47 }
 0x32a   :  { %v385_v14 = vmul.f32 %v617_v13, %v384_v24  ;;  %v391_v55 = vmul.f32 %v619_v25, %v368_v17  ;;  %vm397_vm8 = vweird.f32 %v619_v25 }
 0x32b   :  { %620 = vrsqrt.f32 %v369_v26  ;;  %vm398_vm11 = vmor %vm396_vm9, %vm397_vm8  ;;  %vm406_vm12 = vweird.f32 %v369_v26 }
 0x32c   :  { %v389_v28 = vsel %vm388_vm7, %v617_v13, %v385_v14  ;;  %v392_v32 = vmul.f32 %v619_v25, %v391_v55 }
 0x32d   :  { %v411_v34 = vmul.f32 %v389_v28, %v820_v43 }
 0x32e   :  { %v393_v35 = vmul.f32 0.5, %v392_v32 }
 0x32f   :  { %v414_v36 = vpack.c.bf16 %v411_v34, %v410_v33 }
 0x330   :  { %v394_v37 = vsub.f32 1.5, %v393_v35 }
 0x331   :  { %561 = vmatmul.msk.bf16.vlgmr.msra.gmra.mxu2 %vm318_vm15, %v414_v36  ;;  %v621_v7 = vpop.eup %620 }
 0x332   :  { %v401_v38 = vmul.f32 %v621_v7, %v369_v26  ;;  %v395_v40 = vmul.f32 %v619_v25, %v394_v37  ;;  %vm407_vm10 = vweird.f32 %v621_v7 }
 0x333   :  { %vm408_vm13 = vmor %vm406_vm12, %vm407_vm10 }
 0x334   :  { %v402_v31 = vmul.f32 %v621_v7, %v401_v38  ;;  %v399_v39 = vsel %vm398_vm11, %v619_v25, %v395_v40 }
 0x335   :  { %v412_v20 = vmul.f32 %v399_v39, %v826_v46 }
 0x336   :  { %v403_v41 = vmul.f32 0.5, %v402_v31 }
 0x338   :  { %v404_v42 = vsub.f32 1.5, %v403_v41 }
 0x33a   :  { %v405_v44 = vmul.f32 %v621_v7, %v404_v42 }
 0x33c   :  { %v409_v43 = vsel %vm408_vm13, %v621_v7, %v405_v44 }
 0x33d   :  { %v413_v30 = vmul.f32 %v409_v43, %v832_v52 }
 0x33f   :  { %v415_v45 = vpack.c.bf16 %v413_v30, %v412_v20 }
 0x341   :  { %562 = vmatmul.msk.bf16.vlgmr.msra.gmra.mxu3 %vm318_vm15, %v415_v45 }
 0x3b4   :  { %v479_v48 = vpop.f32.mrf.mxu2 }
 0x3b5   :  { %v489_v49 = vadd.f32 %v479_v48, %v653_v1 }
 0x3b7   :  { %493 = vst.msk [vmem:[%s888_s3] sm:$0xff] %vm19_vm0, %v489_v49 }
 0x3bc   :  { %v481_v50 = vpop.f32.mrf.mxu2 }
 0x3bd   :  { %v490_v51 = vadd.f32 %v481_v50, %v667_v5 }
 0x3bf   :  { %494 = vst.msk [vmem:[%s888_s3 + $0x8] sm:$0xff] %vm19_vm0, %v490_v51 }
 0x3c4   :  { %v484_v46 = vpop.f32.mrf.mxu3 }
 0x3c5   :  { %v491_v52 = vadd.f32 %v484_v46, %v648_v0 }
 0x3c7   :  { %495 = vst.msk [vmem:[%s888_s3 + $0x10] sm:$0xff] %vm19_vm0, %v491_v52 }
 0x3cc   :  { %v486_v1 = vpop.f32.mrf.mxu3 }
 0x3cd   :  { %v492_v53 = vadd.f32 %v486_v1, %v662_v4 }
 0x3cf   :  { %496 = vst.msk [vmem:[%s888_s3 + $0x18] sm:$0xff] %vm19_vm0, %v492_v53 }

// kernel: encoder_forward.17
= control target key start
LH: loop header
LB: loop body
LE: loop exit
PB: predicated region body
PF: predicated region fallthrough
CT: control target
= control target key end

     0   :  { %s87_s18 = smov [#allocation3]   ;;  %s164_s0 = inlined_call_operand.vmem [shape: f32[3], index: 0, kind: input, shape index: {}]   ;;  %s165_s1 = inlined_call_operand.vmem [shape: f32[32,64], index: 1, kind: input, shape index: {}]   ;;  %s166_s2 = inlined_call_operand.vmem [shape: f32[32,64], index: 2, kind: input, shape index: {}]   ;;  %s167_s3 = inlined_call_operand.vmem [shape: f32[32,64], index: 3, kind: input, shape index: {}]   ;;  %s168_s4 = inlined_call_operand.vmem [shape: f32[32,64], index: 4, kind: output, shape index: {}]  }
   0x1   :  { %s10_s17 = sshll.u32 %s164_s0, 4  ;;  %s11_s17 = int_to_ptr.vmem [resolvable:$true] %s10_s17 }
   0x2   :  { %13 = dma.vmem_to_smem %s11_s17, 16, %s87_s18, [#allocation2] }
   0x3   :  { %85 = dma.done.wait [#allocation2], 16 }
   0x4   :  { %86 = vsyncadd [#allocation2], 4294967280 }
   0x5   :  { %16 = sfence }
   0x6   :  { %s27_s19 = sld [smem:[#allocation3]]  ;;  %v23_v0 = vld [vmem:[%s165_s1] sm:$0xff]  ;;  %v24_v2 = vld [vmem:[%s165_s1 + $0x8] sm:$0xff]  ;;  %v25_v3 = vld [vmem:[%s165_s1 + $0x10] sm:$0xff]  ;;  %vm61_vm0 = vcmask 523264  }
   0x7   :  { %s70_s20 = sld [smem:[#allocation3 + $0x1]]  ;;  %v33_v1 = vld [vmem:[%s166_s2] sm:$0xff]  ;;  %v34_v5 = vld [vmem:[%s166_s2 + $0x8] sm:$0xff]  ;;  %v35_v6 = vld [vmem:[%s166_s2 + $0x10] sm:$0xff] }
   0x8   :  { %s71_s21 = sld [smem:[#allocation3 + $0x2]]  ;;  %v47_v4 = vld [vmem:[%s167_s3] sm:$0xff]  ;;  %v48_v8 = vld [vmem:[%s167_s3 + $0x8] sm:$0xff]  ;;  %v49_v9 = vld [vmem:[%s167_s3 + $0x10] sm:$0xff] }
   0x9   :  { %v26_v10 = vld [vmem:[%s165_s1 + $0x18] sm:$0xff] }
   0xa   :  { %v36_v15 = vld [vmem:[%s166_s2 + $0x18] sm:$0xff] }
   0xb   :  { %v50_v20 = vld [vmem:[%s167_s3 + $0x18] sm:$0xff] }
   0xc   :  { %v28_v7 = vstv %s27_s19 }
   0xd   :  { %v29_v11 = vmul.f32 %v28_v7, %v23_v0  ;;  %v38_v12 = vstv %s70_s20  ;;  %v30_v13 = vmul.f32 %v28_v7, %v24_v2  ;;  %v31_v14 = vmul.f32 %v28_v7, %v25_v3 }
   0xe   :  { %v39_v16 = vmul.f32 %v38_v12, %v33_v1  ;;  %v52_v17 = vstv %s71_s21  ;;  %v40_v18 = vmul.f32 %v38_v12, %v34_v5  ;;  %v41_v19 = vmul.f32 %v38_v12, %v35_v6 }
   0xf   :  { %v53_v21 = vmul.f32 %v52_v17, %v47_v4  ;;  %v54_v22 = vmul.f32 %v52_v17, %v48_v8  ;;  %v55_v23 = vmul.f32 %v52_v17, %v49_v9  ;;  %v32_v24 = vmul.f32 %v28_v7, %v26_v10 }
  0x10   :  { %v43_v25 = vadd.f32 %v39_v16, %v29_v11  ;;  %v44_v26 = vadd.f32 %v40_v18, %v30_v13  ;;  %v45_v27 = vadd.f32 %v41_v19, %v31_v14  ;;  %v42_v28 = vmul.f32 %v38_v12, %v36_v15 }
  0x11   :  { %v56_v29 = vmul.f32 %v52_v17, %v50_v20 }
  0x12   :  { %v57_v30 = vadd.f32 %v53_v21, %v43_v25  ;;  %v58_v31 = vadd.f32 %v54_v22, %v44_v26  ;;  %v59_v32 = vadd.f32 %v55_v23, %v45_v27  ;;  %v46_v33 = vadd.f32 %v42_v28, %v32_v24 }
  0x14   :  { %62 = vst.msk [vmem:[%s168_s4] sm:$0xff] %vm61_vm0, %v57_v30  ;;  %v60_v34 = vadd.f32 %v56_v29, %v46_v33 }
  0x15   :  { %63 = vst.msk [vmem:[%s168_s4 + $0x8] sm:$0xff] %vm61_vm0, %v58_v31 }
  0x16   :  { %64 = vst.msk [vmem:[%s168_s4 + $0x10] sm:$0xff] %vm61_vm0, %v59_v32 }
  0x17   :  { %65 = vst.msk [vmem:[%s168_s4 + $0x18] sm:$0xff] %vm61_vm0, %v60_v34 }

// kernel: encoder_forward.21
= control target key start
LH: loop header
LB: loop body
LE: loop exit
PB: predicated region body
PF: predicated region fallthrough
CT: control target
= control target key end

     0   :  { %s105_s21 = smov [#allocation3]   ;;  %s199_s0 = inlined_call_operand.vmem [shape: f32[4], index: 0, kind: input, shape index: {}]   ;;  %s200_s1 = inlined_call_operand.vmem [shape: f32[32,64], index: 1, kind: input, shape index: {}]   ;;  %s201_s2 = inlined_call_operand.vmem [shape: f32[32,64], index: 2, kind: input, shape index: {}]   ;;  %s202_s3 = inlined_call_operand.vmem [shape: f32[32,64], index: 3, kind: input, shape index: {}]   ;;  %s203_s4 = inlined_call_operand.vmem [shape: f32[32,64], index: 4, kind: input, shape index: {}]   ;;  %s204_s5 = inlined_call_operand.vmem [shape: f32[32,64], index: 5, kind: output, shape index: {}]  }
   0x1   :  { %s11_s20 = sshll.u32 %s199_s0, 4  ;;  %s12_s20 = int_to_ptr.vmem [resolvable:$true] %s11_s20 }
   0x2   :  { %14 = dma.vmem_to_smem %s12_s20, 16, %s105_s21, [#allocation2] }
   0x3   :  { %103 = dma.done.wait [#allocation2], 16 }
   0x4   :  { %104 = vsyncadd [#allocation2], 4294967280 }
   0x5   :  { %17 = sfence }
   0x6   :  { %s30_s22 = sld [smem:[#allocation3]]  ;;  %v26_v0 = vld [vmem:[%s200_s1] sm:$0xff]  ;;  %v27_v1 = vld [vmem:[%s200_s1 + $0x8] sm:$0xff]  ;;  %v28_v2 = vld [vmem:[%s200_s1 + $0x10] sm:$0xff]  ;;  %vm78_vm0 = vcmask 523264  }
   0x7   :  { %s87_s23 = sld [smem:[#allocation3 + $0x1]]  ;;  %v36_v3 = vld [vmem:[%s201_s2] sm:$0xff]  ;;  %v37_v4 = vld [vmem:[%s201_s2 + $0x8] sm:$0xff]  ;;  %v38_v5 = vld [vmem:[%s201_s2 + $0x10] sm:$0xff] }
   0x8   :  { %s88_s24 = sld [smem:[#allocation3 + $0x2]]  ;;  %v50_v7 = vld [vmem:[%s202_s3] sm:$0xff]  ;;  %v51_v8 = vld [vmem:[%s202_s3 + $0x8] sm:$0xff]  ;;  %v52_v9 = vld [vmem:[%s202_s3 + $0x10] sm:$0xff] }
   0x9   :  { %s89_s25 = sld [smem:[#allocation3 + $0x3]]  ;;  %v64_v12 = vld [vmem:[%s203_s4] sm:$0xff]  ;;  %v65_v14 = vld [vmem:[%s203_s4 + $0x8] sm:$0xff]  ;;  %v66_v20 = vld [vmem:[%s203_s4 + $0x10] sm:$0xff] }
   0xa   :  { %v29_v21 = vld [vmem:[%s200_s1 + $0x18] sm:$0xff] }
   0xb   :  { %v39_v22 = vld [vmem:[%s201_s2 + $0x18] sm:$0xff] }
   0xc   :  { %v31_v6 = vstv %s30_s22  ;;  %v53_v27 = vld [vmem:[%s202_s3 + $0x18] sm:$0xff] }
   0xd   :  { %v32_v10 = vmul.f32 %v31_v6, %v26_v0  ;;  %v41_v11 = vstv %s87_s23  ;;  %v33_v13 = vmul.f32 %v31_v6, %v27_v1  ;;  %v34_v15 = vmul.f32 %v31_v6, %v28_v2  ;;  %v67_v32 = vld [vmem:[%s203_s4 + $0x18] sm:$0xff] }
   0xe   :  { %v42_v16 = vmul.f32 %v41_v11, %v36_v3  ;;  %v55_v17 = vstv %s88_s24  ;;  %v43_v18 = vmul.f32 %v41_v11, %v37_v4  ;;  %v44_v19 = vmul.f32 %v41_v11, %v38_v5 }
   0xf   :  { %v56_v23 = vmul.f32 %v55_v17, %v50_v7  ;;  %v69_v24 = vstv %s89_s25  ;;  %v57_v25 = vmul.f32 %v55_v17, %v51_v8  ;;  %v58_v26 = vmul.f32 %v55_v17, %v52_v9 }
  0x10   :  { %v46_v28 = vadd.f32 %v42_v16, %v32_v10  ;;  %v70_v29 = vmul.f32 %v69_v24, %v64_v12  ;;  %v47_v30 = vadd.f32 %v43_v18, %v33_v13  ;;  %v71_v31 = vmul.f32 %v69_v24, %v65_v14 }
  0x11   :  { %v48_v33 = vadd.f32 %v44_v19, %v34_v15  ;;  %v72_v34 = vmul.f32 %v69_v24, %v66_v20  ;;  %v35_v35 = vmul.f32 %v31_v6, %v29_v21  ;;  %v45_v36 = vmul.f32 %v41_v11, %v39_v22 }
  0x12   :  { %v60_v37 = vadd.f32 %v56_v23, %v46_v28  ;;  %v61_v38 = vadd.f32 %v57_v25, %v47_v30  ;;  %v59_v39 = vmul.f32 %v55_v17, %v53_v27  ;;  %v73_v42 = vmul.f32 %v69_v24, %v67_v32 }
  0x13   :  { %v62_v40 = vadd.f32 %v58_v26, %v48_v33  ;;  %v49_v41 = vadd.f32 %v45_v36, %v35_v35 }
  0x14   :  { %v74_v43 = vadd.f32 %v70_v29, %v60_v37  ;;  %v75_v44 = vadd.f32 %v71_v31, %v61_v38 }
  0x15   :  { %v76_v45 = vadd.f32 %v72_v34, %v62_v40  ;;  %v63_v46 = vadd.f32 %v59_v39, %v49_v41 }
  0x16   :  { %79 = vst.msk [vmem:[%s204_s5] sm:$0xff] %vm78_vm0, %v74_v43 }
  0x17   :  { %80 = vst.msk [vmem:[%s204_s5 + $0x8] sm:$0xff] %vm78_vm0, %v75_v44  ;;  %v77_v47 = vadd.f32 %v73_v42, %v63_v46 }
  0x18   :  { %81 = vst.msk [vmem:[%s204_s5 + $0x10] sm:$0xff] %vm78_vm0, %v76_v45 }
  0x19   :  { %82 = vst.msk [vmem:[%s204_s5 + $0x18] sm:$0xff] %vm78_vm0, %v77_v47 }

// kernel: encoder_forward.23
= control target key start
LH: loop header
LB: loop body
LE: loop exit
PB: predicated region body
PF: predicated region fallthrough
CT: control target
= control target key end

     0   :  { %s123_s24 = smov [#allocation3]   ;;  %s234_s0 = inlined_call_operand.vmem [shape: f32[5], index: 0, kind: input, shape index: {}]   ;;  %s235_s1 = inlined_call_operand.vmem [shape: f32[32,64], index: 1, kind: input, shape index: {}]   ;;  %s236_s2 = inlined_call_operand.vmem [shape: f32[32,64], index: 2, kind: input, shape index: {}]   ;;  %s237_s3 = inlined_call_operand.vmem [shape: f32[32,64], index: 3, kind: input, shape index: {}]   ;;  %s238_s4 = inlined_call_operand.vmem [shape: f32[32,64], index: 4, kind: input, shape index: {}]   ;;  %s239_s5 = inlined_call_operand.vmem [shape: f32[32,64], index: 5, kind: input, shape index: {}]   ;;  %s240_s6 = inlined_call_operand.vmem [shape: f32[32,64], index: 6, kind: output, shape index: {}]  }
   0x1   :  { %s12_s23 = sshll.u32 %s234_s0, 4  ;;  %s13_s23 = int_to_ptr.vmem [resolvable:$true] %s12_s23 }
   0x2   :  { %15 = dma.vmem_to_smem %s13_s23, 16, %s123_s24, [#allocation2] }
   0x3   :  { %121 = dma.done.wait [#allocation2], 16 }
   0x4   :  { %122 = vsyncadd [#allocation2], 4294967280 }
   0x5   :  { %18 = sfence }
   0x6   :  { %s33_s25 = sld [smem:[#allocation3]]  ;;  %v29_v0 = vld [vmem:[%s235_s1] sm:$0xff]  ;;  %v30_v1 = vld [vmem:[%s235_s1 + $0x8] sm:$0xff]  ;;  %v31_v2 = vld [vmem:[%s235_s1 + $0x10] sm:$0xff]  ;;  %vm95_vm0 = vcmask 523264  }
   0x7   :  { %s104_s26 = sld [smem:[#allocation3 + $0x1]]  ;;  %v39_v3 = vld [vmem:[%s236_s2] sm:$0xff]  ;;  %v40_v4 = vld [vmem:[%s236_s2 + $0x8] sm:$0xff]  ;;  %v41_v5 = vld [vmem:[%s236_s2 + $0x10] sm:$0xff] }
   0x8   :  { %s105_s27 = sld [smem:[#allocation3 + $0x2]]  ;;  %v53_v7 = vld [vmem:[%s237_s3] sm:$0xff]  ;;  %v54_v8 = vld [vmem:[%s237_s3 + $0x8] sm:$0xff]  ;;  %v55_v9 = vld [vmem:[%s237_s3 + $0x10] sm:$0xff] }
   0x9   :  { %s106_s28 = sld [smem:[#allocation3 + $0x3]]  ;;  %v67_v12 = vld [vmem:[%s238_s4] sm:$0xff]  ;;  %v68_v19 = vld [vmem:[%s238_s4 + $0x8] sm:$0xff]  ;;  %v69_v26 = vld [vmem:[%s238_s4 + $0x10] sm:$0xff] }
   0xa   :  { %s107_s7 = sld [smem:[#allocation3 + $0x4]]  ;;  %v81_v17 = vld [vmem:[%s239_s5] sm:$0xff]  ;;  %v82_v20 = vld [vmem:[%s239_s5 + $0x8] sm:$0xff]  ;;  %v83_v27 = vld [vmem:[%s239_s5 + $0x10] sm:$0xff] }
   0xb   :  { %v32_v32 = vld [vmem:[%s235_s1 + $0x18] sm:$0xff] }
   0xc   :  { %v34_v6 = vstv %s33_s25  ;;  %v42_v33 = vld [vmem:[%s236_s2 + $0x18] sm:$0xff] }
   0xd   :  { %v35_v10 = vmul.f32 %v34_v6, %v29_v0  ;;  %v44_v11 = vstv %s104_s26  ;;  %v36_v13 = vmul.f32 %v34_v6, %v30_v1  ;;  %v37_v14 = vmul.f32 %v34_v6, %v31_v2  ;;  %v56_v34 = vld [vmem:[%s237_s3 + $0x18] sm:$0xff] }
   0xe   :  { %v45_v15 = vmul.f32 %v44_v11, %v39_v3  ;;  %v58_v16 = vstv %s105_s27  ;;  %v46_v18 = vmul.f32 %v44_v11, %v40_v4  ;;  %v47_v21 = vmul.f32 %v44_v11, %v41_v5  ;;  %v70_v43 = vld [vmem:[%s238_s4 + $0x18] sm:$0xff] }
   0xf   :  { %v59_v22 = vmul.f32 %v58_v16, %v53_v7  ;;  %v72_v23 = vstv %s106_s28  ;;  %v60_v24 = vmul.f32 %v58_v16, %v54_v8  ;;  %v61_v25 = vmul.f32 %v58_v16, %v55_v9  ;;  %v84_v50 = vld [vmem:[%s239_s5 + $0x18] sm:$0xff] }
  0x10   :  { %v49_v28 = vadd.f32 %v45_v15, %v35_v10  ;;  %v73_v29 = vmul.f32 %v72_v23, %v67_v12  ;;  %v86_v30 = vstv %s107_s7  ;;  %v50_v31 = vadd.f32 %v46_v18, %v36_v13 }
  0x11   :  { %v87_v35 = vmul.f32 %v86_v30, %v81_v17  ;;  %v74_v36 = vmul.f32 %v72_v23, %v68_v19  ;;  %v88_v37 = vmul.f32 %v86_v30, %v82_v20  ;;  %v51_v38 = vadd.f32 %v47_v21, %v37_v14 }
  0x12   :  { %v63_v39 = vadd.f32 %v59_v22, %v49_v28  ;;  %v64_v40 = vadd.f32 %v60_v24, %v50_v31  ;;  %v75_v41 = vmul.f32 %v72_v23, %v69_v26  ;;  %v89_v42 = vmul.f32 %v86_v30, %v83_v27 }
  0x13   :  { %v65_v44 = vadd.f32 %v61_v25, %v51_v38  ;;  %v38_v45 = vmul.f32 %v34_v6, %v32_v32  ;;  %v48_v46 = vmul.f32 %v44_v11, %v42_v33  ;;  %v62_v47 = vmul.f32 %v58_v16, %v56_v34 }
  0x14   :  { %v77_v48 = vadd.f32 %v73_v29, %v63_v39  ;;  %v78_v49 = vadd.f32 %v74_v36, %v64_v40  ;;  %v76_v53 = vmul.f32 %v72_v23, %v70_v43  ;;  %v90_v58 = vmul.f32 %v86_v30, %v84_v50 }
  0x15   :  { %v79_v51 = vadd.f32 %v75_v41, %v65_v44  ;;  %v52_v52 = vadd.f32 %v48_v46, %v38_v45 }
  0x16   :  { %v91_v54 = vadd.f32 %v87_v35, %v77_v48  ;;  %v92_v55 = vadd.f32 %v88_v37, %v78_v49 }
  0x17   :  { %v93_v56 = vadd.f32 %v89_v42, %v79_v51  ;;  %v66_v57 = vadd.f32 %v62_v47, %v52_v52 }
  0x18   :  { %96 = vst.msk [vmem:[%s240_s6] sm:$0xff] %vm95_vm0, %v91_v54 }
  0x19   :  { %97 = vst.msk [vmem:[%s240_s6 + $0x8] sm:$0xff] %vm95_vm0, %v92_v55  ;;  %v80_v59 = vadd.f32 %v76_v53, %v66_v57 }
  0x1a   :  { %98 = vst.msk [vmem:[%s240_s6 + $0x10] sm:$0xff] %vm95_vm0, %v93_v56 }
  0x1b   :  { %v94_v60 = vadd.f32 %v90_v58, %v80_v59 }
  0x1d   :  { %99 = vst.msk [vmem:[%s240_s6 + $0x18] sm:$0xff] %vm95_vm0, %v94_v60 }

</bundles_post_ra>
